<compile_context>
chip_gen: v5e
topology: v5e:2x2
jax: 0.10.0
libtpu: 0.0.40
codegen_flags: <defaults>
</compile_context>

<pallas_src>
import jax
import jax.numpy as jnp
from jax import lax
from jax.experimental import pallas as pl
from jax.experimental.pallas import tpu as pltpu

# SELU constants (match torch.nn.SELU)
_SELU_ALPHA = 1.6732632423543772
_SELU_SCALE = 1.0507009873554805


def _selu(x):
    return _SELU_SCALE * jnp.where(x > 0, x, _SELU_ALPHA * (jnp.exp(x) - 1.0))


def _embedding_kernel(s1_ref, s2_ref,
                      w1_ref, b1_ref, w2_ref, b2_ref, w3_ref, b3_ref,
                      out_ref):
    """One batch tile: fused MLP (both inputs in one matmul chain) + cosine."""
    tb = s1_ref.shape[0]

    # Fuse the two inputs along M so each weight RHS is reused for 2*TB rows.
    x = jnp.concatenate([s1_ref[...], s2_ref[...]], axis=0)        # [2*TB, Kp]

    h = jnp.dot(x, w1_ref[...], preferred_element_type=jnp.float32) + b1_ref[...]
    h = _selu(h)                                                   # f32 epilogue
    h = jnp.dot(h.astype(w2_ref.dtype), w2_ref[...],
                preferred_element_type=jnp.float32) + b2_ref[...]
    h = _selu(h)
    e = jnp.dot(h.astype(w3_ref.dtype), w3_ref[...],
                preferred_element_type=jnp.float32) + b3_ref[...]  # [2*TB, Ep]

    e1 = e[:tb]
    e2 = e[tb:]
    dot = jnp.sum(e1 * e2, axis=1)      # row-wise dot == diag(e1 @ e2.T)
    n1sq = jnp.sum(e1 * e1, axis=1)
    n2sq = jnp.sum(e2 * e2, axis=1)
    cos = dot * lax.rsqrt(n1sq * n2sq)  # EUP rsqrt: no sqrt+divide on the VPU
    out_ref[...] = ((cos + 1.0) * 0.5).reshape(1, tb)   # lane-dense store


def _pad_axis(x, axis, mult):
    pad = (-x.shape[axis]) % mult
    if pad == 0:
        return x
    widths = [(0, 0)] * x.ndim
    widths[axis] = (0, pad)
    return jnp.pad(x, widths)


def embedding_forward(s1, s2, params, *, tb=128, compute_dtype=jnp.float32):
    """params = (w1, b1, w2, b2, w3, b3); wK stored [in, out], bK are [1, out].

    tb: batch tile (rows per grid step). 128 gives effective M = 2*tb = 256
        after the in-kernel s1/s2 fusion (fills the MXU on all generations).
    compute_dtype: dtype fed to the MXU (f32 or bf16); accumulation and the
        SELU/cosine epilogue stay f32 on every generation.
    """
    w1, b1, w2, b2, w3, b3 = params
    B = s1.shape[0]

    # Lane-align feature dims (K of first matmul, N of last matmul) to 128.
    s1 = _pad_axis(s1, 1, 128)
    s2 = _pad_axis(s2, 1, 128)
    w1 = _pad_axis(w1, 0, 128)
    w3 = _pad_axis(w3, 1, 128)
    b3 = _pad_axis(b3, 1, 128)

    # Pad batch to the tile size; cast matmul operands.
    s1 = _pad_axis(s1, 0, tb).astype(compute_dtype)
    s2 = _pad_axis(s2, 0, tb).astype(compute_dtype)
    w1 = w1.astype(compute_dtype)
    w2 = w2.astype(compute_dtype)
    w3 = w3.astype(compute_dtype)
    b1 = b1.astype(jnp.float32)
    b2 = b2.astype(jnp.float32)
    b3 = b3.astype(jnp.float32)

    Bp, Kp = s1.shape
    num_tiles = Bp // tb

    def resident(a):  # weights/biases: constant block index, stay in VMEM
        return pl.BlockSpec(a.shape, lambda i: (0, 0))

    out = pl.pallas_call(
        _embedding_kernel,
        out_shape=jax.ShapeDtypeStruct((num_tiles, tb), jnp.float32),
        grid=(num_tiles,),
        in_specs=[
            pl.BlockSpec((tb, Kp), lambda i: (i, 0)),   # s1 tile (streamed)
            pl.BlockSpec((tb, Kp), lambda i: (i, 0)),   # s2 tile (streamed)
            resident(w1), resident(b1),
            resident(w2), resident(b2),
            resident(w3), resident(b3),
        ],
        out_specs=pl.BlockSpec((1, tb), lambda i: (i, 0)),   # lane-dense output
        compiler_params=pltpu.CompilerParams(
            dimension_semantics=("parallel",)),              # v7x dual-TC
    )(s1, s2, w1, b1, w2, b2, w3, b3)

    return out.reshape(-1)[:B]   # drop batch padding -> shape [B]


def init_params(key, num_state, num_embedding, num_hidden=256):
    """Deterministic init mirroring the PyTorch module:
       weights: kaiming_normal_(fan_in, linear)  -> N(0, 1/fan_in)
       biases : default torch Linear init        -> U(-1/sqrt(fan_in), 1/sqrt(fan_in))
       (weights stored pre-transposed as [in, out])
    """
    ks = jax.random.split(key, 6)

    def kaiming(k, fan_in, fan_out):
        std = 1.0 / jnp.sqrt(fan_in)
        return jax.random.normal(k, (fan_in, fan_out), jnp.float32) * std

    def bias(k, fan_in, fan_out):
        bound = 1.0 / jnp.sqrt(fan_in)
        return jax.random.uniform(k, (1, fan_out), jnp.float32, -bound, bound)

    w1 = kaiming(ks[0], num_state, num_hidden)
    b1 = bias(ks[1], num_state, num_hidden)
    w2 = kaiming(ks[2], num_hidden, num_hidden)
    b2 = bias(ks[3], num_hidden, num_hidden)
    w3 = kaiming(ks[4], num_hidden, num_embedding)
    b3 = bias(ks[5], num_hidden, num_embedding)
    return (w1, b1, w2, b2, w3, b3)


if __name__ == "__main__":
    key = jax.random.PRNGKey(0)
    k_p, k_s1, k_s2 = jax.random.split(key, 3)

    B = 8            # batch
    NUM_STATE = 32   # state dim
    NUM_EMBED = 64   # embedding dim

    params = init_params(k_p, NUM_STATE, NUM_EMBED)
    s1 = jax.random.normal(k_s1, (B, NUM_STATE), jnp.float32)
    s2 = jax.random.normal(k_s2, (B, NUM_STATE), jnp.float32)

    # pure-JAX reference (matches the torch module semantics, no eps clamp)
    def mlp_ref(x, p):
        w1, b1, w2, b2, w3, b3 = p
        h = _selu(x @ w1 + b1)
        h = _selu(h @ w2 + b2)
        return h @ w3 + b3

    e1, e2 = mlp_ref(s1, params), mlp_ref(s2, params)
    cos = jnp.sum(e1 * e2, axis=1) / (
        jnp.linalg.norm(e1, axis=1) * jnp.linalg.norm(e2, axis=1))
    ref = (cos + 1.0) / 2.0

    # f32 path: bitwise-faithful to the module, tight tolerance.
    out_f32 = embedding_forward(s1, s2, params, tb=128,
                                compute_dtype=jnp.float32)
    jax.block_until_ready(out_f32)
    assert out_f32.shape == (B,)
    assert jnp.allclose(out_f32, ref, atol=1e-5, rtol=1e-5), (out_f32, ref)

    # bf16-matmul fast path (f32 accumulation + f32 epilogue): looser tolerance.
    out_bf16 = embedding_forward(s1, s2, params, tb=128,
                                 compute_dtype=jnp.bfloat16)
    jax.block_until_ready(out_bf16)
    assert jnp.allclose(out_bf16, ref, atol=5e-2, rtol=5e-2), (out_bf16, ref)

    print("KERNEL_OK")
</pallas_src>

<mosaic_0001>
module attributes {stable_mosaic.version = 11 : i64} {
  func.func @_embedding_kernel(%arg0: i32, %arg1: memref<128x128xf32, #tpu.memory_space<vmem>>, %arg2: memref<128x128xf32, #tpu.memory_space<vmem>>, %arg3: memref<128x256xf32, #tpu.memory_space<vmem>>, %arg4: memref<1x256xf32, #tpu.memory_space<vmem>>, %arg5: memref<256x256xf32, #tpu.memory_space<vmem>>, %arg6: memref<1x256xf32, #tpu.memory_space<vmem>>, %arg7: memref<256x128xf32, #tpu.memory_space<vmem>>, %arg8: memref<1x128xf32, #tpu.memory_space<vmem>>, %arg9: memref<1x128xf32, #tpu.memory_space<vmem>>) attributes {dimension_semantics = [#tpu.dimension_semantics<parallel>], iteration_bounds = array<i64: 1>, scalar_prefetch = 0 : i64, scratch_operands = 0 : i64, tpu.core_type = #tpu.core_type<tc>, window_params = [{transform_indices = @transform_0, window_bounds = array<i64: 128, 128>}, {transform_indices = @transform_1, window_bounds = array<i64: 128, 128>}, {pipeline_mode = #tpu.pipeline_mode<synchronous>, transform_indices = @transform_2, window_bounds = array<i64: 128, 256>}, {pipeline_mode = #tpu.pipeline_mode<synchronous>, transform_indices = @transform_3, window_bounds = array<i64: 1, 256>}, {pipeline_mode = #tpu.pipeline_mode<synchronous>, transform_indices = @transform_4, window_bounds = array<i64: 256, 256>}, {pipeline_mode = #tpu.pipeline_mode<synchronous>, transform_indices = @transform_5, window_bounds = array<i64: 1, 256>}, {pipeline_mode = #tpu.pipeline_mode<synchronous>, transform_indices = @transform_6, window_bounds = array<i64: 256, 128>}, {pipeline_mode = #tpu.pipeline_mode<synchronous>, transform_indices = @transform_7, window_bounds = array<i64: 1, 128>}, {transform_indices = @transform_8, window_bounds = array<i64: 1, 128>}]} {
    %c0 = arith.constant 0 : index
    %c0_0 = arith.constant 0 : index
    %0 = vector.load %arg1[%c0, %c0_0] : memref<128x128xf32, #tpu.memory_space<vmem>>, vector<128x128xf32>
    %c0_1 = arith.constant 0 : index
    %c0_2 = arith.constant 0 : index
    %1 = vector.load %arg2[%c0_1, %c0_2] : memref<128x128xf32, #tpu.memory_space<vmem>>, vector<128x128xf32>
    %2 = tpu.concatenate %0, %1 in 0 : vector<128x128xf32>, vector<128x128xf32> -> vector<256x128xf32>
    %c0_3 = arith.constant 0 : index
    %c0_4 = arith.constant 0 : index
    %3 = vector.load %arg3[%c0_3, %c0_4] : memref<128x256xf32, #tpu.memory_space<vmem>>, vector<128x256xf32>
    %cst = arith.constant dense<0.000000e+00> : vector<256x256xf32>
    %4 = tpu.matmul %2, %3, %cst {dimension_numbers = #tpu.dot_dimension_numbers<[1], [0], [0], [1], [0, 0, 1, 1], [], []>} : vector<256x128xf32>, vector<128x256xf32>, vector<256x256xf32> -> vector<256x256xf32>
    %c0_5 = arith.constant 0 : index
    %c0_6 = arith.constant 0 : index
    %5 = vector.load %arg4[%c0_5, %c0_6] : memref<1x256xf32, #tpu.memory_space<vmem>>, vector<1x256xf32>
    %6 = vector.broadcast %5 : vector<1x256xf32> to vector<256x256xf32>
    %7 = arith.addf %4, %6 : vector<256x256xf32>
    %cst_7 = arith.constant 0.000000e+00 : f32
    %8 = vector.broadcast %cst_7 : f32 to vector<256x256xf32>
    %9 = arith.cmpf ogt, %7, %8 : vector<256x256xf32>
    %10 = math.exp %7 : vector<256x256xf32>
    %cst_8 = arith.constant 1.000000e+00 : f32
    %11 = vector.broadcast %cst_8 : f32 to vector<256x256xf32>
    %12 = arith.subf %10, %11 : vector<256x256xf32>
    %cst_9 = arith.constant 1.67326319 : f32
    %13 = vector.broadcast %cst_9 : f32 to vector<256x256xf32>
    %14 = arith.mulf %13, %12 : vector<256x256xf32>
    %15 = arith.select %9, %7, %14 : vector<256x256xi1>, vector<256x256xf32>
    %cst_10 = arith.constant 1.05070102 : f32
    %16 = vector.broadcast %cst_10 : f32 to vector<256x256xf32>
    %17 = arith.mulf %16, %15 : vector<256x256xf32>
    %c0_11 = arith.constant 0 : index
    %c0_12 = arith.constant 0 : index
    %18 = vector.load %arg5[%c0_11, %c0_12] : memref<256x256xf32, #tpu.memory_space<vmem>>, vector<256x256xf32>
    %cst_13 = arith.constant dense<0.000000e+00> : vector<256x256xf32>
    %19 = tpu.matmul %17, %18, %cst_13 {dimension_numbers = #tpu.dot_dimension_numbers<[1], [0], [0], [1], [0, 0, 1, 1], [], []>} : vector<256x256xf32>, vector<256x256xf32>, vector<256x256xf32> -> vector<256x256xf32>
    %c0_14 = arith.constant 0 : index
    %c0_15 = arith.constant 0 : index
    %20 = vector.load %arg6[%c0_14, %c0_15] : memref<1x256xf32, #tpu.memory_space<vmem>>, vector<1x256xf32>
    %21 = vector.broadcast %20 : vector<1x256xf32> to vector<256x256xf32>
    %22 = arith.addf %19, %21 : vector<256x256xf32>
    %cst_16 = arith.constant 0.000000e+00 : f32
    %23 = vector.broadcast %cst_16 : f32 to vector<256x256xf32>
    %24 = arith.cmpf ogt, %22, %23 : vector<256x256xf32>
    %25 = math.exp %22 : vector<256x256xf32>
    %cst_17 = arith.constant 1.000000e+00 : f32
    %26 = vector.broadcast %cst_17 : f32 to vector<256x256xf32>
    %27 = arith.subf %25, %26 : vector<256x256xf32>
    %cst_18 = arith.constant 1.67326319 : f32
    %28 = vector.broadcast %cst_18 : f32 to vector<256x256xf32>
    %29 = arith.mulf %28, %27 : vector<256x256xf32>
    %30 = arith.select %24, %22, %29 : vector<256x256xi1>, vector<256x256xf32>
    %cst_19 = arith.constant 1.05070102 : f32
    %31 = vector.broadcast %cst_19 : f32 to vector<256x256xf32>
    %32 = arith.mulf %31, %30 : vector<256x256xf32>
    %c0_20 = arith.constant 0 : index
    %c0_21 = arith.constant 0 : index
    %33 = vector.load %arg7[%c0_20, %c0_21] : memref<256x128xf32, #tpu.memory_space<vmem>>, vector<256x128xf32>
    %cst_22 = arith.constant dense<0.000000e+00> : vector<256x128xf32>
    %34 = tpu.matmul %32, %33, %cst_22 {dimension_numbers = #tpu.dot_dimension_numbers<[1], [0], [0], [1], [0, 0, 1, 1], [], []>} : vector<256x256xf32>, vector<256x128xf32>, vector<256x128xf32> -> vector<256x128xf32>
    %c0_23 = arith.constant 0 : index
    %c0_24 = arith.constant 0 : index
    %35 = vector.load %arg8[%c0_23, %c0_24] : memref<1x128xf32, #tpu.memory_space<vmem>>, vector<1x128xf32>
    %36 = vector.broadcast %35 : vector<1x128xf32> to vector<256x128xf32>
    %37 = arith.addf %34, %36 : vector<256x128xf32>
    %38 = vector.extract_strided_slice %37 {offsets = [0, 0], sizes = [128, 128], strides = [1, 1]} : vector<256x128xf32> to vector<128x128xf32>
    %39 = vector.extract_strided_slice %37 {offsets = [128, 0], sizes = [128, 128], strides = [1, 1]} : vector<256x128xf32> to vector<128x128xf32>
    %40 = arith.mulf %38, %39 : vector<128x128xf32>
    %cst_25 = arith.constant dense<0.000000e+00> : vector<128xf32>
    %41 = vector.multi_reduction <add>, %40, %cst_25 [1] : vector<128x128xf32> to vector<128xf32>
    %42 = arith.mulf %38, %38 : vector<128x128xf32>
    %cst_26 = arith.constant dense<0.000000e+00> : vector<128xf32>
    %43 = vector.multi_reduction <add>, %42, %cst_26 [1] : vector<128x128xf32> to vector<128xf32>
    %44 = arith.mulf %39, %39 : vector<128x128xf32>
    %cst_27 = arith.constant dense<0.000000e+00> : vector<128xf32>
    %45 = vector.multi_reduction <add>, %44, %cst_27 [1] : vector<128x128xf32> to vector<128xf32>
    %46 = arith.mulf %43, %45 : vector<128xf32>
    %47 = math.rsqrt %46 : vector<128xf32>
    %48 = arith.mulf %41, %47 : vector<128xf32>
    %cst_28 = arith.constant 1.000000e+00 : f32
    %49 = vector.broadcast %cst_28 : f32 to vector<128xf32>
    %50 = arith.addf %48, %49 : vector<128xf32>
    %cst_29 = arith.constant 5.000000e-01 : f32
    %51 = vector.broadcast %cst_29 : f32 to vector<128xf32>
    %52 = arith.mulf %50, %51 : vector<128xf32>
    %53 = vector.shape_cast %52 : vector<128xf32> to vector<1x128xf32>
    %c0_30 = arith.constant 0 : index
    %c0_31 = arith.constant 0 : index
    %54 = vector.load %arg9[%c0_30, %c0_31] : memref<1x128xf32, #tpu.memory_space<vmem>>, vector<1x128xf32>
    tpu.vector_store %arg9[%c0_30, %c0_31], %53 {strides = array<i32>} : memref<1x128xf32, #tpu.memory_space<vmem>>, vector<1x128xf32>,
    return
  }
  func.func @transform_0(%arg0: i32) -> (i32, i32) {
    %c0_i32 = arith.constant 0 : i32
    %c0_i32_0 = arith.constant 0 : i32
    return %arg0, %c0_i32 : i32, i32
  }
  func.func @transform_1(%arg0: i32) -> (i32, i32) {
    %c0_i32 = arith.constant 0 : i32
    %c0_i32_0 = arith.constant 0 : i32
    return %arg0, %c0_i32 : i32, i32
  }
  func.func @transform_2(%arg0: i32) -> (i32, i32) {
    %c0_i32 = arith.constant 0 : i32
    %c0_i32_0 = arith.constant 0 : i32
    %c0_i32_1 = arith.constant 0 : i32
    return %c0_i32, %c0_i32_0 : i32, i32
  }
  func.func @transform_3(%arg0: i32) -> (i32, i32) {
    %c0_i32 = arith.constant 0 : i32
    %c0_i32_0 = arith.constant 0 : i32
    %c0_i32_1 = arith.constant 0 : i32
    return %c0_i32, %c0_i32_0 : i32, i32
  }
  func.func @transform_4(%arg0: i32) -> (i32, i32) {
    %c0_i32 = arith.constant 0 : i32
    %c0_i32_0 = arith.constant 0 : i32
    %c0_i32_1 = arith.constant 0 : i32
    return %c0_i32, %c0_i32_0 : i32, i32
  }
  func.func @transform_5(%arg0: i32) -> (i32, i32) {
    %c0_i32 = arith.constant 0 : i32
    %c0_i32_0 = arith.constant 0 : i32
    %c0_i32_1 = arith.constant 0 : i32
    return %c0_i32, %c0_i32_0 : i32, i32
  }
  func.func @transform_6(%arg0: i32) -> (i32, i32) {
    %c0_i32 = arith.constant 0 : i32
    %c0_i32_0 = arith.constant 0 : i32
    %c0_i32_1 = arith.constant 0 : i32
    return %c0_i32, %c0_i32_0 : i32, i32
  }
  func.func @transform_7(%arg0: i32) -> (i32, i32) {
    %c0_i32 = arith.constant 0 : i32
    %c0_i32_0 = arith.constant 0 : i32
    %c0_i32_1 = arith.constant 0 : i32
    return %c0_i32, %c0_i32_0 : i32, i32
  }
  func.func @transform_8(%arg0: i32) -> (i32, i32) {
    %c0_i32 = arith.constant 0 : i32
    %c0_i32_0 = arith.constant 0 : i32
    return %arg0, %c0_i32 : i32, i32
  }
}

</mosaic_0001>

<bundles_post_ra>
// kernel: tpu_custom_call.1
= control target key start
LH: loop header
LB: loop body
LE: loop exit
PB: predicated region body
PF: predicated region fallthrough
CT: control target
= control target key end

     0   :  { %13 = vsyncpa [#allocation3], 0  ;;  %s4207_s0 = inlined_call_operand.hbm [shape: f32[128,128], index: 0, kind: input, shape index: {}]   ;;  %s4208_s1 = inlined_call_operand.hbm [shape: f32[128,128], index: 1, kind: input, shape index: {}]   ;;  %s4209_s2 = inlined_call_operand.hbm [shape: f32[128,256], index: 2, kind: input, shape index: {}]   ;;  %s4210_s3 = inlined_call_operand.vmem [shape: f32[1,256], index: 3, kind: input, shape index: {}]   ;;  %s4211_s4 = inlined_call_operand.hbm [shape: f32[256,256], index: 4, kind: input, shape index: {}]   ;;  %s4212_s5 = inlined_call_operand.vmem [shape: f32[1,256], index: 5, kind: input, shape index: {}]   ;;  %s4213_s6 = inlined_call_operand.hbm [shape: f32[256,128], index: 6, kind: input, shape index: {}]   ;;  %s4214_s7 = inlined_call_operand.vmem [shape: f32[1,128], index: 7, kind: input, shape index: {}]   ;;  %s4215_s8 = inlined_call_operand.hbm [shape: f32[1,128], index: 8, kind: output, shape index: {}]  }
   0x1   :  { %14 = vsyncpa [#allocation6], 0 }
   0x2   :  { %15 = vsyncpa [#allocation9], 0 }
   0x3   :  { %16 = vsyncpa [#allocation4], 0  ;;  %s34_s29 = sshll.u32 %s4208_s1, 4  ;;  %s3132_s30 = smov [#allocation5]   ;;  %s35_s29 = int_to_ptr.hbm [resolvable:$true] %s34_s29 }
   0x4   :  { %s36_s9 = sshll.u32 %s3132_s30, 4  ;;  %s3133_s10 = smov 128   ;;  %s37_s9 = int_to_ptr.vmem [resolvable:$true] %s36_s9 }
   0x5   :  { %s3134_s11 = smov 8   ;;  %s62_s14 = sshll.u32 %s4211_s4, 4  ;;  %s63_s14 = int_to_ptr.hbm [resolvable:$true] %s62_s14 }
   0x6   :  { %42 = dma.hbm_to_vmem [thread:$0]  %s35_s29, 2048, %s37_s9, [#allocation6], %s3133_s10, %s3133_s10, %s3134_s11  }
   0x7   :  { %s3135_s15 = smov [#allocation8]   ;;  %s21_s1 = sshll.u32 %s4207_s0, 4  ;;  %s22_s1 = int_to_ptr.hbm [resolvable:$true] %s21_s1 }
   0x8   :  { %s64_s16 = sshll.u32 %s3135_s15, 4  ;;  %s3136_s19 = smov 256   ;;  %s65_s16 = int_to_ptr.vmem [resolvable:$true] %s64_s16 }
   0x9   :  { %s3137_s20 = smov 16   ;;  %s47_s23 = sshll.u32 %s4209_s2, 4  ;;  %s48_s23 = int_to_ptr.hbm [resolvable:$true] %s47_s23 }
   0xa   :  { %70 = dma.hbm_to_vmem [thread:$0]  %s63_s14, 8192, %s65_s16, [#allocation9], %s3136_s19, %s3136_s19, %s3137_s20  }
   0xb   :  { %s3138_s24 = smov [#allocation2]   ;;  %s3139_s4 = smov [#allocation7]  }
   0xc   :  { %s23_s25 = sshll.u32 %s3138_s24, 4  ;;  %s49_s26 = sshll.u32 %s3139_s4, 4  ;;  %s24_s25 = int_to_ptr.vmem [resolvable:$true] %s23_s25  ;;  %s50_s26 = int_to_ptr.vmem [resolvable:$true] %s49_s26 }
   0xd   :  { %29 = dma.hbm_to_vmem [thread:$0]  %s22_s1, 2048, %s24_s25, [#allocation3], %s3133_s10, %s3133_s10, %s3134_s11  }
   0xe   :  { %s77_s28 = sshll.u32 %s4213_s6, 4  ;;  %s3140_s29 = smov [#allocation10]   ;;  %s78_s28 = int_to_ptr.hbm [resolvable:$true] %s77_s28 }
   0xf   :  { %55 = dma.hbm_to_vmem [thread:$0]  %s48_s23, 4096, %s50_s26, [#allocation6], %s3136_s19, %s3136_s19, %s3137_s20  }
  0x10   :  { %s79_s30 = sshll.u32 %s3140_s29, 4  ;;  %s80_s30 = int_to_ptr.vmem [resolvable:$true] %s79_s30 }
  0x11   :  { %85 = dma.hbm_to_vmem [thread:$0]  %s78_s28, 4096, %s80_s30, [#allocation9], %s3133_s10, %s3133_s10, %s3134_s11  }
  0x12   :  { %3124 = dma.done.wait [#allocation3], 2048  }
  0x13   :  { %3125 = vsyncadd [#allocation3], 4294965248 }
  0x14   :  { %3126 = dma.done.wait [#allocation6], 6144  }
  0x15   :  { %3127 = vsyncadd [#allocation6], 4294961152 }
  0x16   :  { %3128 = dma.done.wait [#allocation9], 12288  }
  0x17   :  { %3129 = vsyncadd [#allocation9], 4294955008  ;;  %v170_v0 = vld [vmem:[#allocation7 + $0xf0] sm:$0xff]  ;;  %v171_v1 = vld [vmem:[#allocation7 + $0xf8] sm:$0xff]  ;;  %s2540_s16 = sshll.u32 %s4215_s8, 4  ;;  %s2541_s16 = int_to_ptr.hbm [resolvable:$true] %s2540_s16 }
  0x18   :  { %v168_v2 = vld [vmem:[#allocation7 + $0xe0] sm:$0xff]  ;;  %178 = vmatpush.msra.mxu0 %v170_v0  ;;  %291 = vmatpush.msra.mxu1 %v171_v1  ;;  %v169_v3 = vld [vmem:[#allocation7 + $0xe8] sm:$0xff]  ;;  %v166_v4 = vld [vmem:[#allocation7 + $0xd0] sm:$0xff] }
  0x19   :  { %v167_v5 = vld [vmem:[#allocation7 + $0xd8] sm:$0xff]  ;;  %v164_v6 = vld [vmem:[#allocation7 + $0xc0] sm:$0xff]  ;;  %v165_v7 = vld [vmem:[#allocation7 + $0xc8] sm:$0xff] }
  0x1a   :  { %179 = vmatpush.msra.mxu0 %v168_v2  ;;  %292 = vmatpush.msra.mxu1 %v169_v3  ;;  %v162_v8 = vld [vmem:[#allocation7 + $0xb0] sm:$0xff]  ;;  %v163_v9 = vld [vmem:[#allocation7 + $0xb8] sm:$0xff]  ;;  %v160_v10 = vld [vmem:[#allocation7 + $0xa0] sm:$0xff] }
  0x1b   :  { %v161_v11 = vld [vmem:[#allocation7 + $0xa8] sm:$0xff]  ;;  %v158_v12 = vld [vmem:[#allocation7 + $0x90] sm:$0xff]  ;;  %v159_v13 = vld [vmem:[#allocation7 + $0x98] sm:$0xff] }
  0x1c   :  { %180 = vmatpush.msra.mxu0 %v166_v4  ;;  %293 = vmatpush.msra.mxu1 %v167_v5  ;;  %v156_v14 = vld [vmem:[#allocation7 + $0x80] sm:$0xff]  ;;  %v157_v15 = vld [vmem:[#allocation7 + $0x88] sm:$0xff]  ;;  %v154_v16 = vld [vmem:[#allocation7 + $0x70] sm:$0xff] }
  0x1d   :  { %v155_v17 = vld [vmem:[#allocation7 + $0x78] sm:$0xff]  ;;  %v152_v18 = vld [vmem:[#allocation7 + $0x60] sm:$0xff]  ;;  %v153_v19 = vld [vmem:[#allocation7 + $0x68] sm:$0xff] }
  0x1e   :  { %181 = vmatpush.msra.mxu0 %v164_v6  ;;  %294 = vmatpush.msra.mxu1 %v165_v7  ;;  %v150_v20 = vld [vmem:[#allocation7 + $0x50] sm:$0xff]  ;;  %v151_v21 = vld [vmem:[#allocation7 + $0x58] sm:$0xff]  ;;  %v148_v22 = vld [vmem:[#allocation7 + $0x40] sm:$0xff] }
  0x1f   :  { %v149_v23 = vld [vmem:[#allocation7 + $0x48] sm:$0xff]  ;;  %v146_v24 = vld [vmem:[#allocation7 + $0x30] sm:$0xff]  ;;  %v147_v25 = vld [vmem:[#allocation7 + $0x38] sm:$0xff] }
  0x20   :  { %182 = vmatpush.msra.mxu0 %v162_v8  ;;  %295 = vmatpush.msra.mxu1 %v163_v9  ;;  %v144_v26 = vld [vmem:[#allocation7 + $0x20] sm:$0xff]  ;;  %v145_v27 = vld [vmem:[#allocation7 + $0x28] sm:$0xff]  ;;  %v142_v28 = vld [vmem:[#allocation7 + $0x10] sm:$0xff] }
  0x21   :  { %v143_v29 = vld [vmem:[#allocation7 + $0x18] sm:$0xff]  ;;  %v140_v30 = vld [vmem:[#allocation7] sm:$0xff]  ;;  %v141_v31 = vld [vmem:[#allocation7 + $0x8] sm:$0xff] }
  0x22   :  { %183 = vmatpush.msra.mxu0 %v160_v10  ;;  %296 = vmatpush.msra.mxu1 %v161_v11  ;;  %v108_v32 = vld [vmem:[#allocation2] sm:$0xff]  ;;  %v883_v33 = vld [vmem:[#allocation8 + $0xf8] sm:$0xff]  ;;  %v881_v35 = vld [vmem:[#allocation8 + $0xe8] sm:$0xff] }
  0x23   :  { %v915_v34 = vld [vmem:[#allocation8 + $0x1f8] sm:$0xff]  ;;  %v913_v36 = vld [vmem:[#allocation8 + $0x1e8] sm:$0xff]  ;;  %v110_v40 = vld [vmem:[#allocation2 + $0x10] sm:$0xff] }
  0x24   :  { %184 = vmatpush.msra.mxu0 %v158_v12  ;;  %297 = vmatpush.msra.mxu1 %v159_v13  ;;  %v879_v37 = vld [vmem:[#allocation8 + $0xd8] sm:$0xff]  ;;  %v109_v39 = vld [vmem:[#allocation2 + $0x8] sm:$0xff]  ;;  %v112_v44 = vld [vmem:[#allocation2 + $0x20] sm:$0xff] }
  0x25   :  { %v911_v38 = vld [vmem:[#allocation8 + $0x1d8] sm:$0xff]  ;;  %v877_v41 = vld [vmem:[#allocation8 + $0xc8] sm:$0xff]  ;;  %v114_v48 = vld [vmem:[#allocation2 + $0x30] sm:$0xff] }
  0x26   :  { %185 = vmatpush.msra.mxu0 %v156_v14  ;;  %298 = vmatpush.msra.mxu1 %v157_v15  ;;  %v909_v42 = vld [vmem:[#allocation8 + $0x1c8] sm:$0xff]  ;;  %v111_v43 = vld [vmem:[#allocation2 + $0x18] sm:$0xff]  ;;  %v116_v52 = vld [vmem:[#allocation2 + $0x40] sm:$0xff] }
  0x27   :  { %v875_v45 = vld [vmem:[#allocation8 + $0xb8] sm:$0xff]  ;;  %v113_v47 = vld [vmem:[#allocation2 + $0x28] sm:$0xff]  ;;  %v118_v56 = vld [vmem:[#allocation2 + $0x50] sm:$0xff] }
  0x28   :  { %186 = vmatpush.msra.mxu0 %v154_v16  ;;  %299 = vmatpush.msra.mxu1 %v155_v17  ;;  %v907_v46 = vld [vmem:[#allocation8 + $0x1b8] sm:$0xff]  ;;  %v873_v49 = vld [vmem:[#allocation8 + $0xa8] sm:$0xff]  ;;  %v882_v58 = vld [vmem:[#allocation8 + $0xf0] sm:$0xff] }
  0x29   :  { %v905_v50 = vld [vmem:[#allocation8 + $0x1a8] sm:$0xff]  ;;  %v115_v51 = vld [vmem:[#allocation2 + $0x38] sm:$0xff]  ;;  %v914_v59 = vld [vmem:[#allocation8 + $0x1f0] sm:$0xff]  ;;  %922 = vmatpush.msra.mxu2 %v882_v58 }
  0x2a   :  { %187 = vmatpush.msra.mxu0 %v152_v18  ;;  %300 = vmatpush.msra.mxu1 %v153_v19  ;;  %v871_v53 = vld [vmem:[#allocation8 + $0x98] sm:$0xff]  ;;  %v117_v55 = vld [vmem:[#allocation2 + $0x48] sm:$0xff]  ;;  %v880_v61 = vld [vmem:[#allocation8 + $0xe0] sm:$0xff] }
  0x2b   :  { %v903_v54 = vld [vmem:[#allocation8 + $0x198] sm:$0xff]  ;;  %v869_v57 = vld [vmem:[#allocation8 + $0x88] sm:$0xff]  ;;  %v912_v62 = vld [vmem:[#allocation8 + $0x1e0] sm:$0xff]  ;;  %1035 = vmatpush.msra.mxu3 %v914_v59  ;;  %923 = vmatpush.msra.mxu2 %v880_v61 }
  0x2c   :  { %188 = vmatpush.msra.mxu0 %v150_v20  ;;  %301 = vmatpush.msra.mxu1 %v151_v21  ;;  %v901_v60 = vld [vmem:[#allocation8 + $0x188] sm:$0xff]  ;;  %v878_v63 = vld [vmem:[#allocation8 + $0xd0] sm:$0xff]  ;;  %v876_v1 = vld [vmem:[#allocation8 + $0xc0] sm:$0xff] }
  0x2d   :  { %v910_v0 = vld [vmem:[#allocation8 + $0x1d0] sm:$0xff]  ;;  %1036 = vmatpush.msra.mxu3 %v912_v62  ;;  %v119_v2 = vld [vmem:[#allocation2 + $0x58] sm:$0xff]  ;;  %924 = vmatpush.msra.mxu2 %v878_v63  ;;  %v908_v3 = vld [vmem:[#allocation8 + $0x1c0] sm:$0xff] }
  0x2e   :  { %189 = vmatpush.msra.mxu0 %v148_v22  ;;  %302 = vmatpush.msra.mxu1 %v149_v23  ;;  %v874_v4 = vld [vmem:[#allocation8 + $0xb0] sm:$0xff]  ;;  %v872_v6 = vld [vmem:[#allocation8 + $0xa0] sm:$0xff]  ;;  %v867_v15 = vld [vmem:[#allocation8 + $0x78] sm:$0xff] }
  0x2f   :  { %1037 = vmatpush.msra.mxu3 %v910_v0  ;;  %925 = vmatpush.msra.mxu2 %v876_v1  ;;  %v906_v5 = vld [vmem:[#allocation8 + $0x1b0] sm:$0xff]  ;;  %v904_v7 = vld [vmem:[#allocation8 + $0x1a0] sm:$0xff]  ;;  %v899_v16 = vld [vmem:[#allocation8 + $0x178] sm:$0xff] }
  0x30   :  { %190 = vmatpush.msra.mxu0 %v146_v24  ;;  %303 = vmatpush.msra.mxu1 %v147_v25  ;;  %v120_v8 = vld [vmem:[#allocation2 + $0x60] sm:$0xff]  ;;  %v870_v9 = vld [vmem:[#allocation8 + $0x90] sm:$0xff]  ;;  %v121_v19 = vld [vmem:[#allocation2 + $0x68] sm:$0xff] }
  0x31   :  { %1038 = vmatpush.msra.mxu3 %v908_v3  ;;  %926 = vmatpush.msra.mxu2 %v874_v4  ;;  %v902_v10 = vld [vmem:[#allocation8 + $0x190] sm:$0xff]  ;;  %v868_v11 = vld [vmem:[#allocation8 + $0x80] sm:$0xff] }
  0x32   :  { %191 = vmatpush.msra.mxu0 %v144_v26  ;;  %304 = vmatpush.msra.mxu1 %v145_v27  ;;  %v900_v12 = vld [vmem:[#allocation8 + $0x180] sm:$0xff]  ;;  %v866_v13 = vld [vmem:[#allocation8 + $0x70] sm:$0xff] }
  0x33   :  { %1039 = vmatpush.msra.mxu3 %v906_v5  ;;  %927 = vmatpush.msra.mxu2 %v872_v6  ;;  %v898_v14 = vld [vmem:[#allocation8 + $0x170] sm:$0xff]  ;;  %v864_v17 = vld [vmem:[#allocation8 + $0x60] sm:$0xff] }
  0x34   :  { %192 = vmatpush.msra.mxu0 %v142_v28  ;;  %305 = vmatpush.msra.mxu1 %v143_v29  ;;  %v896_v18 = vld [vmem:[#allocation8 + $0x160] sm:$0xff]  ;;  %v862_v20 = vld [vmem:[#allocation8 + $0x50] sm:$0xff] }
  0x35   :  { %1040 = vmatpush.msra.mxu3 %v904_v7  ;;  %928 = vmatpush.msra.mxu2 %v870_v9  ;;  %v894_v21 = vld [vmem:[#allocation8 + $0x150] sm:$0xff]  ;;  %v860_v22 = vld [vmem:[#allocation8 + $0x40] sm:$0xff] }
  0x36   :  { %193 = vmatpush.msra.mxu0 %v140_v30  ;;  %306 = vmatpush.msra.mxu1 %v141_v31  ;;  %v892_v23 = vld [vmem:[#allocation8 + $0x140] sm:$0xff]  ;;  %v858_v24 = vld [vmem:[#allocation8 + $0x30] sm:$0xff] }
  0x37   :  { %194 = vmatmul.f32.vlgmr.msra.gmra.mxu0 %v108_v32  ;;  %307 = vmatmul.f32.vlgmr.msra.gmra.mxu1 %v108_v32  ;;  %v890_v25 = vld [vmem:[#allocation8 + $0x130] sm:$0xff]  ;;  %v856_v26 = vld [vmem:[#allocation8 + $0x20] sm:$0xff] }
  0x38   :  { %1148 = vmatpush.msrb.mxu0 %v883_v33  ;;  %1261 = vmatpush.msrb.mxu1 %v915_v34  ;;  %v888_v27 = vld [vmem:[#allocation8 + $0x120] sm:$0xff]  ;;  %v122_v28 = vld [vmem:[#allocation2 + $0x70] sm:$0xff]  ;;  %v865_v33 = vld [vmem:[#allocation8 + $0x68] sm:$0xff] }
  0x39   :  { %1041 = vmatpush.msra.mxu3 %v902_v10  ;;  %929 = vmatpush.msra.mxu2 %v868_v11  ;;  %v854_v29 = vld [vmem:[#allocation8 + $0x10] sm:$0xff]  ;;  %v852_v31 = vld [vmem:[#allocation8] sm:$0xff]  ;;  %v1837_v34 = vld [vmem:[#allocation10 + $0x78] sm:$0xff] }
  0x3a   :  { %1149 = vmatpush.msrb.mxu0 %v881_v35  ;;  %1262 = vmatpush.msrb.mxu1 %v913_v36  ;;  %v886_v30 = vld [vmem:[#allocation8 + $0x110] sm:$0xff]  ;;  %v884_v32 = vld [vmem:[#allocation8 + $0x100] sm:$0xff]  ;;  %v897_v35 = vld [vmem:[#allocation8 + $0x168] sm:$0xff] }
  0x3b   :  { %1042 = vmatpush.msra.mxu3 %v900_v12  ;;  %930 = vmatpush.msra.mxu2 %v866_v13  ;;  %v1853_v36 = vld [vmem:[#allocation10 + $0xf8] sm:$0xff]  ;;  %v126_v3 = vld [vmem:[#allocation5 + $0x10] sm:$0xff] }
  0x3c   :  { %1150 = vmatpush.msrb.mxu0 %v879_v37  ;;  %1263 = vmatpush.msrb.mxu1 %v911_v38  ;;  %v123_v37 = vld [vmem:[#allocation2 + $0x78] sm:$0xff]  ;;  %v172_v38 = vld [vmem:[%s4210_s3] sm:$0x3] }
  0x3d   :  { %1043 = vmatpush.msra.mxu3 %v898_v14  ;;  %931 = vmatpush.msra.mxu2 %v864_v17  ;;  %v861_v17 = vld [vmem:[#allocation8 + $0x48] sm:$0xff] }
  0x3e   :  { %1151 = vmatpush.msrb.mxu0 %v877_v41  ;;  %1264 = vmatpush.msrb.mxu1 %v909_v42 }
  0x3f   :  { %197 = vmatmul.f32.gmra.mxu0 %v109_v39  ;;  %310 = vmatmul.f32.gmra.mxu1 %v109_v39  ;;  %v3214_v39 = vperm.slane %v172_v38, 0 }
  0x40   :  { %1152 = vmatpush.msrb.mxu0 %v875_v45  ;;  %1265 = vmatpush.msrb.mxu1 %v907_v46 }
  0x41   :  { %1044 = vmatpush.msra.mxu3 %v896_v18  ;;  %932 = vmatpush.msra.mxu2 %v862_v20  ;;  %v1835_v18 = vld [vmem:[#allocation10 + $0x68] sm:$0xff] }
  0x42   :  { %1153 = vmatpush.msrb.mxu0 %v873_v49  ;;  %1266 = vmatpush.msrb.mxu1 %v905_v50  ;;  %v1836_v49 = vld [vmem:[#allocation10 + $0x70] sm:$0xff]  ;;  %v895_v50 = vld [vmem:[#allocation8 + $0x158] sm:$0xff] }
  0x43   :  { %1045 = vmatpush.msra.mxu3 %v894_v21  ;;  %933 = vmatpush.msra.mxu2 %v860_v22  ;;  %v1851_v21 = vld [vmem:[#allocation10 + $0xe8] sm:$0xff] }
  0x44   :  { %1154 = vmatpush.msrb.mxu0 %v871_v53  ;;  %1267 = vmatpush.msrb.mxu1 %v903_v54  ;;  %v125_v54 = vld [vmem:[#allocation5 + $0x8] sm:$0xff] }
  0x45   :  { %1046 = vmatpush.msra.mxu3 %v892_v23  ;;  %934 = vmatpush.msra.mxu2 %v858_v24  ;;  %v127_v24 = vld [vmem:[#allocation5 + $0x18] sm:$0xff] }
  0x46   :  { %1155 = vmatpush.msrb.mxu0 %v869_v57  ;;  %1268 = vmatpush.msrb.mxu1 %v901_v60 }
  0x47   :  { %200 = vmatmul.f32.gmra.mxu0 %v110_v40  ;;  %313 = vmatmul.f32.gmra.mxu1 %v110_v40  ;;  %v3216_v40 = vperm.slane %v172_v38, 1 }
  0x48   :  { %1156 = vmatpush.msrb.mxu0 %v867_v15  ;;  %1269 = vmatpush.msrb.mxu1 %v899_v16 }
  0x49   :  { %1047 = vmatpush.msra.mxu3 %v890_v25  ;;  %935 = vmatpush.msra.mxu2 %v856_v26 }
  0x4a   :  { %1157 = vmatpush.msrb.mxu0 %v865_v33  ;;  %1270 = vmatpush.msrb.mxu1 %v897_v35 }
  0x4b   :  { %1048 = vmatpush.msra.mxu3 %v888_v27  ;;  %936 = vmatpush.msra.mxu2 %v854_v29 }
  0x4c   :  { %1271 = vmatpush.msrb.mxu1 %v895_v50 }
  0x4d   :  { %1049 = vmatpush.msra.mxu3 %v886_v30  ;;  %937 = vmatpush.msra.mxu2 %v852_v31 }
  0x4f   :  { %203 = vmatmul.f32.gmra.mxu0 %v111_v43  ;;  %316 = vmatmul.f32.gmra.mxu1 %v111_v43  ;;  %v124_v43 = vld [vmem:[#allocation5] sm:$0xff] }
  0x50   :  { %1050 = vmatpush.msra.mxu3 %v884_v32  ;;  %1858 = vmatpush.msrb.mxu2 %v1837_v34 }
  0x52   :  { %1971 = vmatpush.msrb.mxu3 %v1853_v36  ;;  %1859 = vmatpush.msrb.mxu2 %v1836_v49 }
  0x54   :  { %1860 = vmatpush.msrb.mxu2 %v1835_v18 }
  0x57   :  { %206 = vmatmul.f32.gmra.mxu0 %v112_v44  ;;  %319 = vmatmul.f32.gmra.mxu1 %v112_v44 }
  0x5f   :  { %209 = vmatmul.f32.gmra.mxu0 %v113_v47  ;;  %322 = vmatmul.f32.gmra.mxu1 %v113_v47 }
  0x67   :  { %212 = vmatmul.f32.gmra.mxu0 %v114_v48  ;;  %325 = vmatmul.f32.gmra.mxu1 %v114_v48  ;;  %v863_v48 = vld [vmem:[#allocation8 + $0x58] sm:$0xff] }
  0x68   :  { %1158 = vmatpush.msrb.mxu0 %v863_v48 }
  0x6a   :  { %1159 = vmatpush.msrb.mxu0 %v861_v17 }
  0x6f   :  { %215 = vmatmul.f32.gmra.mxu0 %v115_v51  ;;  %328 = vmatmul.f32.gmra.mxu1 %v115_v51  ;;  %v1852_v51 = vld [vmem:[#allocation10 + $0xf0] sm:$0xff] }
  0x70   :  { %1972 = vmatpush.msrb.mxu3 %v1852_v51 }
  0x72   :  { %1973 = vmatpush.msrb.mxu3 %v1851_v21 }
  0x77   :  { %218 = vmatmul.f32.gmra.mxu0 %v116_v52  ;;  %331 = vmatmul.f32.gmra.mxu1 %v116_v52 }
  0x7f   :  { %221 = vmatmul.f32.gmra.mxu0 %v117_v55  ;;  %334 = vmatmul.f32.gmra.mxu1 %v117_v55 }
  0x87   :  { %224 = vmatmul.f32.gmra.mxu0 %v118_v56  ;;  %337 = vmatmul.f32.gmra.mxu1 %v118_v56 }
  0x8f   :  { %227 = vmatmul.f32.gmra.mxu0 %v119_v2  ;;  %340 = vmatmul.f32.gmra.mxu1 %v119_v2 }
  0x97   :  { %230 = vmatmul.f32.gmra.mxu0 %v120_v8  ;;  %343 = vmatmul.f32.gmra.mxu1 %v120_v8 }
  0x9f   :  { %233 = vmatmul.f32.gmra.mxu0 %v121_v19  ;;  %346 = vmatmul.f32.gmra.mxu1 %v121_v19  ;;  %v893_v19 = vld [vmem:[#allocation8 + $0x148] sm:$0xff] }
  0xa0   :  { %1272 = vmatpush.msrb.mxu1 %v893_v19  ;;  %v130_v19 = vld [vmem:[#allocation5 + $0x30] sm:$0xff] }
  0xa7   :  { %236 = vmatmul.f32.gmra.mxu0 %v122_v28  ;;  %349 = vmatmul.f32.gmra.mxu1 %v122_v28 }
  0xaf   :  { %239 = vmatmul.f32.gmra.mxu0 %v123_v37  ;;  %352 = vmatmul.f32.gmra.mxu1 %v123_v37 }
  0xb4   :  { %v195_v41 = vpop.f32.mrf.mxu0  ;;  %v308_v42 = vpop.f32.mrf.mxu1 }
  0xb5   :  { %v196_v44 = vadd.f32 %v195_v41, %v3214_v39  ;;  %v309_v45 = vadd.f32 %v308_v42, %v3216_v40 }
  0xb7   :  { %v468_v46 = vmul.f32 1.442695, %v196_v44  ;;  %v470_v47 = vmul.f32 1.442695, %v309_v45  ;;  %242 = vmatmul.f32.gmra.mxu0 %v124_v43  ;;  %355 = vmatmul.f32.gmra.mxu1 %v124_v43  ;;  %vm404_vm0 = vcmp.gt.f32.partialorder %v196_v44, 0.0  ;;  %vm405_vm1 = vcmp.gt.f32.partialorder %v309_v45, 0.0 }
  0xb8   :  { %v128_v43 = vld [vmem:[#allocation5 + $0x20] sm:$0xff] }
  0xb9   :  { %2691 = vpow2.f32 %v468_v46 }
  0xba   :  { %2693 = vpow2.f32 %v470_v47 }
  0xbc   :  { %v198_v52 = vpop.f32.mrf.mxu0  ;;  %v311_v53 = vpop.f32.mrf.mxu1 }
  0xbd   :  { %v199_v55 = vadd.f32 %v198_v52, %v3214_v39  ;;  %v312_v56 = vadd.f32 %v311_v53, %v3216_v40 }
  0xbf   :  { %v2692_v57 = vpop.eup %2691  ;;  %v472_v58 = vmul.f32 1.442695, %v199_v55  ;;  %v474_v59 = vmul.f32 1.442695, %v312_v56  ;;  %245 = vmatmul.f32.gmra.mxu0 %v125_v54  ;;  %358 = vmatmul.f32.gmra.mxu1 %v125_v54  ;;  %vm406_vm2 = vcmp.gt.f32.partialorder %v199_v55, 0.0  ;;  %vm407_vm3 = vcmp.gt.f32.partialorder %v312_v56, 0.0 }
  0xc0   :  { %v2694_v60 = vpop.eup %2693  ;;  %v2552_v61 = vadd.f32 -1.0, %v2692_v57  ;;  %v859_v57 = vld [vmem:[#allocation8 + $0x38] sm:$0xff] }
  0xc1   :  { %2695 = vpow2.f32 %v472_v58  ;;  %v2553_v62 = vadd.f32 -1.0, %v2694_v60  ;;  %v1834_v58 = vld [vmem:[#allocation10 + $0x60] sm:$0xff]  ;;  %1160 = vmatpush.msrb.mxu0 %v859_v57 }
  0xc2   :  { %2697 = vpow2.f32 %v474_v59  ;;  %v660_v63 = vmul.f32 1.6732632, %v2552_v61  ;;  %v891_v59 = vld [vmem:[#allocation8 + $0x138] sm:$0xff]  ;;  %1861 = vmatpush.msrb.mxu2 %v1834_v58  ;;  %v1850_v61 = vld [vmem:[#allocation10 + $0xe0] sm:$0xff] }
  0xc3   :  { %v661_v0 = vmul.f32 1.6732632, %v2553_v62  ;;  %1273 = vmatpush.msrb.mxu1 %v891_v59  ;;  %1974 = vmatpush.msrb.mxu3 %v1850_v61 }
  0xc4   :  { %v201_v1 = vpop.f32.mrf.mxu0  ;;  %v314_v2 = vpop.f32.mrf.mxu1  ;;  %v724_v4 = vsel %vm404_vm0, %v196_v44, %v660_v63 }
  0xc5   :  { %v202_v5 = vadd.f32 %v201_v1, %v3214_v39  ;;  %v315_v6 = vadd.f32 %v314_v2, %v3216_v40  ;;  %v3224_v7 = vmul.f32 1.050701, %v724_v4  ;;  %v725_v8 = vsel %vm405_vm1, %v309_v45, %v661_v0  ;;  %v129_v0 = vld [vmem:[#allocation5 + $0x28] sm:$0xff] }
  0xc6   :  { %v3226_v9 = vmul.f32 1.050701, %v725_v8 }
  0xc7   :  { %v2696_v10 = vpop.eup %2695  ;;  %v476_v11 = vmul.f32 1.442695, %v202_v5  ;;  %v478_v12 = vmul.f32 1.442695, %v315_v6  ;;  %248 = vmatmul.f32.gmra.mxu0 %v126_v3  ;;  %361 = vmatmul.f32.gmra.mxu1 %v126_v3  ;;  %vm408_vm4 = vcmp.gt.f32.partialorder %v202_v5, 0.0  ;;  %vm409_vm5 = vcmp.gt.f32.partialorder %v315_v6, 0.0 }
  0xc8   :  { %v2698_v13 = vpop.eup %2697  ;;  %938 = vmatmul.f32.vlgmr.msra.gmra.mxu2 %v3224_v7  ;;  %1051 = vmatmul.f32.vlgmr.msra.gmra.mxu3 %v3226_v9  ;;  %v2554_v14 = vadd.f32 -1.0, %v2696_v10 }
  0xc9   :  { %2699 = vpow2.f32 %v476_v11  ;;  %v2555_v15 = vadd.f32 -1.0, %v2698_v13 }
  0xca   :  { %2701 = vpow2.f32 %v478_v12  ;;  %v662_v16 = vmul.f32 1.6732632, %v2554_v14 }
  0xcb   :  { %v663_v20 = vmul.f32 1.6732632, %v2555_v15 }
  0xcc   :  { %v204_v22 = vpop.f32.mrf.mxu0  ;;  %v317_v23 = vpop.f32.mrf.mxu1  ;;  %v726_v25 = vsel %vm406_vm2, %v199_v55, %v662_v16 }
  0xcd   :  { %v205_v26 = vadd.f32 %v204_v22, %v3214_v39  ;;  %v318_v27 = vadd.f32 %v317_v23, %v3216_v40  ;;  %v3232_v28 = vmul.f32 1.050701, %v726_v25  ;;  %v727_v29 = vsel %vm407_vm3, %v312_v56, %v663_v20 }
  0xce   :  { %v3234_v30 = vmul.f32 1.050701, %v727_v29 }
  0xcf   :  { %v2700_v31 = vpop.eup %2699  ;;  %v480_v32 = vmul.f32 1.442695, %v205_v26  ;;  %v482_v33 = vmul.f32 1.442695, %v318_v27  ;;  %251 = vmatmul.f32.gmra.mxu0 %v127_v24  ;;  %364 = vmatmul.f32.gmra.mxu1 %v127_v24  ;;  %vm410_vm6 = vcmp.gt.f32.partialorder %v205_v26, 0.0  ;;  %vm411_vm7 = vcmp.gt.f32.partialorder %v318_v27, 0.0 }
  0xd0   :  { %v2702_v34 = vpop.eup %2701  ;;  %941 = vmatmul.f32.gmra.mxu2 %v3232_v28  ;;  %1054 = vmatmul.f32.gmra.mxu3 %v3234_v30  ;;  %v2556_v35 = vadd.f32 -1.0, %v2700_v31 }
  0xd1   :  { %2703 = vpow2.f32 %v480_v32  ;;  %v2557_v36 = vadd.f32 -1.0, %v2702_v34 }
  0xd2   :  { %2705 = vpow2.f32 %v482_v33  ;;  %v664_v37 = vmul.f32 1.6732632, %v2556_v35  ;;  %v857_v35 = vld [vmem:[#allocation8 + $0x28] sm:$0xff] }
  0xd3   :  { %v665_v38 = vmul.f32 1.6732632, %v2557_v36  ;;  %v1833_v36 = vld [vmem:[#allocation10 + $0x58] sm:$0xff]  ;;  %1161 = vmatpush.msrb.mxu0 %v857_v35 }
  0xd4   :  { %v207_v41 = vpop.f32.mrf.mxu0  ;;  %v320_v42 = vpop.f32.mrf.mxu1  ;;  %v728_v44 = vsel %vm408_vm4, %v202_v5, %v664_v37  ;;  %v889_v37 = vld [vmem:[#allocation8 + $0x128] sm:$0xff]  ;;  %1862 = vmatpush.msrb.mxu2 %v1833_v36 }
  0xd5   :  { %v208_v45 = vadd.f32 %v207_v41, %v3214_v39  ;;  %v321_v46 = vadd.f32 %v320_v42, %v3216_v40  ;;  %v3240_v47 = vmul.f32 1.050701, %v728_v44  ;;  %v729_v48 = vsel %vm409_vm5, %v315_v6, %v665_v38  ;;  %v1849_v41 = vld [vmem:[#allocation10 + $0xd8] sm:$0xff]  ;;  %1274 = vmatpush.msrb.mxu1 %v889_v37 }
  0xd6   :  { %v3242_v49 = vmul.f32 1.050701, %v729_v48  ;;  %v131_v44 = vld [vmem:[#allocation5 + $0x38] sm:$0xff]  ;;  %1975 = vmatpush.msrb.mxu3 %v1849_v41 }
  0xd7   :  { %v2704_v50 = vpop.eup %2703  ;;  %v484_v51 = vmul.f32 1.442695, %v208_v45  ;;  %v486_v52 = vmul.f32 1.442695, %v321_v46  ;;  %254 = vmatmul.f32.gmra.mxu0 %v128_v43  ;;  %367 = vmatmul.f32.gmra.mxu1 %v128_v43  ;;  %vm412_vm8 = vcmp.gt.f32.partialorder %v208_v45, 0.0  ;;  %vm413_vm9 = vcmp.gt.f32.partialorder %v321_v46, 0.0 }
  0xd8   :  { %v2706_v53 = vpop.eup %2705  ;;  %944 = vmatmul.f32.gmra.mxu2 %v3240_v47  ;;  %1057 = vmatmul.f32.gmra.mxu3 %v3242_v49  ;;  %v2558_v54 = vadd.f32 -1.0, %v2704_v50 }
  0xd9   :  { %2707 = vpow2.f32 %v484_v51  ;;  %v2559_v55 = vadd.f32 -1.0, %v2706_v53 }
  0xda   :  { %2709 = vpow2.f32 %v486_v52  ;;  %v666_v56 = vmul.f32 1.6732632, %v2558_v54 }
  0xdb   :  { %v667_v60 = vmul.f32 1.6732632, %v2559_v55 }
  0xdc   :  { %v210_v62 = vpop.f32.mrf.mxu0  ;;  %v323_v63 = vpop.f32.mrf.mxu1  ;;  %v730_v1 = vsel %vm410_vm6, %v205_v26, %v666_v56 }
  0xdd   :  { %v211_v2 = vadd.f32 %v210_v62, %v3214_v39  ;;  %v324_v3 = vadd.f32 %v323_v63, %v3216_v40  ;;  %v3248_v4 = vmul.f32 1.050701, %v730_v1  ;;  %v731_v5 = vsel %vm411_vm7, %v318_v27, %v667_v60  ;;  %v132_v63 = vld [vmem:[#allocation5 + $0x40] sm:$0xff] }
  0xde   :  { %v3250_v6 = vmul.f32 1.050701, %v731_v5 }
  0xdf   :  { %v2708_v8 = vpop.eup %2707  ;;  %v488_v10 = vmul.f32 1.442695, %v211_v2  ;;  %v490_v11 = vmul.f32 1.442695, %v324_v3  ;;  %257 = vmatmul.f32.gmra.mxu0 %v129_v0  ;;  %370 = vmatmul.f32.gmra.mxu1 %v129_v0  ;;  %vm414_vm10 = vcmp.gt.f32.partialorder %v211_v2, 0.0  ;;  %vm415_vm11 = vcmp.gt.f32.partialorder %v324_v3, 0.0 }
  0xe0   :  { %v2710_v12 = vpop.eup %2709  ;;  %947 = vmatmul.f32.gmra.mxu2 %v3248_v4  ;;  %1060 = vmatmul.f32.gmra.mxu3 %v3250_v6  ;;  %v2560_v13 = vadd.f32 -1.0, %v2708_v8 }
  0xe1   :  { %2711 = vpow2.f32 %v488_v10  ;;  %v2561_v14 = vadd.f32 -1.0, %v2710_v12 }
  0xe2   :  { %2713 = vpow2.f32 %v490_v11  ;;  %v668_v15 = vmul.f32 1.6732632, %v2560_v13 }
  0xe3   :  { %v669_v16 = vmul.f32 1.6732632, %v2561_v14 }
  0xe4   :  { %v213_v17 = vpop.f32.mrf.mxu0  ;;  %v326_v18 = vpop.f32.mrf.mxu1  ;;  %v732_v20 = vsel %vm412_vm8, %v208_v45, %v668_v15 }
  0xe5   :  { %v214_v21 = vadd.f32 %v213_v17, %v3214_v39  ;;  %v327_v22 = vadd.f32 %v326_v18, %v3216_v40  ;;  %v3256_v23 = vmul.f32 1.050701, %v732_v20  ;;  %v733_v24 = vsel %vm413_vm9, %v321_v46, %v669_v16  ;;  %v855_v17 = vld [vmem:[#allocation8 + $0x18] sm:$0xff]  ;;  %v1832_v18 = vld [vmem:[#allocation10 + $0x50] sm:$0xff] }
  0xe6   :  { %v3258_v25 = vmul.f32 1.050701, %v733_v24  ;;  %1162 = vmatpush.msrb.mxu0 %v855_v17  ;;  %1863 = vmatpush.msrb.mxu2 %v1832_v18 }
  0xe7   :  { %v2712_v26 = vpop.eup %2711  ;;  %v492_v27 = vmul.f32 1.442695, %v214_v21  ;;  %v494_v29 = vmul.f32 1.442695, %v327_v22  ;;  %260 = vmatmul.f32.gmra.mxu0 %v130_v19  ;;  %373 = vmatmul.f32.gmra.mxu1 %v130_v19  ;;  %vm416_vm12 = vcmp.gt.f32.partialorder %v214_v21, 0.0  ;;  %vm417_vm13 = vcmp.gt.f32.partialorder %v327_v22, 0.0 }
  0xe8   :  { %v2714_v31 = vpop.eup %2713  ;;  %950 = vmatmul.f32.gmra.mxu2 %v3256_v23  ;;  %1063 = vmatmul.f32.gmra.mxu3 %v3258_v25  ;;  %v2562_v32 = vadd.f32 -1.0, %v2712_v26  ;;  %v887_v19 = vld [vmem:[#allocation8 + $0x118] sm:$0xff]  ;;  %v133_v26 = vld [vmem:[#allocation5 + $0x48] sm:$0xff] }
  0xe9   :  { %2715 = vpow2.f32 %v492_v27  ;;  %v2563_v33 = vadd.f32 -1.0, %v2714_v31  ;;  %1275 = vmatpush.msrb.mxu1 %v887_v19 }
  0xea   :  { %2717 = vpow2.f32 %v494_v29  ;;  %v670_v34 = vmul.f32 1.6732632, %v2562_v32 }
  0xeb   :  { %v671_v38 = vmul.f32 1.6732632, %v2563_v33 }
  0xec   :  { %v216_v42 = vpop.f32.mrf.mxu0  ;;  %v329_v43 = vpop.f32.mrf.mxu1  ;;  %v734_v45 = vsel %vm414_vm10, %v211_v2, %v670_v34 }
  0xed   :  { %v217_v46 = vadd.f32 %v216_v42, %v3214_v39  ;;  %v330_v48 = vadd.f32 %v329_v43, %v3216_v40  ;;  %v3264_v50 = vmul.f32 1.050701, %v734_v45  ;;  %v735_v51 = vsel %vm415_vm11, %v324_v3, %v671_v38 }
  0xee   :  { %v3266_v52 = vmul.f32 1.050701, %v735_v51 }
  0xef   :  { %v2716_v53 = vpop.eup %2715  ;;  %v496_v54 = vmul.f32 1.442695, %v217_v46  ;;  %v498_v55 = vmul.f32 1.442695, %v330_v48  ;;  %263 = vmatmul.f32.gmra.mxu0 %v131_v44  ;;  %376 = vmatmul.f32.gmra.mxu1 %v131_v44  ;;  %vm418_vm14 = vcmp.gt.f32.partialorder %v217_v46, 0.0  ;;  %vm419_vm15 = vcmp.gt.f32.partialorder %v330_v48, 0.0 }
  0xf0   :  { %v2718_v56 = vpop.eup %2717  ;;  %953 = vmatmul.f32.gmra.mxu2 %v3264_v50  ;;  %1066 = vmatmul.f32.gmra.mxu3 %v3266_v52  ;;  %v2564_v57 = vadd.f32 -1.0, %v2716_v53 }
  0xf1   :  { %2719 = vpow2.f32 %v496_v54  ;;  %v2565_v58 = vadd.f32 -1.0, %v2718_v56 }
  0xf2   :  { %2721 = vpow2.f32 %v498_v55  ;;  %v672_v59 = vmul.f32 1.6732632, %v2564_v57 }
  0xf3   :  { %v673_v60 = vmul.f32 1.6732632, %v2565_v58 }
  0xf4   :  { %v219_v61 = vpop.f32.mrf.mxu0  ;;  %v332_v62 = vpop.f32.mrf.mxu1  ;;  %v736_v0 = vsel %vm416_vm12, %v214_v21, %v672_v59  ;;  %v1848_v21 = vld [vmem:[#allocation10 + $0xd0] sm:$0xff] }
  0xf5   :  { %v220_v1 = vadd.f32 %v219_v61, %v3214_v39  ;;  %v333_v2 = vadd.f32 %v332_v62, %v3216_v40  ;;  %v3272_v3 = vmul.f32 1.050701, %v736_v0  ;;  %v737_v5 = vsel %vm417_vm13, %v327_v22, %v673_v60  ;;  %1976 = vmatpush.msrb.mxu3 %v1848_v21 }
  0xf6   :  { %v3274_v8 = vmul.f32 1.050701, %v737_v5  ;;  %v1831_v5 = vld [vmem:[#allocation10 + $0x48] sm:$0xff] }
  0xf7   :  { %v2720_v10 = vpop.eup %2719  ;;  %v500_v11 = vmul.f32 1.442695, %v220_v1  ;;  %v502_v12 = vmul.f32 1.442695, %v333_v2  ;;  %266 = vmatmul.f32.gmra.mxu0 %v132_v63  ;;  %379 = vmatmul.f32.gmra.mxu1 %v132_v63  ;;  %vm420_vm0 = vcmp.gt.f32.partialorder %v220_v1, 0.0  ;;  %vm421_vm1 = vcmp.gt.f32.partialorder %v333_v2, 0.0 }
  0xf8   :  { %v2722_v13 = vpop.eup %2721  ;;  %956 = vmatmul.f32.gmra.mxu2 %v3272_v3  ;;  %1069 = vmatmul.f32.gmra.mxu3 %v3274_v8  ;;  %v2566_v14 = vadd.f32 -1.0, %v2720_v10 }
  0xf9   :  { %2723 = vpow2.f32 %v500_v11  ;;  %v2567_v15 = vadd.f32 -1.0, %v2722_v13  ;;  %1864 = vmatpush.msrb.mxu2 %v1831_v5  ;;  %v1847_v11 = vld [vmem:[#allocation10 + $0xc8] sm:$0xff] }
  0xfa   :  { %2725 = vpow2.f32 %v502_v12  ;;  %v674_v16 = vmul.f32 1.6732632, %v2566_v14  ;;  %v135_v14 = vld [vmem:[#allocation5 + $0x58] sm:$0xff]  ;;  %1977 = vmatpush.msrb.mxu3 %v1847_v11 }
  0xfb   :  { %v675_v20 = vmul.f32 1.6732632, %v2567_v15 }
  0xfc   :  { %v222_v22 = vpop.f32.mrf.mxu0  ;;  %v335_v24 = vpop.f32.mrf.mxu1  ;;  %v738_v27 = vsel %vm418_vm14, %v217_v46, %v674_v16 }
  0xfd   :  { %v223_v29 = vadd.f32 %v222_v22, %v3214_v39  ;;  %v336_v31 = vadd.f32 %v335_v24, %v3216_v40  ;;  %v3280_v32 = vmul.f32 1.050701, %v738_v27  ;;  %v739_v33 = vsel %vm419_vm15, %v330_v48, %v675_v20  ;;  %v134_v48 = vld [vmem:[#allocation5 + $0x50] sm:$0xff] }
  0xfe   :  { %v3282_v34 = vmul.f32 1.050701, %v739_v33 }
  0xff   :  { %v2724_v35 = vpop.eup %2723  ;;  %v504_v36 = vmul.f32 1.442695, %v223_v29  ;;  %v506_v37 = vmul.f32 1.442695, %v336_v31  ;;  %269 = vmatmul.f32.gmra.mxu0 %v133_v26  ;;  %382 = vmatmul.f32.gmra.mxu1 %v133_v26  ;;  %vm422_vm2 = vcmp.gt.f32.partialorder %v223_v29, 0.0  ;;  %vm423_vm3 = vcmp.gt.f32.partialorder %v336_v31, 0.0 }
 0x100   :  { %v2726_v38 = vpop.eup %2725  ;;  %959 = vmatmul.f32.gmra.mxu2 %v3280_v32  ;;  %1072 = vmatmul.f32.gmra.mxu3 %v3282_v34  ;;  %v2568_v41 = vadd.f32 -1.0, %v2724_v35 }
 0x101   :  { %2727 = vpow2.f32 %v504_v36  ;;  %v2569_v42 = vadd.f32 -1.0, %v2726_v38 }
 0x102   :  { %2729 = vpow2.f32 %v506_v37  ;;  %v676_v43 = vmul.f32 1.6732632, %v2568_v41  ;;  %v136_v37 = vld [vmem:[#allocation5 + $0x60] sm:$0xff] }
 0x103   :  { %v677_v44 = vmul.f32 1.6732632, %v2569_v42 }
 0x104   :  { %v225_v45 = vpop.f32.mrf.mxu0  ;;  %v338_v46 = vpop.f32.mrf.mxu1  ;;  %v740_v51 = vsel %vm420_vm0, %v220_v1, %v676_v43  ;;  %v853_v1 = vld [vmem:[#allocation8 + $0x8] sm:$0xff] }
 0x105   :  { %v226_v53 = vadd.f32 %v225_v45, %v3214_v39  ;;  %v339_v54 = vadd.f32 %v338_v46, %v3216_v40  ;;  %v3288_v55 = vmul.f32 1.050701, %v740_v51  ;;  %v741_v56 = vsel %vm421_vm1, %v333_v2, %v677_v44  ;;  %v885_v2 = vld [vmem:[#allocation8 + $0x108] sm:$0xff]  ;;  %1163 = vmatpush.msrb.mxu0 %v853_v1 }
 0x106   :  { %v3290_v57 = vmul.f32 1.050701, %v741_v56  ;;  %1276 = vmatpush.msrb.mxu1 %v885_v2 }
 0x107   :  { %v2728_v58 = vpop.eup %2727  ;;  %v508_v59 = vmul.f32 1.442695, %v226_v53  ;;  %v510_v60 = vmul.f32 1.442695, %v339_v54  ;;  %272 = vmatmul.f32.gmra.mxu0 %v134_v48  ;;  %385 = vmatmul.f32.gmra.mxu1 %v134_v48  ;;  %vm424_vm4 = vcmp.gt.f32.partialorder %v226_v53, 0.0  ;;  %vm425_vm5 = vcmp.gt.f32.partialorder %v339_v54, 0.0 }
 0x108   :  { %v2730_v61 = vpop.eup %2729  ;;  %962 = vmatmul.f32.gmra.mxu2 %v3288_v55  ;;  %1075 = vmatmul.f32.gmra.mxu3 %v3290_v57  ;;  %v2570_v62 = vadd.f32 -1.0, %v2728_v58 }
 0x109   :  { %2731 = vpow2.f32 %v508_v59  ;;  %v2571_v63 = vadd.f32 -1.0, %v2730_v61  ;;  %v1846_v61 = vld [vmem:[#allocation10 + $0xc0] sm:$0xff] }
 0x10a   :  { %2733 = vpow2.f32 %v510_v60  ;;  %v678_v0 = vmul.f32 1.6732632, %v2570_v62  ;;  %v1830_v60 = vld [vmem:[#allocation10 + $0x40] sm:$0xff]  ;;  %1978 = vmatpush.msrb.mxu3 %v1846_v61  ;;  %v139_v61 = vld [vmem:[#allocation5 + $0x78] sm:$0xff] }
 0x10b   :  { %v679_v10 = vmul.f32 1.6732632, %v2571_v63  ;;  %1865 = vmatpush.msrb.mxu2 %v1830_v60 }
 0x10c   :  { %v228_v12 = vpop.f32.mrf.mxu0  ;;  %v341_v13 = vpop.f32.mrf.mxu1  ;;  %v742_v15 = vsel %vm422_vm2, %v223_v29, %v678_v0  ;;  %v137_v0 = vld [vmem:[#allocation5 + $0x68] sm:$0xff] }
 0x10d   :  { %v229_v16 = vadd.f32 %v228_v12, %v3214_v39  ;;  %v342_v17 = vadd.f32 %v341_v13, %v3216_v40  ;;  %v3296_v18 = vmul.f32 1.050701, %v742_v15  ;;  %v743_v19 = vsel %vm423_vm3, %v336_v31, %v679_v10 }
 0x10e   :  { %v3298_v20 = vmul.f32 1.050701, %v743_v19 }
 0x10f   :  { %v2732_v21 = vpop.eup %2731  ;;  %v512_v22 = vmul.f32 1.442695, %v229_v16  ;;  %v514_v24 = vmul.f32 1.442695, %v342_v17  ;;  %275 = vmatmul.f32.gmra.mxu0 %v135_v14  ;;  %388 = vmatmul.f32.gmra.mxu1 %v135_v14  ;;  %vm426_vm6 = vcmp.gt.f32.partialorder %v229_v16, 0.0  ;;  %vm427_vm7 = vcmp.gt.f32.partialorder %v342_v17, 0.0 }
 0x110   :  { %v2734_v26 = vpop.eup %2733  ;;  %965 = vmatmul.f32.gmra.mxu2 %v3296_v18  ;;  %1078 = vmatmul.f32.gmra.mxu3 %v3298_v20  ;;  %v2572_v27 = vadd.f32 -1.0, %v2732_v21 }
 0x111   :  { %2735 = vpow2.f32 %v512_v22  ;;  %v2573_v29 = vadd.f32 -1.0, %v2734_v26 }
 0x112   :  { %2737 = vpow2.f32 %v514_v24  ;;  %v680_v33 = vmul.f32 1.6732632, %v2572_v27  ;;  %v138_v27 = vld [vmem:[#allocation5 + $0x70] sm:$0xff] }
 0x113   :  { %v681_v35 = vmul.f32 1.6732632, %v2573_v29 }
 0x114   :  { %v231_v31 = vpop.f32.mrf.mxu0  ;;  %v344_v36 = vpop.f32.mrf.mxu1  ;;  %v744_v38 = vsel %vm424_vm4, %v226_v53, %v680_v33 }
 0x115   :  { %v232_v41 = vadd.f32 %v231_v31, %v3214_v39  ;;  %v345_v42 = vadd.f32 %v344_v36, %v3216_v40  ;;  %v3304_v43 = vmul.f32 1.050701, %v744_v38  ;;  %v745_v44 = vsel %vm425_vm5, %v339_v54, %v681_v35 }
 0x116   :  { %v3306_v45 = vmul.f32 1.050701, %v745_v44 }
 0x117   :  { %v2736_v46 = vpop.eup %2735  ;;  %v516_v48 = vmul.f32 1.442695, %v232_v41  ;;  %v518_v51 = vmul.f32 1.442695, %v345_v42  ;;  %278 = vmatmul.f32.gmra.mxu0 %v136_v37  ;;  %391 = vmatmul.f32.gmra.mxu1 %v136_v37  ;;  %vm428_vm8 = vcmp.gt.f32.partialorder %v232_v41, 0.0  ;;  %vm429_vm9 = vcmp.gt.f32.partialorder %v345_v42, 0.0 }
 0x118   :  { %v2738_v56 = vpop.eup %2737  ;;  %968 = vmatmul.f32.gmra.mxu2 %v3304_v43  ;;  %1081 = vmatmul.f32.gmra.mxu3 %v3306_v45  ;;  %v2574_v53 = vadd.f32 -1.0, %v2736_v46 }
 0x119   :  { %2739 = vpow2.f32 %v516_v48  ;;  %v2575_v58 = vadd.f32 -1.0, %v2738_v56 }
 0x11a   :  { %2741 = vpow2.f32 %v518_v51  ;;  %v682_v59 = vmul.f32 1.6732632, %v2574_v53  ;;  %v1829_v53 = vld [vmem:[#allocation10 + $0x38] sm:$0xff] }
 0x11b   :  { %v683_v54 = vmul.f32 1.6732632, %v2575_v58  ;;  %v1845_v58 = vld [vmem:[#allocation10 + $0xb8] sm:$0xff]  ;;  %1866 = vmatpush.msrb.mxu2 %v1829_v53 }
 0x11c   :  { %v234_v62 = vpop.f32.mrf.mxu0  ;;  %v347_v63 = vpop.f32.mrf.mxu1  ;;  %v746_v1 = vsel %vm426_vm6, %v229_v16, %v682_v59  ;;  %1979 = vmatpush.msrb.mxu3 %v1845_v58 }
 0x11d   :  { %v235_v5 = vadd.f32 %v234_v62, %v3214_v39  ;;  %v348_v2 = vadd.f32 %v347_v63, %v3216_v40  ;;  %v3312_v10 = vmul.f32 1.050701, %v746_v1  ;;  %v747_v11 = vsel %vm427_vm7, %v342_v17, %v683_v54 }
 0x11e   :  { %v3314_v12 = vmul.f32 1.050701, %v747_v11 }
 0x11f   :  { %v2740_v13 = vpop.eup %2739  ;;  %v520_v14 = vmul.f32 1.442695, %v235_v5  ;;  %v522_v15 = vmul.f32 1.442695, %v348_v2  ;;  %281 = vmatmul.f32.gmra.mxu0 %v137_v0  ;;  %394 = vmatmul.f32.gmra.mxu1 %v137_v0  ;;  %vm430_vm10 = vcmp.gt.f32.partialorder %v235_v5, 0.0  ;;  %vm431_vm11 = vcmp.gt.f32.partialorder %v348_v2, 0.0 }
 0x120   :  { %v2742_v19 = vpop.eup %2741  ;;  %971 = vmatmul.f32.gmra.mxu2 %v3312_v10  ;;  %1084 = vmatmul.f32.gmra.mxu3 %v3314_v12  ;;  %v2576_v16 = vadd.f32 -1.0, %v2740_v13 }
 0x121   :  { %2743 = vpow2.f32 %v520_v14  ;;  %v2577_v21 = vadd.f32 -1.0, %v2742_v19 }
 0x122   :  { %2745 = vpow2.f32 %v522_v15  ;;  %v684_v22 = vmul.f32 1.6732632, %v2576_v16 }
 0x123   :  { %v685_v24 = vmul.f32 1.6732632, %v2577_v21 }
 0x124   :  { %v237_v17 = vpop.f32.mrf.mxu0  ;;  %v350_v26 = vpop.f32.mrf.mxu1  ;;  %v748_v29 = vsel %vm428_vm8, %v232_v41, %v684_v22 }
 0x125   :  { %v238_v33 = vadd.f32 %v237_v17, %v3214_v39  ;;  %v351_v35 = vadd.f32 %v350_v26, %v3216_v40  ;;  %v3320_v31 = vmul.f32 1.050701, %v748_v29  ;;  %v749_v36 = vsel %vm429_vm9, %v345_v42, %v685_v24 }
 0x126   :  { %v3322_v37 = vmul.f32 1.050701, %v749_v36 }
 0x127   :  { %v2744_v38 = vpop.eup %2743  ;;  %v524_v44 = vmul.f32 1.442695, %v238_v33  ;;  %v526_v46 = vmul.f32 1.442695, %v351_v35  ;;  %284 = vmatmul.f32.gmra.mxu0 %v138_v27  ;;  %397 = vmatmul.f32.gmra.mxu1 %v138_v27  ;;  %vm432_vm12 = vcmp.gt.f32.partialorder %v238_v33, 0.0  ;;  %vm433_vm13 = vcmp.gt.f32.partialorder %v351_v35, 0.0 }
 0x128   :  { %v2746_v48 = vpop.eup %2745  ;;  %974 = vmatmul.f32.gmra.mxu2 %v3320_v31  ;;  %1087 = vmatmul.f32.gmra.mxu3 %v3322_v37  ;;  %v2578_v41 = vadd.f32 -1.0, %v2744_v38 }
 0x129   :  { %2747 = vpow2.f32 %v524_v44  ;;  %v2579_v51 = vadd.f32 -1.0, %v2746_v48 }
 0x12a   :  { %2749 = vpow2.f32 %v526_v46  ;;  %v686_v56 = vmul.f32 1.6732632, %v2578_v41 }
 0x12b   :  { %v687_v42 = vmul.f32 1.6732632, %v2579_v51 }
 0x12c   :  { %v240_v59 = vpop.f32.mrf.mxu0  ;;  %v353_v60 = vpop.f32.mrf.mxu1  ;;  %v750_v54 = vsel %vm430_vm10, %v235_v5, %v686_v56 }
 0x12d   :  { %v241_v62 = vadd.f32 %v240_v59, %v3214_v39  ;;  %v354_v63 = vadd.f32 %v353_v60, %v3216_v40  ;;  %v3328_v0 = vmul.f32 1.050701, %v750_v54  ;;  %v751_v1 = vsel %vm431_vm11, %v348_v2, %v687_v42 }
 0x12e   :  { %v3330_v11 = vmul.f32 1.050701, %v751_v1 }
 0x12f   :  { %v2748_v13 = vpop.eup %2747  ;;  %v528_v14 = vmul.f32 1.442695, %v241_v62  ;;  %v530_v15 = vmul.f32 1.442695, %v354_v63  ;;  %287 = vmatmul.f32.gmra.mxu0 %v139_v61  ;;  %400 = vmatmul.f32.gmra.mxu1 %v139_v61  ;;  %vm434_vm14 = vcmp.gt.f32.partialorder %v241_v62, 0.0  ;;  %vm435_vm15 = vcmp.gt.f32.partialorder %v354_v63, 0.0 }
 0x130   :  { %v2750_v19 = vpop.eup %2749  ;;  %977 = vmatmul.f32.gmra.mxu2 %v3328_v0  ;;  %1090 = vmatmul.f32.gmra.mxu3 %v3330_v11  ;;  %v2580_v5 = vadd.f32 -1.0, %v2748_v13 }
 0x131   :  { %2751 = vpow2.f32 %v528_v14  ;;  %v2581_v16 = vadd.f32 -1.0, %v2750_v19  ;;  %v1828_v19 = vld [vmem:[#allocation10 + $0x30] sm:$0xff] }
 0x132   :  { %2753 = vpow2.f32 %v530_v15  ;;  %v688_v21 = vmul.f32 1.6732632, %v2580_v5  ;;  %v1844_v5 = vld [vmem:[#allocation10 + $0xb0] sm:$0xff]  ;;  %1867 = vmatpush.msrb.mxu2 %v1828_v19 }
 0x133   :  { %v689_v22 = vmul.f32 1.6732632, %v2581_v16  ;;  %1980 = vmatpush.msrb.mxu3 %v1844_v5 }
 0x134   :  { %v243_v2 = vpop.f32.mrf.mxu0  ;;  %v356_v24 = vpop.f32.mrf.mxu1  ;;  %v752_v17 = vsel %vm432_vm12, %v238_v33, %v688_v21 }
 0x135   :  { %v244_v26 = vadd.f32 %v243_v2, %v3214_v39  ;;  %v357_v27 = vadd.f32 %v356_v24, %v3216_v40  ;;  %v3336_v29 = vmul.f32 1.050701, %v752_v17  ;;  %v753_v36 = vsel %vm433_vm13, %v351_v35, %v689_v22 }
 0x136   :  { %v3338_v38 = vmul.f32 1.050701, %v753_v36  ;;  %v3363_v36 = vld [vmem:[%s4212_s5] sm:$0x3] }
 0x137   :  { %v2752_v44 = vpop.eup %2751  ;;  %v532_v46 = vmul.f32 1.442695, %v244_v26  ;;  %v534_v48 = vmul.f32 1.442695, %v357_v27  ;;  %1164 = vmatmul.f32.vlgmr.msrb.gmra.mxu0 %v3224_v7  ;;  %1277 = vmatmul.f32.vlgmr.msrb.gmra.mxu1 %v3226_v9  ;;  %vm436_vm0 = vcmp.gt.f32.partialorder %v244_v26, 0.0  ;;  %vm437_vm1 = vcmp.gt.f32.partialorder %v357_v27, 0.0 }
 0x138   :  { %v2754_v41 = vpop.eup %2753  ;;  %980 = vmatmul.f32.gmra.mxu2 %v3336_v29  ;;  %1093 = vmatmul.f32.gmra.mxu3 %v3338_v38  ;;  %v2582_v33 = vadd.f32 -1.0, %v2752_v44 }
 0x139   :  { %2755 = vpow2.f32 %v532_v46  ;;  %v2583_v51 = vadd.f32 -1.0, %v2754_v41 }
 0x13a   :  { %2757 = vpow2.f32 %v534_v48  ;;  %v690_v56 = vmul.f32 1.6732632, %v2582_v33 }
 0x13b   :  { %v691_v35 = vmul.f32 1.6732632, %v2583_v51 }
 0x13c   :  { %v246_v53 = vpop.f32.mrf.mxu0  ;;  %v359_v58 = vpop.f32.mrf.mxu1  ;;  %v754_v42 = vsel %vm434_vm14, %v241_v62, %v690_v56 }
 0x13d   :  { %v247_v7 = vadd.f32 %v246_v53, %v3214_v39  ;;  %v360_v9 = vadd.f32 %v359_v58, %v3216_v40  ;;  %v3346_v59 = vmul.f32 1.050701, %v754_v42  ;;  %v755_v60 = vsel %vm435_vm15, %v354_v63, %v691_v35 }
 0x13e   :  { %v3348_v61 = vmul.f32 1.050701, %v755_v60 }
 0x13f   :  { %v2756_v54 = vpop.eup %2755  ;;  %v536_v1 = vmul.f32 1.442695, %v247_v7  ;;  %v538_v13 = vmul.f32 1.442695, %v360_v9  ;;  %1167 = vmatmul.f32.gmra.mxu0 %v3232_v28  ;;  %1280 = vmatmul.f32.gmra.mxu1 %v3234_v30  ;;  %vm438_vm2 = vcmp.gt.f32.partialorder %v247_v7, 0.0  ;;  %vm439_vm3 = vcmp.gt.f32.partialorder %v360_v9, 0.0 }
 0x140   :  { %v2758_v14 = vpop.eup %2757  ;;  %983 = vmatmul.f32.gmra.mxu2 %v3346_v59  ;;  %1096 = vmatmul.f32.gmra.mxu3 %v3348_v61  ;;  %v2584_v62 = vadd.f32 -1.0, %v2756_v54 }
 0x141   :  { %2759 = vpow2.f32 %v536_v1  ;;  %v2585_v15 = vadd.f32 -1.0, %v2758_v14 }
 0x142   :  { %2761 = vpow2.f32 %v538_v13  ;;  %v692_v63 = vmul.f32 1.6732632, %v2584_v62 }
 0x143   :  { %v693_v16 = vmul.f32 1.6732632, %v2585_v15 }
 0x144   :  { %v249_v21 = vpop.f32.mrf.mxu0  ;;  %v362_v28 = vpop.f32.mrf.mxu1  ;;  %v756_v22 = vsel %vm436_vm0, %v244_v26, %v692_v63 }
 0x145   :  { %v250_v30 = vadd.f32 %v249_v21, %v3214_v39  ;;  %v3356_v2 = vadd.f32 %v362_v28, %v3216_v40  ;;  %v3358_v24 = vmul.f32 1.050701, %v756_v22  ;;  %v757_v17 = vsel %vm437_vm1, %v357_v27, %v693_v16  ;;  %v1827_v21 = vld [vmem:[#allocation10 + $0x28] sm:$0xff] }
 0x146   :  { %v3365_v44 = vmul.f32 1.050701, %v757_v17  ;;  %v3373_v27 = vperm.slane %v3363_v36, 0  ;;  %v1843_v28 = vld [vmem:[#allocation10 + $0xa8] sm:$0xff]  ;;  %1868 = vmatpush.msrb.mxu2 %v1827_v21 }
 0x147   :  { %v2760_v46 = vpop.eup %2759  ;;  %v540_v48 = vmul.f32 1.442695, %v250_v30  ;;  %v542_v26 = vmul.f32 1.442695, %v3356_v2  ;;  %1170 = vmatmul.f32.gmra.mxu0 %v3240_v47  ;;  %1283 = vmatmul.f32.gmra.mxu1 %v3242_v49  ;;  %vm440_vm4 = vcmp.gt.f32.partialorder %v250_v30, 0.0  ;;  %vm441_vm5 = vcmp.gt.f32.partialorder %v3356_v2, 0.0 }
 0x148   :  { %v2762_v41 = vpop.eup %2761  ;;  %986 = vmatmul.f32.gmra.mxu2 %v3358_v24  ;;  %1099 = vmatmul.f32.gmra.mxu3 %v3365_v44  ;;  %v2586_v33 = vadd.f32 -1.0, %v2760_v46 }
 0x149   :  { %2763 = vpow2.f32 %v540_v48  ;;  %v2587_v51 = vadd.f32 -1.0, %v2762_v41  ;;  %1981 = vmatpush.msrb.mxu3 %v1843_v28 }
 0x14a   :  { %2765 = vpow2.f32 %v542_v26  ;;  %v694_v56 = vmul.f32 1.6732632, %v2586_v33 }
 0x14b   :  { %v939_v35 = vpop.f32.mrf.mxu2  ;;  %v1052_v53 = vpop.f32.mrf.mxu3  ;;  %v695_v58 = vmul.f32 1.6732632, %v2587_v51 }
 0x14c   :  { %v940_v47 = vadd.f32 %v939_v35, %v3373_v27  ;;  %v252_v49 = vpop.f32.mrf.mxu0  ;;  %v365_v42 = vpop.f32.mrf.mxu1  ;;  %v758_v60 = vsel %vm438_vm2, %v247_v7, %v694_v56 }
 0x14d   :  { %v253_v54 = vadd.f32 %v252_v49, %v3214_v39  ;;  %v3378_v1 = vadd.f32 %v365_v42, %v3216_v40  ;;  %v3380_v13 = vmul.f32 1.050701, %v758_v60  ;;  %v759_v14 = vsel %vm439_vm3, %v360_v9, %v695_v58 }
 0x14e   :  { %v3382_v62 = vadd.f32 %v1052_v53, %v940_v47  ;;  %v3384_v15 = vmul.f32 1.050701, %v759_v14 }
 0x14f   :  { %v2764_v19 = vpop.eup %2763  ;;  %v544_v5 = vmul.f32 1.442695, %v253_v54  ;;  %v546_v63 = vmul.f32 1.442695, %v3378_v1  ;;  %1173 = vmatmul.f32.gmra.mxu0 %v3248_v4  ;;  %1286 = vmatmul.f32.gmra.mxu1 %v3250_v6  ;;  %vm442_vm6 = vcmp.gt.f32.partialorder %v253_v54, 0.0  ;;  %vm443_vm7 = vcmp.gt.f32.partialorder %v3378_v1, 0.0 }
 0x150   :  { %v2766_v7 = vpop.eup %2765  ;;  %989 = vmatmul.f32.gmra.mxu2 %v3380_v13  ;;  %1102 = vmatmul.f32.gmra.mxu3 %v3384_v15  ;;  %v2588_v16 = vadd.f32 -1.0, %v2764_v19 }
 0x151   :  { %2767 = vpow2.f32 %v544_v5  ;;  %v2589_v9 = vadd.f32 -1.0, %v2766_v7 }
 0x152   :  { %v696_v22 = vmul.f32 1.6732632, %v2588_v16  ;;  %2769 = vpow2.f32 %v546_v63 }
 0x153   :  { %v942_v17 = vpop.f32.mrf.mxu2  ;;  %v1055_v46 = vpop.f32.mrf.mxu3  ;;  %v697_v4 = vmul.f32 1.6732632, %v2589_v9 }
 0x154   :  { %v943_v6 = vadd.f32 %v942_v17, %v3373_v27  ;;  %v255_v48 = vpop.f32.mrf.mxu0  ;;  %v368_v26 = vpop.f32.mrf.mxu1  ;;  %v760_v41 = vsel %vm440_vm4, %v250_v30, %v696_v22 }
 0x155   :  { %v256_v33 = vadd.f32 %v255_v48, %v3214_v39  ;;  %v3395_v51 = vadd.f32 %v368_v26, %v3216_v40  ;;  %v3397_v56 = vmul.f32 1.050701, %v760_v41  ;;  %v761_v35 = vsel %vm441_vm5, %v3356_v2, %v697_v4 }
 0x156   :  { %v3400_v53 = vadd.f32 %v1055_v46, %v943_v6  ;;  %v3402_v58 = vmul.f32 1.050701, %v761_v35 }
 0x157   :  { %v2768_v47 = vpop.eup %2767  ;;  %v548_v49 = vmul.f32 1.442695, %v256_v33  ;;  %v550_v42 = vmul.f32 1.442695, %v3395_v51  ;;  %1176 = vmatmul.f32.gmra.mxu0 %v3256_v23  ;;  %1289 = vmatmul.f32.gmra.mxu1 %v3258_v25  ;;  %vm444_vm8 = vcmp.gt.f32.partialorder %v256_v33, 0.0  ;;  %vm445_vm9 = vcmp.gt.f32.partialorder %v3395_v51, 0.0 }
 0x158   :  { %992 = vmatmul.f32.gmra.mxu2 %v3397_v56  ;;  %1105 = vmatmul.f32.gmra.mxu3 %v3402_v58  ;;  %v2590_v30 = vadd.f32 -1.0, %v2768_v47  ;;  %v2770_v60 = vpop.eup %2769  ;;  %v1842_v47 = vld [vmem:[#allocation10 + $0xa0] sm:$0xff] }
 0x159   :  { %2771 = vpow2.f32 %v548_v49  ;;  %v2591_v14 = vadd.f32 -1.0, %v2770_v60  ;;  %1982 = vmatpush.msrb.mxu3 %v1842_v47 }
 0x15a   :  { %v698_v2 = vmul.f32 1.6732632, %v2590_v30  ;;  %2773 = vpow2.f32 %v550_v42 }
 0x15b   :  { %v945_v19 = vpop.f32.mrf.mxu2  ;;  %v1058_v5 = vpop.f32.mrf.mxu3  ;;  %v699_v9 = vmul.f32 1.6732632, %v2591_v14 }
 0x15c   :  { %v946_v63 = vadd.f32 %v945_v19, %v3373_v27  ;;  %v258_v7 = vpop.f32.mrf.mxu0  ;;  %v371_v16 = vpop.f32.mrf.mxu1  ;;  %v762_v23 = vsel %vm442_vm6, %v253_v54, %v698_v2 }
 0x15d   :  { %v259_v25 = vadd.f32 %v258_v7, %v3214_v39  ;;  %v3412_v21 = vadd.f32 %v371_v16, %v3216_v40  ;;  %v3414_v28 = vmul.f32 1.050701, %v762_v23  ;;  %v763_v17 = vsel %vm443_vm7, %v3378_v1, %v699_v9  ;;  %v1826_v1 = vld [vmem:[#allocation10 + $0x20] sm:$0xff] }
 0x15e   :  { %v3417_v22 = vadd.f32 %v1058_v5, %v946_v63  ;;  %v3421_v48 = vmul.f32 1.050701, %v763_v17  ;;  %1869 = vmatpush.msrb.mxu2 %v1826_v1 }
 0x15f   :  { %v2772_v46 = vpop.eup %2771  ;;  %v552_v4 = vmul.f32 1.442695, %v259_v25  ;;  %v554_v6 = vmul.f32 1.442695, %v3412_v21  ;;  %1179 = vmatmul.f32.gmra.mxu0 %v3264_v50  ;;  %1292 = vmatmul.f32.gmra.mxu1 %v3266_v52  ;;  %vm446_vm10 = vcmp.gt.f32.partialorder %v259_v25, 0.0  ;;  %vm447_vm11 = vcmp.gt.f32.partialorder %v3412_v21, 0.0 }
 0x160   :  { %995 = vmatmul.f32.gmra.mxu2 %v3414_v28  ;;  %v2592_v54 = vadd.f32 -1.0, %v2772_v46  ;;  %v2774_v26 = vpop.eup %2773  ;;  %1108 = vmatmul.f32.gmra.mxu3 %v3421_v48 }
 0x161   :  { %2775 = vpow2.f32 %v552_v4  ;;  %v2593_v35 = vadd.f32 -1.0, %v2774_v26 }
 0x162   :  { %v700_v41 = vmul.f32 1.6732632, %v2592_v54  ;;  %2777 = vpow2.f32 %v554_v6 }
 0x163   :  { %v948_v49 = vpop.f32.mrf.mxu2  ;;  %v1061_v42 = vpop.f32.mrf.mxu3  ;;  %v701_v2 = vmul.f32 1.6732632, %v2593_v35 }
 0x164   :  { %v949_v50 = vadd.f32 %v948_v49, %v3373_v27  ;;  %v261_v52 = vpop.f32.mrf.mxu0  ;;  %v374_v30 = vpop.f32.mrf.mxu1  ;;  %v764_v60 = vsel %vm444_vm8, %v256_v33, %v700_v41 }
 0x165   :  { %v262_v14 = vadd.f32 %v261_v52, %v3214_v39  ;;  %v3430_v19 = vadd.f32 %v374_v30, %v3216_v40  ;;  %v3432_v5 = vmul.f32 1.050701, %v764_v60  ;;  %v765_v7 = vsel %vm445_vm9, %v3395_v51, %v701_v2 }
 0x166   :  { %v3435_v63 = vadd.f32 %v1061_v42, %v949_v50  ;;  %v3439_v17 = vmul.f32 1.050701, %v765_v7 }
 0x167   :  { %v2776_v16 = vpop.eup %2775  ;;  %v556_v23 = vmul.f32 1.442695, %v262_v14  ;;  %v558_v9 = vmul.f32 1.442695, %v3430_v19  ;;  %1182 = vmatmul.f32.gmra.mxu0 %v3272_v3  ;;  %1295 = vmatmul.f32.gmra.mxu1 %v3274_v8  ;;  %vm448_vm12 = vcmp.gt.f32.partialorder %v262_v14, 0.0  ;;  %vm449_vm13 = vcmp.gt.f32.partialorder %v3430_v19, 0.0 }
 0x168   :  { %998 = vmatmul.f32.gmra.mxu2 %v3432_v5  ;;  %v2594_v33 = vadd.f32 -1.0, %v2776_v16  ;;  %v2778_v46 = vpop.eup %2777  ;;  %1111 = vmatmul.f32.gmra.mxu3 %v3439_v17 }
 0x169   :  { %2779 = vpow2.f32 %v556_v23  ;;  %v2595_v6 = vadd.f32 -1.0, %v2778_v46 }
 0x16a   :  { %v702_v4 = vmul.f32 1.6732632, %v2594_v33  ;;  %2781 = vpow2.f32 %v558_v9  ;;  %v1841_v9 = vld [vmem:[#allocation10 + $0x98] sm:$0xff] }
 0x16b   :  { %v951_v51 = vpop.f32.mrf.mxu2  ;;  %v1064_v54 = vpop.f32.mrf.mxu3  ;;  %v703_v1 = vmul.f32 1.6732632, %v2595_v6  ;;  %1983 = vmatpush.msrb.mxu3 %v1841_v9 }
 0x16c   :  { %v952_v26 = vadd.f32 %v951_v51, %v3373_v27  ;;  %v264_v41 = vpop.f32.mrf.mxu0  ;;  %v377_v35 = vpop.f32.mrf.mxu1  ;;  %v766_v3 = vsel %vm446_vm10, %v259_v25, %v702_v4 }
 0x16d   :  { %v265_v8 = vadd.f32 %v264_v41, %v3214_v39  ;;  %v3448_v47 = vadd.f32 %v377_v35, %v3216_v40  ;;  %v3450_v49 = vmul.f32 1.050701, %v766_v3  ;;  %v767_v50 = vsel %vm447_vm11, %v3412_v21, %v703_v1  ;;  %v1825_v21 = vld [vmem:[#allocation10 + $0x18] sm:$0xff] }
 0x16e   :  { %v3453_v42 = vadd.f32 %v1064_v54, %v952_v26  ;;  %v3457_v2 = vmul.f32 1.050701, %v767_v50  ;;  %1870 = vmatpush.msrb.mxu2 %v1825_v21 }
 0x16f   :  { %v2780_v52 = vpop.eup %2779  ;;  %v560_v30 = vmul.f32 1.442695, %v265_v8  ;;  %v562_v60 = vmul.f32 1.442695, %v3448_v47  ;;  %1185 = vmatmul.f32.gmra.mxu0 %v3280_v32  ;;  %1298 = vmatmul.f32.gmra.mxu1 %v3282_v34  ;;  %vm450_vm14 = vcmp.gt.f32.partialorder %v265_v8, 0.0  ;;  %vm451_vm15 = vcmp.gt.f32.partialorder %v3448_v47, 0.0 }
 0x170   :  { %1001 = vmatmul.f32.gmra.mxu2 %v3450_v49  ;;  %v2596_v25 = vadd.f32 -1.0, %v2780_v52  ;;  %v2782_v7 = vpop.eup %2781  ;;  %1114 = vmatmul.f32.gmra.mxu3 %v3457_v2 }
 0x171   :  { %2783 = vpow2.f32 %v560_v30  ;;  %v2597_v23 = vadd.f32 -1.0, %v2782_v7 }
 0x172   :  { %v704_v16 = vmul.f32 1.6732632, %v2596_v25  ;;  %2785 = vpow2.f32 %v562_v60 }
 0x173   :  { %v954_v33 = vpop.f32.mrf.mxu2  ;;  %v1067_v46 = vpop.f32.mrf.mxu3  ;;  %v705_v51 = vmul.f32 1.6732632, %v2597_v23 }
 0x174   :  { %v955_v32 = vadd.f32 %v954_v33, %v3373_v27  ;;  %v267_v34 = vpop.f32.mrf.mxu0  ;;  %v380_v4 = vpop.f32.mrf.mxu1  ;;  %v768_v6 = vsel %vm448_vm12, %v262_v14, %v704_v16 }
 0x175   :  { %v268_v54 = vadd.f32 %v267_v34, %v3214_v39  ;;  %v3466_v26 = vadd.f32 %v380_v4, %v3216_v40  ;;  %v3468_v41 = vmul.f32 1.050701, %v768_v6  ;;  %v769_v3 = vsel %vm449_vm13, %v3430_v19, %v705_v51 }
 0x176   :  { %v3471_v35 = vadd.f32 %v1067_v46, %v955_v32  ;;  %v3478_v14 = vmul.f32 1.050701, %v769_v3 }
 0x177   :  { %v2784_v1 = vpop.eup %2783  ;;  %v564_v50 = vmul.f32 1.442695, %v268_v54  ;;  %v566_v52 = vmul.f32 1.442695, %v3466_v26  ;;  %1188 = vmatmul.f32.gmra.mxu0 %v3288_v55  ;;  %1301 = vmatmul.f32.gmra.mxu1 %v3290_v57  ;;  %vm452_vm0 = vcmp.gt.f32.partialorder %v268_v54, 0.0  ;;  %vm453_vm1 = vcmp.gt.f32.partialorder %v3466_v26, 0.0 }
 0x178   :  { %1004 = vmatmul.f32.gmra.mxu2 %v3468_v41  ;;  %v2598_v30 = vadd.f32 -1.0, %v2784_v1  ;;  %v2786_v60 = vpop.eup %2785  ;;  %1117 = vmatmul.f32.gmra.mxu3 %v3478_v14 }
 0x179   :  { %2787 = vpow2.f32 %v564_v50  ;;  %v2599_v7 = vadd.f32 -1.0, %v2786_v60  ;;  %v1840_v60 = vld [vmem:[#allocation10 + $0x90] sm:$0xff] }
 0x17a   :  { %v706_v25 = vmul.f32 1.6732632, %v2598_v30  ;;  %2789 = vpow2.f32 %v566_v52  ;;  %1984 = vmatpush.msrb.mxu3 %v1840_v60 }
 0x17b   :  { %v957_v19 = vpop.f32.mrf.mxu2  ;;  %v1070_v16 = vpop.f32.mrf.mxu3  ;;  %v707_v9 = vmul.f32 1.6732632, %v2599_v7 }
 0x17c   :  { %v958_v23 = vadd.f32 %v957_v19, %v3373_v27  ;;  %v270_v55 = vpop.f32.mrf.mxu0  ;;  %v383_v21 = vpop.f32.mrf.mxu1  ;;  %v770_v57 = vsel %vm450_vm14, %v265_v8, %v706_v25 }
 0x17d   :  { %v271_v33 = vadd.f32 %v270_v55, %v3214_v39  ;;  %v3484_v46 = vadd.f32 %v383_v21, %v3216_v40  ;;  %v3486_v32 = vmul.f32 1.050701, %v770_v57  ;;  %v771_v4 = vsel %vm451_vm15, %v3448_v47, %v707_v9  ;;  %v1824_v47 = vld [vmem:[#allocation10 + $0x10] sm:$0xff] }
 0x17e   :  { %v3489_v34 = vadd.f32 %v1070_v16, %v958_v23  ;;  %v3496_v1 = vmul.f32 1.050701, %v771_v4  ;;  %1871 = vmatpush.msrb.mxu2 %v1824_v47 }
 0x17f   :  { %v2788_v6 = vpop.eup %2787  ;;  %v568_v51 = vmul.f32 1.442695, %v271_v33  ;;  %v570_v3 = vmul.f32 1.442695, %v3484_v46  ;;  %1191 = vmatmul.f32.gmra.mxu0 %v3296_v18  ;;  %1304 = vmatmul.f32.gmra.mxu1 %v3298_v20  ;;  %vm454_vm2 = vcmp.gt.f32.partialorder %v271_v33, 0.0  ;;  %vm455_vm3 = vcmp.gt.f32.partialorder %v3484_v46, 0.0 }
 0x180   :  { %v2600_v8 = vadd.f32 -1.0, %v2788_v6  ;;  %1007 = vmatmul.f32.gmra.mxu2 %v3486_v32  ;;  %v2790_v50 = vpop.eup %2789  ;;  %1120 = vmatmul.f32.gmra.mxu3 %v3496_v1 }
 0x181   :  { %2791 = vpow2.f32 %v568_v51  ;;  %v2601_v52 = vadd.f32 -1.0, %v2790_v50 }
 0x182   :  { %v708_v30 = vmul.f32 1.6732632, %v2600_v8  ;;  %2793 = vpow2.f32 %v570_v3 }
 0x183   :  { %v960_v25 = vpop.f32.mrf.mxu2  ;;  %v1073_v7 = vpop.f32.mrf.mxu3  ;;  %v709_v23 = vmul.f32 1.6732632, %v2601_v52 }
 0x184   :  { %v961_v18 = vadd.f32 %v960_v25, %v3373_v27  ;;  %v273_v20 = vpop.f32.mrf.mxu0  ;;  %v386_v19 = vpop.f32.mrf.mxu1  ;;  %v772_v16 = vsel %vm452_vm0, %v268_v54, %v708_v30  ;;  %vm1374_vm0 = vcmp.gt.f32.partialorder %v3382_v62, 0.0 }
 0x185   :  { %v274_v55 = vadd.f32 %v273_v20, %v3214_v39  ;;  %v3503_v21 = vadd.f32 %v386_v19, %v3216_v40  ;;  %v3505_v57 = vmul.f32 1.050701, %v772_v16  ;;  %v773_v4 = vsel %vm453_vm1, %v3466_v26, %v709_v23 }
 0x186   :  { %v3507_v9 = vadd.f32 %v1073_v7, %v961_v18  ;;  %v3514_v8 = vmul.f32 1.050701, %v773_v4 }
 0x187   :  { %v2792_v6 = vpop.eup %2791  ;;  %v572_v51 = vmul.f32 1.442695, %v274_v55  ;;  %v574_v3 = vmul.f32 1.442695, %v3503_v21  ;;  %1194 = vmatmul.f32.gmra.mxu0 %v3304_v43  ;;  %1307 = vmatmul.f32.gmra.mxu1 %v3306_v45  ;;  %vm456_vm4 = vcmp.gt.f32.partialorder %v274_v55, 0.0  ;;  %vm457_vm5 = vcmp.gt.f32.partialorder %v3503_v21, 0.0 }
 0x188   :  { %v2602_v54 = vadd.f32 -1.0, %v2792_v6  ;;  %1010 = vmatmul.f32.gmra.mxu2 %v3505_v57  ;;  %v2794_v50 = vpop.eup %2793  ;;  %1123 = vmatmul.f32.gmra.mxu3 %v3514_v8 }
 0x189   :  { %2795 = vpow2.f32 %v572_v51  ;;  %v2603_v52 = vadd.f32 -1.0, %v2794_v50 }
 0x18a   :  { %v710_v30 = vmul.f32 1.6732632, %v2602_v54  ;;  %2797 = vpow2.f32 %v574_v3 }
 0x18b   :  { %v963_v26 = vpop.f32.mrf.mxu2  ;;  %v1076_v47 = vpop.f32.mrf.mxu3  ;;  %v711_v7 = vmul.f32 1.6732632, %v2603_v52 }
 0x18c   :  { %v964_v60 = vadd.f32 %v963_v26, %v3373_v27  ;;  %v276_v43 = vpop.f32.mrf.mxu0  ;;  %v389_v25 = vpop.f32.mrf.mxu1  ;;  %v774_v45 = vsel %vm454_vm2, %v271_v33, %v710_v30  ;;  %v1839_v30 = vld [vmem:[#allocation10 + $0x88] sm:$0xff]  ;;  %vm1376_vm2 = vcmp.gt.f32.partialorder %v3400_v53, 0.0 }
 0x18d   :  { %v277_v18 = vadd.f32 %v276_v43, %v3214_v39  ;;  %v3521_v20 = vadd.f32 %v389_v25, %v3216_v40  ;;  %v3523_v19 = vmul.f32 1.050701, %v774_v45  ;;  %v775_v23 = vsel %vm455_vm3, %v3484_v46, %v711_v7  ;;  %v1823_v46 = vld [vmem:[#allocation10 + $0x8] sm:$0xff]  ;;  %1985 = vmatpush.msrb.mxu3 %v1839_v30 }
 0x18e   :  { %v3525_v16 = vadd.f32 %v1076_v47, %v964_v60  ;;  %v3532_v3 = vmul.f32 1.050701, %v775_v23  ;;  %1872 = vmatpush.msrb.mxu2 %v1823_v46 }
 0x18f   :  { %v2796_v4 = vpop.eup %2795  ;;  %v576_v6 = vmul.f32 1.442695, %v277_v18  ;;  %v578_v51 = vmul.f32 1.442695, %v3521_v20  ;;  %1197 = vmatmul.f32.gmra.mxu0 %v3312_v10  ;;  %1310 = vmatmul.f32.gmra.mxu1 %v3314_v12  ;;  %vm458_vm6 = vcmp.gt.f32.partialorder %v277_v18, 0.0  ;;  %vm459_vm7 = vcmp.gt.f32.partialorder %v3521_v20, 0.0 }
 0x190   :  { %v2604_v33 = vadd.f32 -1.0, %v2796_v4  ;;  %1013 = vmatmul.f32.gmra.mxu2 %v3523_v19  ;;  %v2798_v54 = vpop.eup %2797  ;;  %1126 = vmatmul.f32.gmra.mxu3 %v3532_v3 }
 0x191   :  { %2799 = vpow2.f32 %v576_v6  ;;  %v2605_v50 = vadd.f32 -1.0, %v2798_v54 }
 0x192   :  { %v712_v52 = vmul.f32 1.6732632, %v2604_v33  ;;  %2801 = vpow2.f32 %v578_v51 }
 0x193   :  { %v966_v26 = vpop.f32.mrf.mxu2  ;;  %v1079_v47 = vpop.f32.mrf.mxu3  ;;  %v713_v25 = vmul.f32 1.6732632, %v2605_v50 }
 0x194   :  { %v967_v10 = vadd.f32 %v966_v26, %v3373_v27  ;;  %v279_v12 = vpop.f32.mrf.mxu0  ;;  %v392_v60 = vpop.f32.mrf.mxu1  ;;  %v776_v43 = vsel %vm456_vm4, %v274_v55, %v712_v52  ;;  %vm1378_vm4 = vcmp.gt.f32.partialorder %v3417_v22, 0.0 }
 0x195   :  { %v280_v45 = vadd.f32 %v279_v12, %v3214_v39  ;;  %v393_v7 = vadd.f32 %v392_v60, %v3216_v40  ;;  %v3539_v23 = vmul.f32 1.050701, %v776_v43  ;;  %v777_v6 = vsel %vm457_vm5, %v3503_v21, %v713_v25 }
 0x196   :  { %v3541_v4 = vadd.f32 %v1079_v47, %v967_v10  ;;  %v3547_v50 = vmul.f32 1.050701, %v777_v6 }
 0x197   :  { %v2800_v51 = vpop.eup %2799  ;;  %v580_v33 = vmul.f32 1.442695, %v280_v45  ;;  %v582_v54 = vmul.f32 1.442695, %v393_v7  ;;  %1200 = vmatmul.f32.gmra.mxu0 %v3320_v31  ;;  %1313 = vmatmul.f32.gmra.mxu1 %v3322_v37  ;;  %vm460_vm8 = vcmp.gt.f32.partialorder %v280_v45, 0.0  ;;  %vm461_vm9 = vcmp.gt.f32.partialorder %v393_v7, 0.0 }
 0x198   :  { %v2606_v55 = vadd.f32 -1.0, %v2800_v51  ;;  %1016 = vmatmul.f32.gmra.mxu2 %v3539_v23  ;;  %v2802_v52 = vpop.eup %2801  ;;  %1129 = vmatmul.f32.gmra.mxu3 %v3547_v50 }
 0x199   :  { %2803 = vpow2.f32 %v580_v33  ;;  %v2607_v46 = vadd.f32 -1.0, %v2802_v52 }
 0x19a   :  { %v714_v30 = vmul.f32 1.6732632, %v2606_v55  ;;  %2805 = vpow2.f32 %v582_v54 }
 0x19b   :  { %v969_v21 = vpop.f32.mrf.mxu2  ;;  %v1082_v26 = vpop.f32.mrf.mxu3  ;;  %v715_v12 = vmul.f32 1.6732632, %v2607_v46 }
 0x19c   :  { %v970_v47 = vadd.f32 %v969_v21, %v3373_v27  ;;  %v282_v31 = vpop.f32.mrf.mxu0  ;;  %v395_v10 = vpop.f32.mrf.mxu1  ;;  %v778_v37 = vsel %vm458_vm6, %v277_v18, %v714_v30  ;;  %vm1380_vm6 = vcmp.gt.f32.partialorder %v3435_v63, 0.0 }
 0x19d   :  { %v283_v60 = vadd.f32 %v282_v31, %v3214_v39  ;;  %v3554_v43 = vadd.f32 %v395_v10, %v3216_v40  ;;  %v3556_v25 = vmul.f32 1.050701, %v778_v37  ;;  %v779_v51 = vsel %vm459_vm7, %v3521_v20, %v715_v12 }
 0x19e   :  { %v3558_v6 = vadd.f32 %v1082_v26, %v970_v47  ;;  %v3565_v52 = vmul.f32 1.050701, %v779_v51 }
 0x19f   :  { %v2804_v33 = vpop.eup %2803  ;;  %v584_v54 = vmul.f32 1.442695, %v283_v60  ;;  %v586_v55 = vmul.f32 1.442695, %v3554_v43  ;;  %1203 = vmatmul.f32.gmra.mxu0 %v3328_v0  ;;  %1316 = vmatmul.f32.gmra.mxu1 %v3330_v11  ;;  %vm462_vm10 = vcmp.gt.f32.partialorder %v283_v60, 0.0  ;;  %vm463_vm11 = vcmp.gt.f32.partialorder %v3554_v43, 0.0 }
 0x1a0   :  { %v2608_v18 = vadd.f32 -1.0, %v2804_v33  ;;  %1019 = vmatmul.f32.gmra.mxu2 %v3556_v25  ;;  %v2806_v46 = vpop.eup %2805  ;;  %1132 = vmatmul.f32.gmra.mxu3 %v3565_v52 }
 0x1a1   :  { %2807 = vpow2.f32 %v584_v54  ;;  %v2609_v30 = vadd.f32 -1.0, %v2806_v46 }
 0x1a2   :  { %v716_v21 = vmul.f32 1.6732632, %v2608_v18  ;;  %2809 = vpow2.f32 %v586_v55 }
 0x1a3   :  { %v972_v20 = vpop.f32.mrf.mxu2  ;;  %v1085_v26 = vpop.f32.mrf.mxu3  ;;  %v717_v10 = vmul.f32 1.6732632, %v2609_v30 }
 0x1a4   :  { %v973_v47 = vadd.f32 %v972_v20, %v3373_v27  ;;  %v285_v0 = vpop.f32.mrf.mxu0  ;;  %v398_v31 = vpop.f32.mrf.mxu1  ;;  %v780_v11 = vsel %vm460_vm8, %v280_v45, %v716_v21  ;;  %v1822_v20 = vld [vmem:[#allocation10] sm:$0xff]  ;;  %vm1382_vm8 = vcmp.gt.f32.partialorder %v3453_v42, 0.0 }
 0x1a5   :  { %v286_v37 = vadd.f32 %v285_v0, %v3214_v39  ;;  %v3571_v12 = vadd.f32 %v398_v31, %v3216_v40  ;;  %v3573_v51 = vmul.f32 1.050701, %v780_v11  ;;  %v781_v54 = vsel %vm461_vm9, %v393_v7, %v717_v10  ;;  %v1838_v0 = vld [vmem:[#allocation10 + $0x80] sm:$0xff]  ;;  %1873 = vmatpush.msrb.mxu2 %v1822_v20 }
 0x1a6   :  { %v3575_v33 = vadd.f32 %v1085_v26, %v973_v47  ;;  %v3581_v30 = vmul.f32 1.050701, %v781_v54  ;;  %1986 = vmatpush.msrb.mxu3 %v1838_v0 }
 0x1a7   :  { %v2808_v55 = vpop.eup %2807  ;;  %v588_v18 = vmul.f32 1.442695, %v286_v37  ;;  %v590_v46 = vmul.f32 1.442695, %v3571_v12  ;;  %1206 = vmatmul.f32.gmra.mxu0 %v3336_v29  ;;  %1319 = vmatmul.f32.gmra.mxu1 %v3338_v38  ;;  %vm464_vm12 = vcmp.gt.f32.partialorder %v286_v37, 0.0  ;;  %vm465_vm13 = vcmp.gt.f32.partialorder %v3571_v12, 0.0 }
 0x1a8   :  { %v2610_v45 = vadd.f32 -1.0, %v2808_v55  ;;  %1022 = vmatmul.f32.gmra.mxu2 %v3573_v51  ;;  %v2810_v21 = vpop.eup %2809  ;;  %1135 = vmatmul.f32.gmra.mxu3 %v3581_v30 }
 0x1a9   :  { %2811 = vpow2.f32 %v588_v18  ;;  %v2611_v26 = vadd.f32 -1.0, %v2810_v21 }
 0x1aa   :  { %v718_v7 = vmul.f32 1.6732632, %v2610_v45  ;;  %2813 = vpow2.f32 %v590_v46  ;;  %v1438_v46 = vmul.f32 1.442695, %v3382_v62 }
 0x1ab   :  { %v975_v47 = vpop.f32.mrf.mxu2  ;;  %v1088_v29 = vpop.f32.mrf.mxu3  ;;  %v719_v54 = vmul.f32 1.6732632, %v2611_v26 }
 0x1ac   :  { %v976_v38 = vadd.f32 %v975_v47, %v3373_v27  ;;  %v288_v31 = vpop.f32.mrf.mxu0  ;;  %v401_v11 = vpop.f32.mrf.mxu1  ;;  %v782_v10 = vsel %vm462_vm10, %v283_v60, %v718_v7  ;;  %v3603_v7 = vperm.slane %v3363_v36, 1  ;;  %vm1384_vm10 = vcmp.gt.f32.partialorder %v3471_v35, 0.0 }
 0x1ad   :  { %v289_v55 = vadd.f32 %v288_v31, %v3214_v39  ;;  %v3588_v18 = vadd.f32 %v401_v11, %v3216_v40  ;;  %v3590_v45 = vmul.f32 1.050701, %v782_v10  ;;  %v783_v20 = vsel %vm463_vm11, %v3554_v43, %v719_v54 }
 0x1ae   :  { %v3593_v21 = vadd.f32 %v1088_v29, %v976_v38  ;;  %v3600_v40 = vmul.f32 1.050701, %v783_v20 }
 0x1af   :  { %v2812_v0 = vpop.eup %2811  ;;  %v592_v47 = vmul.f32 1.442695, %v289_v55  ;;  %v594_v60 = vmul.f32 1.442695, %v3588_v18  ;;  %1209 = vmatmul.f32.gmra.mxu0 %v3346_v59  ;;  %1322 = vmatmul.f32.gmra.mxu1 %v3348_v61  ;;  %vm466_vm14 = vcmp.gt.f32.partialorder %v289_v55, 0.0  ;;  %vm467_vm15 = vcmp.gt.f32.partialorder %v3588_v18, 0.0 }
 0x1b0   :  { %v2612_v39 = vadd.f32 -1.0, %v2812_v0  ;;  %1025 = vmatmul.f32.gmra.mxu2 %v3590_v45  ;;  %v2814_v26 = vpop.eup %2813  ;;  %1138 = vmatmul.f32.gmra.mxu3 %v3600_v40 }
 0x1b1   :  { %2815 = vpow2.f32 %v592_v47  ;;  %v2613_v43 = vadd.f32 -1.0, %v2814_v26 }
 0x1b2   :  { %2817 = vpow2.f32 %v1438_v46  ;;  %v720_v29 = vmul.f32 1.6732632, %v2612_v39  ;;  %v1442_v46 = vmul.f32 1.442695, %v3400_v53 }
 0x1b3   :  { %2819 = vpow2.f32 %v594_v60  ;;  %v978_v59 = vpop.f32.mrf.mxu2  ;;  %v1091_v38 = vpop.f32.mrf.mxu3  ;;  %v721_v54 = vmul.f32 1.6732632, %v2613_v43 }
 0x1b4   :  { %v979_v61 = vadd.f32 %v978_v59, %v3373_v27  ;;  %v1165_v31 = vpop.f32.mrf.mxu0  ;;  %v1278_v11 = vpop.f32.mrf.mxu1  ;;  %v784_v10 = vsel %vm464_vm12, %v286_v37, %v720_v29  ;;  %2821 = vpow2.f32 %v1442_v46  ;;  %vm1386_vm12 = vcmp.gt.f32.partialorder %v3489_v34, 0.0 }
 0x1b5   :  { %v1166_v36 = vadd.f32 %v1165_v31, %v3603_v7  ;;  %v3609_v20 = vmul.f32 1.050701, %v784_v10  ;;  %v785_v47 = vsel %vm465_vm13, %v3571_v12, %v721_v54 }
 0x1b6   :  { %v3612_v0 = vadd.f32 %v1091_v38, %v979_v61  ;;  %v3615_v26 = vmul.f32 1.050701, %v785_v47 }
 0x1b7   :  { %v2816_v60 = vpop.eup %2815  ;;  %v1279_v39 = vadd.f32 %v1278_v11, %v1166_v36  ;;  %1212 = vmatmul.f32.gmra.mxu0 %v3358_v24  ;;  %1325 = vmatmul.f32.gmra.mxu1 %v3365_v44 }
 0x1b8   :  { %4217 = vst [vmem:[#allocation16_spill] sm:$0xff] %v3615_v26  ;;  %v2818_v37 = vpop.eup %2817  ;;  %v2614_v43 = vadd.f32 -1.0, %v2816_v60  ;;  %1028 = vmatmul.f32.gmra.mxu2 %v3609_v20  ;;  %1141 = vmatmul.f32.gmra.mxu3 %v3615_v26  ;;  %v1446_v60 = vmul.f32 1.442695, %v3417_v22 }
 0x1b9   :  { %v2820_v29 = vpop.eup %2819  ;;  %v1440_v59 = vmul.f32 1.442695, %v1279_v39  ;;  %v2616_v12 = vadd.f32 -1.0, %v2818_v37  ;;  %vm1375_vm1 = vcmp.gt.f32.partialorder %v1279_v39, 0.0 }
 0x1ba   :  { %v2615_v31 = vadd.f32 -1.0, %v2820_v29  ;;  %v722_v38 = vmul.f32 1.6732632, %v2614_v43 }
 0x1bb   :  { %2823 = vpow2.f32 %v1440_v59  ;;  %v981_v61 = vpop.f32.mrf.mxu2  ;;  %v1094_v11 = vpop.f32.mrf.mxu3  ;;  %v1630_v29 = vmul.f32 1.6732632, %v2616_v12 }
 0x1bc   :  { %v982_v24 = vadd.f32 %v981_v61, %v3373_v27  ;;  %v1168_v10 = vpop.f32.mrf.mxu0  ;;  %v1281_v44 = vpop.f32.mrf.mxu1  ;;  %v786_v54 = vsel %vm466_vm14, %v289_v55, %v722_v38  ;;  %v723_v36 = vmul.f32 1.6732632, %v2615_v31  ;;  %2825 = vpow2.f32 %v1446_v60 }
 0x1bd   :  { %v1169_v47 = vadd.f32 %v1168_v10, %v3603_v7  ;;  %v3624_v46 = vmul.f32 1.050701, %v786_v54  ;;  %v2822_v55 = vpop.eup %2821  ;;  %vm1388_vm14 = vcmp.gt.f32.partialorder %v3507_v9, 0.0 }
 0x1be   :  { %v3627_v43 = vadd.f32 %v1094_v11, %v982_v24  ;;  %v787_v37 = vsel %vm467_vm15, %v3588_v18, %v723_v36  ;;  %v1694_v18 = vsel %vm1374_vm0, %v3382_v62, %v1630_v29  ;;  %v2618_v12 = vadd.f32 -1.0, %v2822_v55 }
 0x1bf   :  { %v1282_v59 = vadd.f32 %v1281_v44, %v1169_v47  ;;  %v3630_v26 = vmul.f32 1.050701, %v787_v37  ;;  %1215 = vmatmul.f32.gmra.mxu0 %v3380_v13  ;;  %1328 = vmatmul.f32.gmra.mxu1 %v3384_v15  ;;  %v1758_v36 = vmul.f32 1.050701, %v1694_v18  ;;  %v1450_v47 = vmul.f32 1.442695, %v3435_v63 }
 0x1c0   :  { %1031 = vmatmul.f32.gmra.mxu2 %v3624_v46  ;;  %v1632_v29 = vmul.f32 1.6732632, %v2618_v12  ;;  %vm1390_vm0 = vcmp.gt.f32.partialorder %v3525_v16, 0.0 }
 0x1c1   :  { %v2824_v31 = vpop.eup %2823  ;;  %v1444_v38 = vmul.f32 1.442695, %v1282_v59  ;;  %1144 = vmatmul.f32.gmra.mxu3 %v3630_v26  ;;  %vm1377_vm3 = vcmp.gt.f32.partialorder %v1282_v59, 0.0 }
 0x1c2   :  { %v2617_v61 = vadd.f32 -1.0, %v2824_v31  ;;  %v2826_v55 = vpop.eup %2825 }
 0x1c3   :  { %2827 = vpow2.f32 %v1444_v38  ;;  %v984_v11 = vpop.f32.mrf.mxu2  ;;  %v1097_v24 = vpop.f32.mrf.mxu3 }
 0x1c4   :  { %v1631_v13 = vmul.f32 1.6732632, %v2617_v61  ;;  %v985_v15 = vadd.f32 %v984_v11, %v3373_v27  ;;  %v1171_v10 = vpop.f32.mrf.mxu0  ;;  %v1284_v44 = vpop.f32.mrf.mxu1  ;;  %2829 = vpow2.f32 %v1450_v47  ;;  %v2620_v11 = vadd.f32 -1.0, %v2826_v55 }
 0x1c5   :  { %v1172_v54 = vadd.f32 %v1171_v10, %v3603_v7 }
 0x1c6   :  { %v1695_v60 = vsel %vm1375_vm1, %v1279_v39, %v1631_v13  ;;  %v3641_v37 = vadd.f32 %v1097_v24, %v985_v15  ;;  %v1696_v13 = vsel %vm1376_vm2, %v3400_v53, %v1632_v29  ;;  %vm1392_vm2 = vcmp.gt.f32.partialorder %v3541_v4, 0.0 }
 0x1c7   :  { %v1759_v31 = vmul.f32 1.050701, %v1695_v60  ;;  %v1285_v62 = vadd.f32 %v1284_v44, %v1172_v54  ;;  %1218 = vmatmul.f32.gmra.mxu0 %v3397_v56  ;;  %1331 = vmatmul.f32.gmra.mxu1 %v3402_v58  ;;  %v1454_v44 = vmul.f32 1.442695, %v3453_v42 }
 0x1c8   :  { %1874 = vmatmul.f32.vlgmr.msrb.gmra.mxu2 %v1758_v36  ;;  %v1760_v36 = vmul.f32 1.050701, %v1696_v13 }
 0x1c9   :  { %v2828_v38 = vpop.eup %2827  ;;  %v1448_v61 = vmul.f32 1.442695, %v1285_v62  ;;  %1987 = vmatmul.f32.vlgmr.msrb.gmra.mxu3 %v1759_v31  ;;  %v1634_v31 = vmul.f32 1.6732632, %v2620_v11  ;;  %vm1379_vm5 = vcmp.gt.f32.partialorder %v1285_v62, 0.0 }
 0x1ca   :  { %v2619_v18 = vadd.f32 -1.0, %v2828_v38  ;;  %v2830_v29 = vpop.eup %2829 }
 0x1cb   :  { %2831 = vpow2.f32 %v1448_v61  ;;  %v987_v39 = vpop.f32.mrf.mxu2  ;;  %v1100_v24 = vpop.f32.mrf.mxu3 }
 0x1cc   :  { %v988_v56 = vadd.f32 %v987_v39, %v3373_v27  ;;  %v1174_v15 = vpop.f32.mrf.mxu0  ;;  %v1287_v58 = vpop.f32.mrf.mxu1  ;;  %v1633_v12 = vmul.f32 1.6732632, %v2619_v18  ;;  %2833 = vpow2.f32 %v1454_v44  ;;  %v2622_v18 = vadd.f32 -1.0, %v2830_v29 }
 0x1cd   :  { %v1175_v10 = vadd.f32 %v1174_v15, %v3603_v7  ;;  %v1458_v15 = vmul.f32 1.442695, %v3471_v35 }
 0x1ce   :  { %v3650_v54 = vadd.f32 %v1100_v24, %v988_v56  ;;  %v1697_v47 = vsel %vm1377_vm3, %v1282_v59, %v1633_v12  ;;  %v1698_v24 = vsel %vm1378_vm4, %v3417_v22, %v1634_v31  ;;  %vm1394_vm4 = vcmp.gt.f32.partialorder %v3558_v6, 0.0 }
 0x1cf   :  { %v1288_v60 = vadd.f32 %v1287_v58, %v1175_v10  ;;  %1221 = vmatmul.f32.gmra.mxu0 %v3414_v28  ;;  %1334 = vmatmul.f32.gmra.mxu1 %v3421_v48  ;;  %v1761_v53 = vmul.f32 1.050701, %v1697_v47  ;;  %v1762_v12 = vmul.f32 1.050701, %v1698_v24  ;;  %v1462_v24 = vmul.f32 1.442695, %v3489_v34 }
 0x1d0   :  { %1877 = vmatmul.f32.gmra.mxu2 %v1760_v36  ;;  %v1636_v36 = vmul.f32 1.6732632, %v2622_v18 }
 0x1d1   :  { %v2832_v55 = vpop.eup %2831  ;;  %v1452_v38 = vmul.f32 1.442695, %v1288_v60  ;;  %1990 = vmatmul.f32.gmra.mxu3 %v1761_v53  ;;  %vm1381_vm7 = vcmp.gt.f32.partialorder %v1288_v60, 0.0 }
 0x1d2   :  { %v2621_v61 = vadd.f32 -1.0, %v2832_v55  ;;  %v2834_v47 = vpop.eup %2833 }
 0x1d3   :  { %2835 = vpow2.f32 %v1452_v38  ;;  %v990_v39 = vpop.f32.mrf.mxu2  ;;  %v1103_v59 = vpop.f32.mrf.mxu3  ;;  %v2624_v55 = vadd.f32 -1.0, %v2834_v47 }
 0x1d4   :  { %v991_v28 = vadd.f32 %v990_v39, %v3373_v27  ;;  %v1177_v48 = vpop.f32.mrf.mxu0  ;;  %v1290_v13 = vpop.f32.mrf.mxu1  ;;  %v1635_v11 = vmul.f32 1.6732632, %v2621_v61  ;;  %2837 = vpow2.f32 %v1458_v15  ;;  %v1700_v61 = vsel %vm1380_vm6, %v3435_v63, %v1636_v36 }
 0x1d5   :  { %v1178_v56 = vadd.f32 %v1177_v48, %v3603_v7  ;;  %v1764_v48 = vmul.f32 1.050701, %v1700_v61  ;;  %vm1396_vm6 = vcmp.gt.f32.partialorder %v3575_v33, 0.0 }
 0x1d6   :  { %v3659_v58 = vadd.f32 %v1103_v59, %v991_v28  ;;  %v1699_v10 = vsel %vm1379_vm5, %v1285_v62, %v1635_v11 }
 0x1d7   :  { %v1291_v44 = vadd.f32 %v1290_v13, %v1178_v56  ;;  %1224 = vmatmul.f32.gmra.mxu0 %v3432_v5  ;;  %1337 = vmatmul.f32.gmra.mxu1 %v3439_v17  ;;  %v1763_v22 = vmul.f32 1.050701, %v1699_v10  ;;  %v1638_v56 = vmul.f32 1.6732632, %v2624_v55 }
 0x1d8   :  { %1880 = vmatmul.f32.gmra.mxu2 %v1762_v12 }
 0x1d9   :  { %v2836_v53 = vpop.eup %2835  ;;  %v1456_v31 = vmul.f32 1.442695, %v1291_v44  ;;  %1993 = vmatmul.f32.gmra.mxu3 %v1763_v22  ;;  %vm1383_vm9 = vcmp.gt.f32.partialorder %v1291_v44, 0.0 }
 0x1da   :  { %v2623_v29 = vadd.f32 -1.0, %v2836_v53  ;;  %v2838_v15 = vpop.eup %2837 }
 0x1db   :  { %2839 = vpow2.f32 %v1456_v31  ;;  %v993_v38 = vpop.f32.mrf.mxu2  ;;  %v1106_v62 = vpop.f32.mrf.mxu3  ;;  %v2626_v36 = vadd.f32 -1.0, %v2838_v15 }
 0x1dc   :  { %v994_v5 = vadd.f32 %v993_v38, %v3373_v27  ;;  %v1180_v17 = vpop.f32.mrf.mxu0  ;;  %v1293_v39 = vpop.f32.mrf.mxu1  ;;  %v1637_v18 = vmul.f32 1.6732632, %v2623_v29  ;;  %2841 = vpow2.f32 %v1462_v24  ;;  %v1466_v38 = vmul.f32 1.442695, %v3507_v9 }
 0x1dd   :  { %v1181_v59 = vadd.f32 %v1180_v17, %v3603_v7 }
 0x1de   :  { %v3668_v28 = vadd.f32 %v1106_v62, %v994_v5  ;;  %v1701_v13 = vsel %vm1381_vm7, %v1288_v60, %v1637_v18  ;;  %v1702_v60 = vsel %vm1382_vm8, %v3453_v42, %v1638_v56  ;;  %vm1398_vm8 = vcmp.gt.f32.partialorder %v3593_v21, 0.0 }
 0x1df   :  { %v1294_v11 = vadd.f32 %v1293_v39, %v1181_v59  ;;  %1227 = vmatmul.f32.gmra.mxu0 %v3450_v49  ;;  %1340 = vmatmul.f32.gmra.mxu1 %v3457_v2  ;;  %v1765_v63 = vmul.f32 1.050701, %v1701_v13  ;;  %v1766_v61 = vmul.f32 1.050701, %v1702_v60  ;;  %v1640_v39 = vmul.f32 1.6732632, %v2626_v36 }
 0x1e0   :  { %1883 = vmatmul.f32.gmra.mxu2 %v1764_v48 }
 0x1e1   :  { %v2840_v12 = vpop.eup %2839  ;;  %v1460_v10 = vmul.f32 1.442695, %v1294_v11  ;;  %1996 = vmatmul.f32.gmra.mxu3 %v1765_v63  ;;  %vm1385_vm11 = vcmp.gt.f32.partialorder %v1294_v11, 0.0 }
 0x1e2   :  { %v2625_v22 = vadd.f32 -1.0, %v2840_v12  ;;  %v2842_v18 = vpop.eup %2841 }
 0x1e3   :  { %2843 = vpow2.f32 %v1460_v10  ;;  %v996_v47 = vpop.f32.mrf.mxu2  ;;  %v1109_v53 = vpop.f32.mrf.mxu3  ;;  %v2628_v13 = vadd.f32 -1.0, %v2842_v18 }
 0x1e4   :  { %v997_v49 = vadd.f32 %v996_v47, %v3373_v27  ;;  %v1183_v2 = vpop.f32.mrf.mxu0  ;;  %v1639_v31 = vmul.f32 1.6732632, %v2625_v22  ;;  %v1296_v55 = vpop.f32.mrf.mxu1  ;;  %2845 = vpow2.f32 %v1466_v38  ;;  %v1470_v22 = vmul.f32 1.442695, %v3525_v16 }
 0x1e5   :  { %v1184_v29 = vadd.f32 %v1183_v2, %v3603_v7 }
 0x1e6   :  { %v3677_v62 = vadd.f32 %v1109_v53, %v997_v49  ;;  %v1703_v5 = vsel %vm1383_vm9, %v1291_v44, %v1639_v31  ;;  %v1704_v44 = vsel %vm1384_vm10, %v3471_v35, %v1640_v39  ;;  %v1642_v53 = vmul.f32 1.6732632, %v2628_v13 }
 0x1e7   :  { %v1297_v17 = vadd.f32 %v1296_v55, %v1184_v29  ;;  %1230 = vmatmul.f32.gmra.mxu0 %v3468_v41  ;;  %1343 = vmatmul.f32.gmra.mxu1 %v3478_v14  ;;  %v1767_v42 = vmul.f32 1.050701, %v1703_v5  ;;  %v1768_v47 = vmul.f32 1.050701, %v1704_v44  ;;  %vm1400_vm10 = vcmp.gt.f32.partialorder %v3612_v0, 0.0 }
 0x1e8   :  { %1886 = vmatmul.f32.gmra.mxu2 %v1766_v61 }
 0x1e9   :  { %v2844_v59 = vpop.eup %2843  ;;  %v1464_v24 = vmul.f32 1.442695, %v1297_v17  ;;  %1999 = vmatmul.f32.gmra.mxu3 %v1767_v42  ;;  %vm1387_vm13 = vcmp.gt.f32.partialorder %v1297_v17, 0.0 }
 0x1ea   :  { %v2627_v48 = vadd.f32 -1.0, %v2844_v59  ;;  %v2846_v2 = vpop.eup %2845  ;;  %v1474_v59 = vmul.f32 1.442695, %v3541_v4 }
 0x1eb   :  { %2847 = vpow2.f32 %v1464_v24  ;;  %v999_v63 = vpop.f32.mrf.mxu2  ;;  %v1112_v56 = vpop.f32.mrf.mxu3  ;;  %v2630_v38 = vadd.f32 -1.0, %v2846_v2 }
 0x1ec   :  { %v1000_v41 = vadd.f32 %v999_v63, %v3373_v27  ;;  %v1186_v14 = vpop.f32.mrf.mxu0  ;;  %v1641_v15 = vmul.f32 1.6732632, %v2627_v48  ;;  %v1299_v10 = vpop.f32.mrf.mxu1  ;;  %2849 = vpow2.f32 %v1470_v22 }
 0x1ed   :  { %v1187_v12 = vadd.f32 %v1186_v14, %v3603_v7  ;;  %v1644_v44 = vmul.f32 1.6732632, %v2630_v38 }
 0x1ee   :  { %v3686_v36 = vadd.f32 %v1112_v56, %v1000_v41  ;;  %v1705_v60 = vsel %vm1385_vm11, %v1294_v11, %v1641_v15  ;;  %v1706_v11 = vsel %vm1386_vm12, %v3489_v34, %v1642_v53  ;;  %v1478_v53 = vmul.f32 1.442695, %v3558_v6 }
 0x1ef   :  { %v1300_v49 = vadd.f32 %v1299_v10, %v1187_v12  ;;  %1233 = vmatmul.f32.gmra.mxu0 %v3486_v32  ;;  %1346 = vmatmul.f32.gmra.mxu1 %v3496_v1  ;;  %v1769_v35 = vmul.f32 1.050701, %v1705_v60  ;;  %v1770_v48 = vmul.f32 1.050701, %v1706_v11  ;;  %vm1402_vm12 = vcmp.gt.f32.partialorder %v3627_v43, 0.0 }
 0x1f0   :  { %1889 = vmatmul.f32.gmra.mxu2 %v1768_v47 }
 0x1f1   :  { %v2848_v31 = vpop.eup %2847  ;;  %v1468_v29 = vmul.f32 1.442695, %v1300_v49  ;;  %2002 = vmatmul.f32.gmra.mxu3 %v1769_v35  ;;  %vm1389_vm15 = vcmp.gt.f32.partialorder %v1300_v49, 0.0 }
 0x1f2   :  { %v2629_v55 = vadd.f32 -1.0, %v2848_v31  ;;  %v2850_v41 = vpop.eup %2849 }
 0x1f3   :  { %2851 = vpow2.f32 %v1468_v29  ;;  %v1002_v61 = vpop.f32.mrf.mxu2  ;;  %v1115_v5 = vpop.f32.mrf.mxu3  ;;  %v2632_v12 = vadd.f32 -1.0, %v2850_v41 }
 0x1f4   :  { %v1003_v32 = vadd.f32 %v1002_v61, %v3373_v27  ;;  %v1189_v1 = vpop.f32.mrf.mxu0  ;;  %v1643_v42 = vmul.f32 1.6732632, %v2629_v55  ;;  %v1302_v18 = vpop.f32.mrf.mxu1  ;;  %2853 = vpow2.f32 %v1474_v59 }
 0x1f5   :  { %v1190_v39 = vadd.f32 %v1189_v1, %v3603_v7  ;;  %v1646_v38 = vmul.f32 1.6732632, %v2632_v12 }
 0x1f6   :  { %v3695_v24 = vadd.f32 %v1115_v5, %v1003_v32  ;;  %v1707_v13 = vsel %vm1387_vm13, %v1297_v17, %v1643_v42  ;;  %v1708_v17 = vsel %vm1388_vm14, %v3507_v9, %v1644_v44  ;;  %vm1404_vm14 = vcmp.gt.f32.partialorder %v3641_v37, 0.0 }
 0x1f7   :  { %v1303_v63 = vadd.f32 %v1302_v18, %v1190_v39  ;;  %1236 = vmatmul.f32.gmra.mxu0 %v3505_v57  ;;  %1349 = vmatmul.f32.gmra.mxu1 %v3514_v8  ;;  %v1771_v34 = vmul.f32 1.050701, %v1707_v13  ;;  %v1772_v31 = vmul.f32 1.050701, %v1708_v17  ;;  %v1482_v13 = vmul.f32 1.442695, %v3575_v33 }
 0x1f8   :  { %1892 = vmatmul.f32.gmra.mxu2 %v1770_v48 }
 0x1f9   :  { %v2852_v56 = vpop.eup %2851  ;;  %v1472_v14 = vmul.f32 1.442695, %v1303_v63  ;;  %2005 = vmatmul.f32.gmra.mxu3 %v1771_v34  ;;  %vm1391_vm1 = vcmp.gt.f32.partialorder %v1303_v63, 0.0 }
 0x1fa   :  { %v2631_v15 = vadd.f32 -1.0, %v2852_v56  ;;  %v2854_v61 = vpop.eup %2853 }
 0x1fb   :  { %2855 = vpow2.f32 %v1472_v14  ;;  %v1005_v10 = vpop.f32.mrf.mxu2  ;;  %v1118_v47 = vpop.f32.mrf.mxu3  ;;  %v2634_v1 = vadd.f32 -1.0, %v2854_v61 }
 0x1fc   :  { %v1006_v57 = vadd.f32 %v1005_v10, %v3373_v27  ;;  %v1192_v22 = vpop.f32.mrf.mxu0  ;;  %v1645_v8 = vmul.f32 1.6732632, %v2631_v15  ;;  %v1305_v35 = vpop.f32.mrf.mxu1  ;;  %2857 = vpow2.f32 %v1478_v53  ;;  %v1486_v53 = vmul.f32 1.442695, %v3593_v21 }
 0x1fd   :  { %v1193_v60 = vadd.f32 %v1192_v22, %v3603_v7  ;;  %v1648_v14 = vmul.f32 1.6732632, %v2634_v1 }
 0x1fe   :  { %v3704_v2 = vadd.f32 %v1118_v47, %v1006_v57  ;;  %v1709_v29 = vsel %vm1389_vm15, %v1300_v49, %v1645_v8  ;;  %v1710_v49 = vsel %vm1390_vm0, %v3525_v16, %v1646_v38  ;;  %vm1406_vm0 = vcmp.gt.f32.partialorder %v3650_v54, 0.0 }
 0x1ff   :  { %v1306_v55 = vadd.f32 %v1305_v35, %v1193_v60  ;;  %1239 = vmatmul.f32.gmra.mxu0 %v3523_v19  ;;  %1352 = vmatmul.f32.gmra.mxu1 %v3532_v3  ;;  %v1773_v9 = vmul.f32 1.050701, %v1709_v29  ;;  %v1774_v44 = vmul.f32 1.050701, %v1710_v49 }
 0x200   :  { %1895 = vmatmul.f32.gmra.mxu2 %v1772_v31 }
 0x201   :  { %v2856_v11 = vpop.eup %2855  ;;  %v1476_v32 = vmul.f32 1.442695, %v1306_v55  ;;  %2008 = vmatmul.f32.gmra.mxu3 %v1773_v9  ;;  %vm1393_vm3 = vcmp.gt.f32.partialorder %v1306_v55, 0.0 }
 0x202   :  { %v2633_v5 = vadd.f32 -1.0, %v2856_v11  ;;  %v2858_v15 = vpop.eup %2857 }
 0x203   :  { %2859 = vpow2.f32 %v1476_v32  ;;  %v1008_v42 = vpop.f32.mrf.mxu2  ;;  %v1121_v18 = vpop.f32.mrf.mxu3  ;;  %v2636_v57 = vadd.f32 -1.0, %v2858_v15 }
 0x204   :  { %v1647_v39 = vmul.f32 1.6732632, %v2633_v5  ;;  %v1009_v19 = vadd.f32 %v1008_v42, %v3373_v27  ;;  %v1195_v3 = vpop.f32.mrf.mxu0  ;;  %v1308_v48 = vpop.f32.mrf.mxu1  ;;  %2861 = vpow2.f32 %v1482_v13 }
 0x205   :  { %v1196_v59 = vadd.f32 %v1195_v3, %v3603_v7  ;;  %v1650_v61 = vmul.f32 1.6732632, %v2636_v57 }
 0x206   :  { %v3713_v34 = vadd.f32 %v1121_v18, %v1009_v19  ;;  %v1711_v41 = vsel %vm1391_vm1, %v1303_v63, %v1647_v39  ;;  %v1712_v63 = vsel %vm1392_vm2, %v3541_v4, %v1648_v14  ;;  %vm1408_vm2 = vcmp.gt.f32.partialorder %v3659_v58, 0.0 }
 0x207   :  { %v1309_v56 = vadd.f32 %v1308_v48, %v1196_v59  ;;  %1242 = vmatmul.f32.gmra.mxu0 %v3539_v23  ;;  %1355 = vmatmul.f32.gmra.mxu1 %v3547_v50  ;;  %v1775_v16 = vmul.f32 1.050701, %v1711_v41  ;;  %v1776_v29 = vmul.f32 1.050701, %v1712_v63  ;;  %v1490_v59 = vmul.f32 1.442695, %v3612_v0 }
 0x208   :  { %1898 = vmatmul.f32.gmra.mxu2 %v1774_v44 }
 0x209   :  { %v2860_v12 = vpop.eup %2859  ;;  %v1480_v10 = vmul.f32 1.442695, %v1309_v56  ;;  %2011 = vmatmul.f32.gmra.mxu3 %v1775_v16  ;;  %vm1395_vm5 = vcmp.gt.f32.partialorder %v1309_v56, 0.0 }
 0x20a   :  { %v2635_v17 = vadd.f32 -1.0, %v2860_v12  ;;  %v2862_v11 = vpop.eup %2861 }
 0x20b   :  { %2863 = vpow2.f32 %v1480_v10  ;;  %v1011_v22 = vpop.f32.mrf.mxu2  ;;  %v1124_v47 = vpop.f32.mrf.mxu3  ;;  %v2638_v42 = vadd.f32 -1.0, %v2862_v11 }
 0x20c   :  { %v1649_v8 = vmul.f32 1.6732632, %v2635_v17  ;;  %v1012_v23 = vadd.f32 %v1011_v22, %v3373_v27  ;;  %v1198_v50 = vpop.f32.mrf.mxu0  ;;  %v1311_v35 = vpop.f32.mrf.mxu1  ;;  %2865 = vpow2.f32 %v1486_v53 }
 0x20d   :  { %v1199_v60 = vadd.f32 %v1198_v50, %v3603_v7  ;;  %v1652_v16 = vmul.f32 1.6732632, %v2638_v42  ;;  %v1494_v50 = vmul.f32 1.442695, %v3627_v43 }
 0x20e   :  { %v3722_v31 = vadd.f32 %v1124_v47, %v1012_v23  ;;  %v1713_v9 = vsel %vm1393_vm3, %v1306_v55, %v1649_v8  ;;  %v1714_v55 = vsel %vm1394_vm4, %v3558_v6, %v1650_v61  ;;  %vm1410_vm4 = vcmp.gt.f32.partialorder %v3668_v28, 0.0 }
 0x20f   :  { %v1312_v38 = vadd.f32 %v1311_v35, %v1199_v60  ;;  %1245 = vmatmul.f32.gmra.mxu0 %v3556_v25  ;;  %1358 = vmatmul.f32.gmra.mxu1 %v3565_v52  ;;  %v1777_v4 = vmul.f32 1.050701, %v1713_v9  ;;  %v1778_v13 = vmul.f32 1.050701, %v1714_v55 }
 0x210   :  { %1901 = vmatmul.f32.gmra.mxu2 %v1776_v29 }
 0x211   :  { %v2864_v32 = vpop.eup %2863  ;;  %v1484_v5 = vmul.f32 1.442695, %v1312_v38  ;;  %2014 = vmatmul.f32.gmra.mxu3 %v1777_v4  ;;  %vm1397_vm7 = vcmp.gt.f32.partialorder %v1312_v38, 0.0 }
 0x212   :  { %v2637_v1 = vadd.f32 -1.0, %v2864_v32  ;;  %v2866_v14 = vpop.eup %2865 }
 0x213   :  { %2867 = vpow2.f32 %v1484_v5  ;;  %v1014_v49 = vpop.f32.mrf.mxu2  ;;  %v1127_v19 = vpop.f32.mrf.mxu3  ;;  %v2640_v17 = vadd.f32 -1.0, %v2866_v14 }
 0x214   :  { %v1651_v39 = vmul.f32 1.6732632, %v2637_v1  ;;  %v1015_v25 = vadd.f32 %v1014_v49, %v3373_v27  ;;  %v1201_v52 = vpop.f32.mrf.mxu0  ;;  %v1314_v18 = vpop.f32.mrf.mxu1  ;;  %2869 = vpow2.f32 %v1490_v59 }
 0x215   :  { %v1202_v3 = vadd.f32 %v1201_v52, %v3603_v7  ;;  %v1654_v29 = vmul.f32 1.6732632, %v2640_v17 }
 0x216   :  { %v3731_v48 = vadd.f32 %v1127_v19, %v1015_v25  ;;  %v1715_v44 = vsel %vm1395_vm5, %v1309_v56, %v1651_v39  ;;  %v1716_v56 = vsel %vm1396_vm6, %v3575_v33, %v1652_v16  ;;  %v1498_v39 = vmul.f32 1.442695, %v3641_v37 }
 0x217   :  { %v1315_v41 = vadd.f32 %v1314_v18, %v1202_v3  ;;  %1248 = vmatmul.f32.gmra.mxu0 %v3573_v51  ;;  %1361 = vmatmul.f32.gmra.mxu1 %v3581_v30  ;;  %v1779_v6 = vmul.f32 1.050701, %v1715_v44  ;;  %v1780_v60 = vmul.f32 1.050701, %v1716_v56  ;;  %v4218_v18 = vld [vmem:[#allocation16_spill] sm:$0xff]  ;;  %vm1412_vm6 = vcmp.gt.f32.partialorder %v3677_v62, 0.0 }
 0x218   :  { %1904 = vmatmul.f32.gmra.mxu2 %v1778_v13 }
 0x219   :  { %v2868_v15 = vpop.eup %2867  ;;  %v1488_v12 = vmul.f32 1.442695, %v1315_v41  ;;  %2017 = vmatmul.f32.gmra.mxu3 %v1779_v6  ;;  %vm1399_vm9 = vcmp.gt.f32.partialorder %v1315_v41, 0.0 }
 0x21a   :  { %v2639_v10 = vadd.f32 -1.0, %v2868_v15  ;;  %v2870_v9 = vpop.eup %2869 }
 0x21b   :  { %2871 = vpow2.f32 %v1488_v12  ;;  %v1017_v57 = vpop.f32.mrf.mxu2  ;;  %v1130_v63 = vpop.f32.mrf.mxu3  ;;  %v2642_v32 = vadd.f32 -1.0, %v2870_v9 }
 0x21c   :  { %v1653_v22 = vmul.f32 1.6732632, %v2639_v10  ;;  %v1018_v51 = vadd.f32 %v1017_v57, %v3373_v27  ;;  %v1204_v30 = vpop.f32.mrf.mxu0  ;;  %v1317_v23 = vpop.f32.mrf.mxu1  ;;  %2873 = vpow2.f32 %v1494_v50 }
 0x21d   :  { %v1205_v8 = vadd.f32 %v1204_v30, %v3603_v7  ;;  %v1656_v59 = vmul.f32 1.6732632, %v2642_v32 }
 0x21e   :  { %v3740_v47 = vadd.f32 %v1130_v63, %v1018_v51  ;;  %v1717_v35 = vsel %vm1397_vm7, %v1312_v38, %v1653_v22  ;;  %v1718_v38 = vsel %vm1398_vm8, %v3593_v21, %v1654_v29  ;;  %v1502_v22 = vmul.f32 1.442695, %v3650_v54 }
 0x21f   :  { %v1318_v53 = vadd.f32 %v1317_v23, %v1205_v8  ;;  %1251 = vmatmul.f32.gmra.mxu0 %v3590_v45  ;;  %1364 = vmatmul.f32.gmra.mxu1 %v3600_v40  ;;  %v1781_v33 = vmul.f32 1.050701, %v1717_v35  ;;  %v1782_v52 = vmul.f32 1.050701, %v1718_v38  ;;  %vm1414_vm8 = vcmp.gt.f32.partialorder %v3686_v36, 0.0 }
 0x220   :  { %1907 = vmatmul.f32.gmra.mxu2 %v1780_v60 }
 0x221   :  { %v2872_v4 = vpop.eup %2871  ;;  %v1492_v61 = vmul.f32 1.442695, %v1318_v53  ;;  %2020 = vmatmul.f32.gmra.mxu3 %v1781_v33  ;;  %vm1401_vm11 = vcmp.gt.f32.partialorder %v1318_v53, 0.0 }
 0x222   :  { %v2641_v11 = vadd.f32 -1.0, %v2872_v4  ;;  %v2874_v13 = vpop.eup %2873 }
 0x223   :  { %2875 = vpow2.f32 %v1492_v61  ;;  %v1020_v5 = vpop.f32.mrf.mxu2  ;;  %v1133_v42 = vpop.f32.mrf.mxu3  ;;  %v2644_v14 = vadd.f32 -1.0, %v2874_v13 }
 0x224   :  { %v1655_v1 = vmul.f32 1.6732632, %v2641_v11  ;;  %v1021_v45 = vadd.f32 %v1020_v5, %v3373_v27  ;;  %v1207_v40 = vpop.f32.mrf.mxu0  ;;  %v1320_v55 = vpop.f32.mrf.mxu1  ;;  %2877 = vpow2.f32 %v1498_v39  ;;  %v1506_v5 = vmul.f32 1.442695, %v3659_v58 }
 0x225   :  { %v1208_v49 = vadd.f32 %v1207_v40, %v3603_v7  ;;  %v1658_v23 = vmul.f32 1.6732632, %v2644_v14  ;;  %v1510_v14 = vmul.f32 1.442695, %v3668_v28 }
 0x226   :  { %v3749_v25 = vadd.f32 %v1133_v42, %v1021_v45  ;;  %v1719_v19 = vsel %vm1399_vm9, %v1315_v41, %v1655_v1  ;;  %v1720_v41 = vsel %vm1400_vm10, %v3612_v0, %v1656_v59  ;;  %vm1416_vm10 = vcmp.gt.f32.partialorder %v3695_v24, 0.0 }
 0x227   :  { %v1321_v3 = vadd.f32 %v1320_v55, %v1208_v49  ;;  %1254 = vmatmul.f32.gmra.mxu0 %v3609_v20  ;;  %1367 = vmatmul.f32.gmra.mxu1 %v4218_v18  ;;  %v1783_v21 = vmul.f32 1.050701, %v1719_v19  ;;  %v1784_v30 = vmul.f32 1.050701, %v1720_v41 }
 0x228   :  { %1910 = vmatmul.f32.gmra.mxu2 %v1782_v52 }
 0x229   :  { %v2876_v44 = vpop.eup %2875  ;;  %v1496_v6 = vmul.f32 1.442695, %v1321_v3  ;;  %2023 = vmatmul.f32.gmra.mxu3 %v1783_v21  ;;  %vm1403_vm13 = vcmp.gt.f32.partialorder %v1321_v3, 0.0 }
 0x22a   :  { %v2643_v16 = vadd.f32 -1.0, %v2876_v44  ;;  %v2878_v50 = vpop.eup %2877 }
 0x22b   :  { %2879 = vpow2.f32 %v1496_v6  ;;  %v1023_v15 = vpop.f32.mrf.mxu2  ;;  %v1136_v17 = vpop.f32.mrf.mxu3  ;;  %v2646_v29 = vadd.f32 -1.0, %v2878_v50 }
 0x22c   :  { %v1657_v12 = vmul.f32 1.6732632, %v2643_v16  ;;  %v1024_v20 = vadd.f32 %v1023_v15, %v3373_v27  ;;  %v1210_v10 = vpop.f32.mrf.mxu0  ;;  %v1323_v56 = vpop.f32.mrf.mxu1  ;;  %2881 = vpow2.f32 %v1502_v22 }
 0x22d   :  { %v1211_v57 = vadd.f32 %v1210_v10, %v3603_v7  ;;  %v1660_v49 = vmul.f32 1.6732632, %v2646_v29  ;;  %v1514_v29 = vmul.f32 1.442695, %v3677_v62 }
 0x22e   :  { %v3758_v51 = vadd.f32 %v1136_v17, %v1024_v20  ;;  %v1721_v63 = vsel %vm1401_vm11, %v1318_v53, %v1657_v12  ;;  %v1722_v53 = vsel %vm1402_vm12, %v3627_v43, %v1658_v23  ;;  %vm1418_vm12 = vcmp.gt.f32.partialorder %v3704_v2, 0.0 }
 0x22f   :  { %v1324_v8 = vadd.f32 %v1323_v56, %v1211_v57  ;;  %1257 = vmatmul.f32.gmra.mxu0 %v3624_v46  ;;  %1370 = vmatmul.f32.gmra.mxu1 %v3630_v26  ;;  %v1785_v0 = vmul.f32 1.050701, %v1721_v63  ;;  %v1786_v1 = vmul.f32 1.050701, %v1722_v53  ;;  %v1724_v21 = vsel %vm1404_vm14, %v3641_v37, %v1660_v49 }
 0x230   :  { %1913 = vmatmul.f32.gmra.mxu2 %v1784_v30  ;;  %v1788_v41 = vmul.f32 1.050701, %v1724_v21  ;;  %vm1420_vm14 = vcmp.gt.f32.partialorder %v3713_v34, 0.0 }
 0x231   :  { %v2880_v60 = vpop.eup %2879  ;;  %v1500_v35 = vmul.f32 1.442695, %v1324_v8  ;;  %2026 = vmatmul.f32.gmra.mxu3 %v1785_v0  ;;  %vm1405_vm15 = vcmp.gt.f32.partialorder %v1324_v8, 0.0 }
 0x232   :  { %v2645_v33 = vadd.f32 -1.0, %v2880_v60  ;;  %v2882_v55 = vpop.eup %2881 }
 0x233   :  { %2883 = vpow2.f32 %v1500_v35  ;;  %v1026_v9 = vpop.f32.mrf.mxu2  ;;  %v1139_v61 = vpop.f32.mrf.mxu3  ;;  %v2648_v19 = vadd.f32 -1.0, %v2882_v55 }
 0x234   :  { %v1659_v4 = vmul.f32 1.6732632, %v2645_v33  ;;  %v1027_v46 = vadd.f32 %v1026_v9, %v3373_v27  ;;  %v1213_v26 = vpop.f32.mrf.mxu0  ;;  %v1326_v32 = vpop.f32.mrf.mxu1  ;;  %2885 = vpow2.f32 %v1506_v5 }
 0x235   :  { %v1214_v11 = vadd.f32 %v1213_v26, %v3603_v7  ;;  %v1662_v17 = vmul.f32 1.6732632, %v2648_v19  ;;  %v1518_v19 = vmul.f32 1.442695, %v3686_v36 }
 0x236   :  { %v3767_v38 = vadd.f32 %v1139_v61, %v1027_v46  ;;  %v1723_v45 = vsel %vm1403_vm13, %v1321_v3, %v1659_v4 }
 0x237   :  { %v1327_v40 = vadd.f32 %v1326_v32, %v1214_v11  ;;  %v1787_v42 = vmul.f32 1.050701, %v1723_v45  ;;  %v1726_v0 = vsel %vm1406_vm0, %v3650_v54, %v1662_v17  ;;  %vm1422_vm0 = vcmp.gt.f32.partialorder %v3722_v31, 0.0 }
 0x238   :  { %1916 = vmatmul.f32.gmra.mxu2 %v1786_v1  ;;  %v1790_v53 = vmul.f32 1.050701, %v1726_v0 }
 0x239   :  { %v2884_v43 = vpop.eup %2883  ;;  %v1504_v39 = vmul.f32 1.442695, %v1327_v40  ;;  %2029 = vmatmul.f32.gmra.mxu3 %v1787_v42  ;;  %vm1407_vm1 = vcmp.gt.f32.partialorder %v1327_v40, 0.0 }
 0x23a   :  { %v2647_v52 = vadd.f32 -1.0, %v2884_v43  ;;  %v2886_v57 = vpop.eup %2885 }
 0x23b   :  { %2887 = vpow2.f32 %v1504_v39  ;;  %v1029_v18 = vpop.f32.mrf.mxu2  ;;  %v1142_v44 = vpop.f32.mrf.mxu3  ;;  %v2650_v30 = vadd.f32 -1.0, %v2886_v57 }
 0x23c   :  { %v1661_v59 = vmul.f32 1.6732632, %v2647_v52  ;;  %v1030_v3 = vadd.f32 %v1029_v18, %v3373_v27  ;;  %v1216_v13 = vpop.f32.mrf.mxu0  ;;  %v1329_v16 = vpop.f32.mrf.mxu1  ;;  %2889 = vpow2.f32 %v1510_v14 }
 0x23d   :  { %v1217_v6 = vadd.f32 %v1216_v13, %v3603_v7  ;;  %v1664_v61 = vmul.f32 1.6732632, %v2650_v30 }
 0x23e   :  { %v3774_v15 = vadd.f32 %v1142_v44, %v1030_v3  ;;  %v1725_v12 = vsel %vm1405_vm15, %v1324_v8, %v1661_v59 }
 0x23f   :  { %v1330_v20 = vadd.f32 %v1329_v16, %v1217_v6  ;;  %v1789_v10 = vmul.f32 1.050701, %v1725_v12 }
 0x240   :  { %1919 = vmatmul.f32.gmra.mxu2 %v1788_v41 }
 0x241   :  { %v2888_v37 = vpop.eup %2887  ;;  %v1508_v56 = vmul.f32 1.442695, %v1330_v20  ;;  %2032 = vmatmul.f32.gmra.mxu3 %v1789_v10  ;;  %vm1409_vm3 = vcmp.gt.f32.partialorder %v1330_v20, 0.0 }
 0x242   :  { %v2649_v22 = vadd.f32 -1.0, %v2888_v37  ;;  %v2890_v11 = vpop.eup %2889 }
 0x243   :  { %2891 = vpow2.f32 %v1508_v56  ;;  %v1032_v63 = vpop.f32.mrf.mxu2  ;;  %v2652_v1 = vadd.f32 -1.0, %v2890_v11 }
 0x244   :  { %v1663_v23 = vmul.f32 1.6732632, %v2649_v22  ;;  %v1033_v8 = vadd.f32 %v1032_v63, %v3373_v27  ;;  %v1219_v50 = vpop.f32.mrf.mxu0  ;;  %v1145_v60 = vpop.f32.mrf.mxu3  ;;  %v3786_v27 = vld [vmem:[%s4214_s7] ss:$0 sm:$0xff]  ;;  %2893 = vpow2.f32 %v1514_v29  ;;  %v1522_v63 = vmul.f32 1.442695, %v3695_v24 }
 0x245   :  { %v1220_v35 = vadd.f32 %v1219_v50, %v3603_v7  ;;  %v1332_v33 = vpop.f32.mrf.mxu1  ;;  %v1666_v44 = vmul.f32 1.6732632, %v2652_v1 }
 0x246   :  { %v3781_v9 = vadd.f32 %v1145_v60, %v1033_v8  ;;  %v1727_v4 = vsel %vm1407_vm1, %v1327_v40, %v1663_v23  ;;  %v1728_v40 = vsel %vm1408_vm2, %v3659_v58, %v1664_v61  ;;  %vm1424_vm2 = vcmp.gt.f32.partialorder %v3731_v48, 0.0 }
 0x247   :  { %v1333_v46 = vadd.f32 %v1332_v33, %v1220_v35  ;;  %v1791_v26 = vmul.f32 1.050701, %v1727_v4  ;;  %v1792_v21 = vmul.f32 1.050701, %v1728_v40  ;;  %v1526_v40 = vmul.f32 1.442695, %v3704_v2 }
 0x248   :  { %1922 = vmatmul.f32.gmra.mxu2 %v1790_v53 }
 0x249   :  { %v2892_v54 = vpop.eup %2891  ;;  %v1512_v32 = vmul.f32 1.442695, %v1333_v46  ;;  %2035 = vmatmul.f32.gmra.mxu3 %v1791_v26  ;;  %vm1411_vm5 = vcmp.gt.f32.partialorder %v1333_v46, 0.0 }
 0x24a   :  { %v2651_v5 = vadd.f32 -1.0, %v2892_v54  ;;  %v2894_v6 = vpop.eup %2893 }
 0x24b   :  { %2895 = vpow2.f32 %v1512_v32  ;;  %v1875_v45 = vpop.f32.mrf.mxu2  ;;  %v2654_v12 = vadd.f32 -1.0, %v2894_v6 }
 0x24c   :  { %v1665_v42 = vmul.f32 1.6732632, %v2651_v5  ;;  %v1876_v49 = vadd.f32 %v3786_v27, %v1875_v45  ;;  %v1222_v55 = vpop.f32.mrf.mxu0  ;;  %v1988_v52 = vpop.f32.mrf.mxu3  ;;  %2897 = vpow2.f32 %v1518_v19 }
 0x24d   :  { %v1223_v43 = vadd.f32 %v1222_v55, %v3603_v7  ;;  %v1335_v39 = vpop.f32.mrf.mxu1  ;;  %v1668_v35 = vmul.f32 1.6732632, %v2654_v12 }
 0x24e   :  { %v3793_v18 = vadd.f32 %v1988_v52, %v1876_v49  ;;  %v1729_v59 = vsel %vm1409_vm3, %v1330_v20, %v1665_v42  ;;  %v1730_v20 = vsel %vm1410_vm4, %v3668_v28, %v1666_v44  ;;  %vm1426_vm4 = vcmp.gt.f32.partialorder %v3740_v47, 0.0 }
 0x24f   :  { %v1336_v3 = vadd.f32 %v1335_v39, %v1223_v43  ;;  %v1793_v13 = vmul.f32 1.050701, %v1729_v59  ;;  %v1794_v23 = vmul.f32 1.050701, %v1730_v20  ;;  %v1530_v20 = vmul.f32 1.442695, %v3713_v34 }
 0x250   :  { %1925 = vmatmul.f32.gmra.mxu2 %v1792_v21  ;;  %v2132_v58 = vmul.f32 %v3793_v18, %v3793_v18 }
 0x251   :  { %v2896_v16 = vpop.eup %2895  ;;  %v1516_v14 = vmul.f32 1.442695, %v1336_v3  ;;  %2038 = vmatmul.f32.gmra.mxu3 %v1793_v13  ;;  %vm1413_vm7 = vcmp.gt.f32.partialorder %v1336_v3, 0.0 }
 0x252   :  { %v2653_v41 = vadd.f32 -1.0, %v2896_v16  ;;  %2148 = vadd.xlane.f32.xlu1 %v2132_v58  ;;  %v2898_v33 = vpop.eup %2897 }
 0x253   :  { %2899 = vpow2.f32 %v1516_v14  ;;  %v1878_v10 = vpop.f32.mrf.mxu2  ;;  %v2656_v26 = vadd.f32 -1.0, %v2898_v33 }
 0x254   :  { %v1667_v17 = vmul.f32 1.6732632, %v2653_v41  ;;  %v1879_v57 = vadd.f32 %v3786_v27, %v1878_v10  ;;  %v1225_v37 = vpop.f32.mrf.mxu0  ;;  %v1991_v30 = vpop.f32.mrf.mxu3  ;;  %2901 = vpow2.f32 %v1522_v63 }
 0x255   :  { %v1226_v56 = vadd.f32 %v1225_v37, %v3603_v7  ;;  %v1338_v22 = vpop.f32.mrf.mxu1  ;;  %v1670_v52 = vmul.f32 1.6732632, %v2656_v26 }
 0x256   :  { %v3802_v0 = vadd.f32 %v1991_v30, %v1879_v57  ;;  %v1731_v8 = vsel %vm1411_vm5, %v1333_v46, %v1667_v17  ;;  %v1732_v46 = vsel %vm1412_vm6, %v3677_v62, %v1668_v35  ;;  %vm1428_vm6 = vcmp.gt.f32.partialorder %v3749_v25, 0.0 }
 0x257   :  { %v1339_v50 = vadd.f32 %v1338_v22, %v1226_v56  ;;  %v1795_v60 = vmul.f32 1.050701, %v1731_v8  ;;  %v1796_v49 = vmul.f32 1.050701, %v1732_v46  ;;  %v1534_v46 = vmul.f32 1.442695, %v3722_v31 }
 0x258   :  { %1928 = vmatmul.f32.gmra.mxu2 %v1794_v23  ;;  %v2133_v28 = vmul.f32 %v3802_v0, %v3802_v0 }
 0x259   :  { %v2900_v29 = vpop.eup %2899  ;;  %v1520_v53 = vmul.f32 1.442695, %v1339_v50  ;;  %2041 = vmatmul.f32.gmra.mxu3 %v1795_v60  ;;  %vm1415_vm9 = vcmp.gt.f32.partialorder %v1339_v50, 0.0 }
 0x25a   :  { %v2655_v4 = vadd.f32 -1.0, %v2900_v29  ;;  %2150 = vadd.xlane.f32.xlu2 %v2133_v28  ;;  %v2902_v19 = vpop.eup %2901 }
 0x25b   :  { %2903 = vpow2.f32 %v1520_v53  ;;  %v1881_v61 = vpop.f32.mrf.mxu2  ;;  %v2658_v44 = vadd.f32 -1.0, %v2902_v19 }
 0x25c   :  { %v1669_v11 = vmul.f32 1.6732632, %v2655_v4  ;;  %v1882_v54 = vadd.f32 %v3786_v27, %v1881_v61  ;;  %v1228_v32 = vpop.f32.mrf.mxu0  ;;  %v1994_v45 = vpop.f32.mrf.mxu3  ;;  %2905 = vpow2.f32 %v1526_v40 }
 0x25d   :  { %v1229_v5 = vadd.f32 %v1228_v32, %v3603_v7  ;;  %v1341_v1 = vpop.f32.mrf.mxu1  ;;  %v1672_v30 = vmul.f32 1.6732632, %v2658_v44 }
 0x25e   :  { %v3811_v42 = vadd.f32 %v1994_v45, %v1882_v54  ;;  %v1733_v55 = vsel %vm1413_vm7, %v1336_v3, %v1669_v11  ;;  %v1734_v3 = vsel %vm1414_vm8, %v3686_v36, %v1670_v52  ;;  %vm1430_vm8 = vcmp.gt.f32.partialorder %v3758_v51, 0.0 }
 0x25f   :  { %v1342_v43 = vadd.f32 %v1341_v1, %v1229_v5  ;;  %v1797_v39 = vmul.f32 1.050701, %v1733_v55  ;;  %v1798_v57 = vmul.f32 1.050701, %v1734_v3  ;;  %v1538_v3 = vmul.f32 1.442695, %v3731_v48 }
 0x260   :  { %1931 = vmatmul.f32.gmra.mxu2 %v1796_v49  ;;  %v2134_v62 = vmul.f32 %v3811_v42, %v3811_v42 }
 0x261   :  { %v2904_v21 = vpop.eup %2903  ;;  %v1524_v59 = vmul.f32 1.442695, %v1342_v43  ;;  %2044 = vmatmul.f32.gmra.mxu3 %v1797_v39  ;;  %vm1417_vm11 = vcmp.gt.f32.partialorder %v1342_v43, 0.0 }
 0x262   :  { %v2657_v13 = vadd.f32 -1.0, %v2904_v21  ;;  %2152 = vadd.xlane.f32.xlu0 %v2134_v62  ;;  %v2906_v63 = vpop.eup %2905 }
 0x263   :  { %2907 = vpow2.f32 %v1524_v59  ;;  %v1884_v6 = vpop.f32.mrf.mxu2  ;;  %v2660_v35 = vadd.f32 -1.0, %v2906_v63 }
 0x264   :  { %v1671_v58 = vmul.f32 1.6732632, %v2657_v13  ;;  %v1885_v16 = vadd.f32 %v3786_v27, %v1884_v6  ;;  %v1231_v14 = vpop.f32.mrf.mxu0  ;;  %v1997_v10 = vpop.f32.mrf.mxu3  ;;  %2909 = vpow2.f32 %v1530_v20 }
 0x265   :  { %v1232_v41 = vadd.f32 %v1231_v14, %v3603_v7  ;;  %v1344_v12 = vpop.f32.mrf.mxu1  ;;  %v1674_v45 = vmul.f32 1.6732632, %v2660_v35 }
 0x266   :  { %v3820_v17 = vadd.f32 %v1997_v10, %v1885_v16  ;;  %v1735_v37 = vsel %vm1415_vm9, %v1339_v50, %v1671_v58  ;;  %v1736_v50 = vsel %vm1416_vm10, %v3695_v24, %v1672_v30  ;;  %vm1432_vm10 = vcmp.gt.f32.partialorder %v3767_v38, 0.0 }
 0x267   :  { %v1345_v56 = vadd.f32 %v1344_v12, %v1232_v41  ;;  %v1799_v22 = vmul.f32 1.050701, %v1735_v37  ;;  %v1800_v54 = vmul.f32 1.050701, %v1736_v50  ;;  %v1542_v50 = vmul.f32 1.442695, %v3740_v47 }
 0x268   :  { %1934 = vmatmul.f32.gmra.mxu2 %v1798_v57  ;;  %v2135_v36 = vmul.f32 %v3820_v17, %v3820_v17 }
 0x269   :  { %v2908_v23 = vpop.eup %2907  ;;  %v1528_v8 = vmul.f32 1.442695, %v1345_v56  ;;  %2047 = vmatmul.f32.gmra.mxu3 %v1799_v22  ;;  %vm1419_vm13 = vcmp.gt.f32.partialorder %v1345_v56, 0.0 }
 0x26a   :  { %v2659_v60 = vadd.f32 -1.0, %v2908_v23  ;;  %2154 = vadd.xlane.f32.xlu1 %v2135_v36  ;;  %v2910_v40 = vpop.eup %2909 }
 0x26b   :  { %2911 = vpow2.f32 %v1528_v8  ;;  %v1887_v33 = vpop.f32.mrf.mxu2  ;;  %v2662_v52 = vadd.f32 -1.0, %v2910_v40 }
 0x26c   :  { %v1673_v28 = vmul.f32 1.6732632, %v2659_v60  ;;  %v1888_v29 = vadd.f32 %v3786_v27, %v1887_v33  ;;  %v1234_v53 = vpop.f32.mrf.mxu0  ;;  %v2000_v61 = vpop.f32.mrf.mxu3  ;;  %2913 = vpow2.f32 %v1534_v46 }
 0x26d   :  { %v1235_v4 = vadd.f32 %v1234_v53, %v3603_v7  ;;  %v1347_v26 = vpop.f32.mrf.mxu1  ;;  %v1676_v10 = vmul.f32 1.6732632, %v2662_v52 }
 0x26e   :  { %v3829_v11 = vadd.f32 %v2000_v61, %v1888_v29  ;;  %v1737_v32 = vsel %vm1417_vm11, %v1342_v43, %v1673_v28  ;;  %v1738_v43 = vsel %vm1418_vm12, %v3704_v2, %v1674_v45  ;;  %vm1434_vm12 = vcmp.gt.f32.partialorder %v3774_v15, 0.0 }
 0x26f   :  { %v1348_v5 = vadd.f32 %v1347_v26, %v1235_v4  ;;  %v1801_v1 = vmul.f32 1.050701, %v1737_v32  ;;  %v1802_v16 = vmul.f32 1.050701, %v1738_v43  ;;  %v1546_v43 = vmul.f32 1.442695, %v3749_v25 }
 0x270   :  { %1937 = vmatmul.f32.gmra.mxu2 %v1800_v54  ;;  %v2136_v24 = vmul.f32 %v3829_v11, %v3829_v11 }
 0x271   :  { %v2912_v49 = vpop.eup %2911  ;;  %v1532_v55 = vmul.f32 1.442695, %v1348_v5  ;;  %2050 = vmatmul.f32.gmra.mxu3 %v1801_v1  ;;  %vm1421_vm15 = vcmp.gt.f32.partialorder %v1348_v5, 0.0 }
 0x272   :  { %v2661_v39 = vadd.f32 -1.0, %v2912_v49  ;;  %2156 = vadd.xlane.f32.xlu0 %v2136_v24  ;;  %v2914_v20 = vpop.eup %2913 }
 0x273   :  { %2915 = vpow2.f32 %v1532_v55  ;;  %v1890_v19 = vpop.f32.mrf.mxu2  ;;  %v2664_v30 = vadd.f32 -1.0, %v2914_v20 }
 0x274   :  { %v1675_v62 = vmul.f32 1.6732632, %v2661_v39  ;;  %v1891_v21 = vadd.f32 %v3786_v27, %v1890_v19  ;;  %v1237_v59 = vpop.f32.mrf.mxu0  ;;  %v2003_v6 = vpop.f32.mrf.mxu3  ;;  %2917 = vpow2.f32 %v1538_v3 }
 0x275   :  { %v1238_v13 = vadd.f32 %v1237_v59, %v3603_v7  ;;  %v1350_v44 = vpop.f32.mrf.mxu1  ;;  %v1678_v61 = vmul.f32 1.6732632, %v2664_v30 }
 0x276   :  { %v3838_v58 = vadd.f32 %v2003_v6, %v1891_v21  ;;  %v1739_v14 = vsel %vm1419_vm13, %v1345_v56, %v1675_v62  ;;  %v1740_v56 = vsel %vm1420_vm14, %v3713_v34, %v1676_v10  ;;  %vm1436_vm14 = vcmp.gt.f32.partialorder %v3781_v9, 0.0 }
 0x277   :  { %v1351_v41 = vadd.f32 %v1350_v44, %v1238_v13  ;;  %v1803_v12 = vmul.f32 1.050701, %v1739_v14  ;;  %v1804_v29 = vmul.f32 1.050701, %v1740_v56  ;;  %v1550_v56 = vmul.f32 1.442695, %v3758_v51 }
 0x278   :  { %1940 = vmatmul.f32.gmra.mxu2 %v1802_v16  ;;  %v2137_v2 = vmul.f32 %v3838_v58, %v3838_v58 }
 0x279   :  { %v2916_v57 = vpop.eup %2915  ;;  %v1536_v37 = vmul.f32 1.442695, %v1351_v41  ;;  %2053 = vmatmul.f32.gmra.mxu3 %v1803_v12  ;;  %vm1423_vm1 = vcmp.gt.f32.partialorder %v1351_v41, 0.0 }
 0x27a   :  { %v2663_v22 = vadd.f32 -1.0, %v2916_v57  ;;  %2158 = vadd.xlane.f32.xlu2 %v2137_v2  ;;  %v2918_v46 = vpop.eup %2917 }
 0x27b   :  { %2919 = vpow2.f32 %v1536_v37  ;;  %v1893_v63 = vpop.f32.mrf.mxu2  ;;  %v2666_v45 = vadd.f32 -1.0, %v2918_v46 }
 0x27c   :  { %v1677_v36 = vmul.f32 1.6732632, %v2663_v22  ;;  %v1894_v23 = vadd.f32 %v3786_v27, %v1893_v63  ;;  %v1240_v8 = vpop.f32.mrf.mxu0  ;;  %v2006_v33 = vpop.f32.mrf.mxu3  ;;  %2921 = vpow2.f32 %v1542_v50 }
 0x27d   :  { %v1241_v60 = vadd.f32 %v1240_v8, %v3603_v7  ;;  %v1353_v35 = vpop.f32.mrf.mxu1  ;;  %v1680_v6 = vmul.f32 1.6732632, %v2666_v45 }
 0x27e   :  { %v3847_v28 = vadd.f32 %v2006_v33, %v1894_v23  ;;  %v1741_v53 = vsel %vm1421_vm15, %v1348_v5, %v1677_v36  ;;  %v1742_v5 = vsel %vm1422_vm0, %v3722_v31, %v1678_v61 }
 0x27f   :  { %v1354_v4 = vadd.f32 %v1353_v35, %v1241_v60  ;;  %v1805_v26 = vmul.f32 1.050701, %v1741_v53  ;;  %v1806_v21 = vmul.f32 1.050701, %v1742_v5  ;;  %v1554_v5 = vmul.f32 1.442695, %v3767_v38 }
 0x280   :  { %1943 = vmatmul.f32.gmra.mxu2 %v1804_v29  ;;  %v2138_v34 = vmul.f32 %v3847_v28, %v3847_v28 }
 0x281   :  { %v2920_v54 = vpop.eup %2919  ;;  %v1540_v32 = vmul.f32 1.442695, %v1354_v4  ;;  %2056 = vmatmul.f32.gmra.mxu3 %v1805_v26  ;;  %vm1425_vm3 = vcmp.gt.f32.partialorder %v1354_v4, 0.0 }
 0x282   :  { %v2665_v1 = vadd.f32 -1.0, %v2920_v54  ;;  %2160 = vadd.xlane.f32.xlu1 %v2138_v34  ;;  %v2922_v3 = vpop.eup %2921 }
 0x283   :  { %2923 = vpow2.f32 %v1540_v32  ;;  %v1896_v40 = vpop.f32.mrf.mxu2  ;;  %v2668_v10 = vadd.f32 -1.0, %v2922_v3 }
 0x284   :  { %v1679_v24 = vmul.f32 1.6732632, %v2665_v1  ;;  %v1897_v49 = vadd.f32 %v3786_v27, %v1896_v40  ;;  %v1243_v55 = vpop.f32.mrf.mxu0  ;;  %v2009_v19 = vpop.f32.mrf.mxu3  ;;  %2925 = vpow2.f32 %v1546_v43 }
 0x285   :  { %v1244_v39 = vadd.f32 %v1243_v55, %v3603_v7  ;;  %v1356_v52 = vpop.f32.mrf.mxu1  ;;  %v1682_v33 = vmul.f32 1.6732632, %v2668_v10 }
 0x286   :  { %v3856_v62 = vadd.f32 %v2009_v19, %v1897_v49  ;;  %v1743_v59 = vsel %vm1423_vm1, %v1351_v41, %v1679_v24  ;;  %v1744_v41 = vsel %vm1424_vm2, %v3731_v48, %v1680_v6 }
 0x287   :  { %v1357_v13 = vadd.f32 %v1356_v52, %v1244_v39  ;;  %v1807_v44 = vmul.f32 1.050701, %v1743_v59  ;;  %v1808_v23 = vmul.f32 1.050701, %v1744_v41  ;;  %v1558_v41 = vmul.f32 1.442695, %v3774_v15 }
 0x288   :  { %1946 = vmatmul.f32.gmra.mxu2 %v1806_v21  ;;  %v2139_v31 = vmul.f32 %v3856_v62, %v3856_v62 }
 0x289   :  { %v2924_v16 = vpop.eup %2923  ;;  %v1544_v14 = vmul.f32 1.442695, %v1357_v13  ;;  %2059 = vmatmul.f32.gmra.mxu3 %v1807_v44  ;;  %vm1427_vm5 = vcmp.gt.f32.partialorder %v1357_v13, 0.0 }
 0x28a   :  { %v2667_v12 = vadd.f32 -1.0, %v2924_v16  ;;  %2162 = vadd.xlane.f32.xlu0 %v2139_v31  ;;  %v2926_v50 = vpop.eup %2925 }
 0x28b   :  { %2927 = vpow2.f32 %v1544_v14  ;;  %v1899_v20 = vpop.f32.mrf.mxu2  ;;  %v2670_v61 = vadd.f32 -1.0, %v2926_v50 }
 0x28c   :  { %v1681_v2 = vmul.f32 1.6732632, %v2667_v12  ;;  %v1900_v57 = vadd.f32 %v3786_v27, %v1899_v20  ;;  %v1246_v37 = vpop.f32.mrf.mxu0  ;;  %v2012_v63 = vpop.f32.mrf.mxu3  ;;  %2929 = vpow2.f32 %v1550_v56 }
 0x28d   :  { %v1247_v22 = vadd.f32 %v1246_v37, %v3603_v7  ;;  %v1359_v30 = vpop.f32.mrf.mxu1  ;;  %v1684_v19 = vmul.f32 1.6732632, %v2670_v61 }
 0x28e   :  { %v3865_v36 = vadd.f32 %v2012_v63, %v1900_v57  ;;  %v1745_v8 = vsel %vm1425_vm3, %v1354_v4, %v1681_v2  ;;  %v1746_v4 = vsel %vm1426_vm4, %v3740_v47, %v1682_v33 }
 0x28f   :  { %v1360_v60 = vadd.f32 %v1359_v30, %v1247_v22  ;;  %v1809_v35 = vmul.f32 1.050701, %v1745_v8  ;;  %v1810_v49 = vmul.f32 1.050701, %v1746_v4  ;;  %v1562_v4 = vmul.f32 1.442695, %v3781_v9 }
 0x290   :  { %1949 = vmatmul.f32.gmra.mxu2 %v1808_v23  ;;  %v2140_v48 = vmul.f32 %v3865_v36, %v3865_v36 }
 0x291   :  { %v2928_v29 = vpop.eup %2927  ;;  %v1548_v53 = vmul.f32 1.442695, %v1360_v60  ;;  %2062 = vmatmul.f32.gmra.mxu3 %v1809_v35  ;;  %vm1429_vm7 = vcmp.gt.f32.partialorder %v1360_v60, 0.0 }
 0x292   :  { %v2669_v26 = vadd.f32 -1.0, %v2928_v29  ;;  %2164 = vadd.xlane.f32.xlu2 %v2140_v48  ;;  %v2930_v43 = vpop.eup %2929 }
 0x293   :  { %2931 = vpow2.f32 %v1548_v53  ;;  %v1902_v46 = vpop.f32.mrf.mxu2  ;;  %v2672_v6 = vadd.f32 -1.0, %v2930_v43 }
 0x294   :  { %v1683_v34 = vmul.f32 1.6732632, %v2669_v26  ;;  %v1903_v54 = vadd.f32 %v3786_v27, %v1902_v46  ;;  %v1249_v32 = vpop.f32.mrf.mxu0  ;;  %v2015_v40 = vpop.f32.mrf.mxu3  ;;  %2933 = vpow2.f32 %v1554_v5 }
 0x295   :  { %v1250_v1 = vadd.f32 %v1249_v32, %v3603_v7  ;;  %v1362_v45 = vpop.f32.mrf.mxu1  ;;  %v1686_v63 = vmul.f32 1.6732632, %v2672_v6 }
 0x296   :  { %v3874_v24 = vadd.f32 %v2015_v40, %v1903_v54  ;;  %v1747_v55 = vsel %vm1427_vm5, %v1357_v13, %v1683_v34  ;;  %v1748_v13 = vsel %vm1428_vm6, %v3749_v25, %v1684_v19 }
 0x297   :  { %v1363_v39 = vadd.f32 %v1362_v45, %v1250_v1  ;;  %v1811_v52 = vmul.f32 1.050701, %v1747_v55  ;;  %v1812_v57 = vmul.f32 1.050701, %v1748_v13 }
 0x298   :  { %1952 = vmatmul.f32.gmra.mxu2 %v1810_v49  ;;  %v2141_v47 = vmul.f32 %v3874_v24, %v3874_v24 }
 0x299   :  { %v2932_v21 = vpop.eup %2931  ;;  %v1552_v59 = vmul.f32 1.442695, %v1363_v39  ;;  %2065 = vmatmul.f32.gmra.mxu3 %v1811_v52  ;;  %vm1431_vm9 = vcmp.gt.f32.partialorder %v1363_v39, 0.0 }
 0x29a   :  { %v2671_v44 = vadd.f32 -1.0, %v2932_v21  ;;  %2166 = vadd.xlane.f32.xlu1 %v2141_v47  ;;  %v2934_v56 = vpop.eup %2933 }
 0x29b   :  { %2935 = vpow2.f32 %v1552_v59  ;;  %v1905_v3 = vpop.f32.mrf.mxu2  ;;  %v2674_v33 = vadd.f32 -1.0, %v2934_v56 }
 0x29c   :  { %v1685_v31 = vmul.f32 1.6732632, %v2671_v44  ;;  %v1906_v16 = vadd.f32 %v3786_v27, %v1905_v3  ;;  %v1252_v14 = vpop.f32.mrf.mxu0  ;;  %v2018_v20 = vpop.f32.mrf.mxu3  ;;  %2937 = vpow2.f32 %v1558_v41 }
 0x29d   :  { %v1253_v12 = vadd.f32 %v1252_v14, %v3603_v7  ;;  %v1365_v10 = vpop.f32.mrf.mxu1  ;;  %v1688_v40 = vmul.f32 1.6732632, %v2674_v33 }
 0x29e   :  { %v3883_v2 = vadd.f32 %v2018_v20, %v1906_v16  ;;  %v1749_v37 = vsel %vm1429_vm7, %v1360_v60, %v1685_v31  ;;  %v1750_v60 = vsel %vm1430_vm8, %v3758_v51, %v1686_v63 }
 0x29f   :  { %v1366_v22 = vadd.f32 %v1365_v10, %v1253_v12  ;;  %v1813_v30 = vmul.f32 1.050701, %v1749_v37  ;;  %v1814_v54 = vmul.f32 1.050701, %v1750_v60 }
 0x2a0   :  { %1955 = vmatmul.f32.gmra.mxu2 %v1812_v57  ;;  %v2142_v25 = vmul.f32 %v3883_v2, %v3883_v2 }
 0x2a1   :  { %v2936_v23 = vpop.eup %2935  ;;  %v1556_v8 = vmul.f32 1.442695, %v1366_v22  ;;  %2068 = vmatmul.f32.gmra.mxu3 %v1813_v30  ;;  %vm1433_vm11 = vcmp.gt.f32.partialorder %v1366_v22, 0.0 }
 0x2a2   :  { %v2673_v35 = vadd.f32 -1.0, %v2936_v23  ;;  %2168 = vadd.xlane.f32.xlu0 %v2142_v25  ;;  %v2938_v5 = vpop.eup %2937 }
 0x2a3   :  { %2939 = vpow2.f32 %v1556_v8  ;;  %v1908_v50 = vpop.f32.mrf.mxu2  ;;  %v2676_v19 = vadd.f32 -1.0, %v2938_v5 }
 0x2a4   :  { %v1687_v48 = vmul.f32 1.6732632, %v2673_v35  ;;  %v1909_v29 = vadd.f32 %v3786_v27, %v1908_v50  ;;  %v1255_v53 = vpop.f32.mrf.mxu0  ;;  %v2021_v46 = vpop.f32.mrf.mxu3  ;;  %2941 = vpow2.f32 %v1562_v4 }
 0x2a5   :  { %v1256_v26 = vadd.f32 %v1255_v53, %v3603_v7  ;;  %v1368_v61 = vpop.f32.mrf.mxu1  ;;  %v1690_v10 = vmul.f32 1.6732632, %v2676_v19 }
 0x2a6   :  { %v3892_v34 = vadd.f32 %v2021_v46, %v1909_v29  ;;  %v1751_v32 = vsel %vm1431_vm9, %v1363_v39, %v1687_v48  ;;  %v1752_v39 = vsel %vm1432_vm10, %v3767_v38, %v1688_v40 }
 0x2a7   :  { %v1369_v1 = vadd.f32 %v1368_v61, %v1256_v26  ;;  %v1815_v45 = vmul.f32 1.050701, %v1751_v32  ;;  %v1816_v31 = vmul.f32 1.050701, %v1752_v39 }
 0x2a8   :  { %1958 = vmatmul.f32.gmra.mxu2 %v1814_v54  ;;  %v2143_v51 = vmul.f32 %v3892_v34, %v3892_v34 }
 0x2a9   :  { %v2940_v49 = vpop.eup %2939  ;;  %v1560_v55 = vmul.f32 1.442695, %v1369_v1  ;;  %2071 = vmatmul.f32.gmra.mxu3 %v1815_v45  ;;  %vm1435_vm13 = vcmp.gt.f32.partialorder %v1369_v1, 0.0 }
 0x2aa   :  { %v2675_v52 = vadd.f32 -1.0, %v2940_v49  ;;  %2170 = vadd.xlane.f32.xlu2 %v2143_v51  ;;  %v2942_v20 = vpop.eup %2941 }
 0x2ab   :  { %2943 = vpow2.f32 %v1560_v55  ;;  %v1911_v43 = vpop.f32.mrf.mxu2 }
 0x2ac   :  { %v1689_v47 = vmul.f32 1.6732632, %v2675_v52  ;;  %v1912_v21 = vadd.f32 %v3786_v27, %v1911_v43  ;;  %v1258_v59 = vpop.f32.mrf.mxu0  ;;  %v2024_v6 = vpop.f32.mrf.mxu3 }
 0x2ad   :  { %v1259_v44 = vadd.f32 %v1258_v59, %v3603_v7  ;;  %v1371_v3 = vpop.f32.mrf.mxu1  ;;  %v2678_v7 = vadd.f32 -1.0, %v2942_v20 }
 0x2ae   :  { %v3900_v13 = vadd.f32 %v2024_v6, %v1912_v21  ;;  %v1753_v16 = vsel %vm1433_vm11, %v1366_v22, %v1689_v47  ;;  %v1754_v22 = vsel %vm1434_vm12, %v3774_v15, %v1690_v10  ;;  %vm2473_vm11 = vcmask 130112  }
 0x2af   :  { %v1372_v14 = vadd.f32 %v1371_v3, %v1259_v44  ;;  %v1817_v12 = vmul.f32 1.050701, %v1753_v16  ;;  %v1818_v8 = vmul.f32 1.050701, %v1754_v22  ;;  %v1692_v50 = vmul.f32 1.6732632, %v2678_v7 }
 0x2b0   :  { %1961 = vmatmul.f32.gmra.mxu2 %v1816_v31  ;;  %v2144_v38 = vmul.f32 %v3900_v13, %v3900_v13 }
 0x2b1   :  { %v2944_v41 = vpop.eup %2943  ;;  %v1564_v57 = vmul.f32 1.442695, %v1372_v14  ;;  %2074 = vmatmul.f32.gmra.mxu3 %v1817_v12  ;;  %v1756_v53 = vsel %vm1436_vm14, %v3781_v9, %v1692_v50  ;;  %vm1437_vm15 = vcmp.gt.f32.partialorder %v1372_v14, 0.0  ;;  %vm2481_vm14 = vcmask 261312  }
 0x2b2   :  { %v2677_v37 = vadd.f32 -1.0, %v2944_v41  ;;  %2172 = vadd.xlane.f32.xlu1 %v2144_v38  ;;  %v1820_v54 = vmul.f32 1.050701, %v1756_v53 }
 0x2b3   :  { %2945 = vpow2.f32 %v1564_v57  ;;  %v1914_v30 = vpop.f32.mrf.mxu2 }
 0x2b4   :  { %v1691_v63 = vmul.f32 1.6732632, %v2677_v37  ;;  %v1915_v56 = vadd.f32 %v3786_v27, %v1914_v30  ;;  %v2027_v25 = vpop.f32.mrf.mxu3 }
 0x2b6   :  { %v3907_v23 = vadd.f32 %v2027_v25, %v1915_v56  ;;  %v1755_v35 = vsel %vm1435_vm13, %v1369_v1, %v1691_v63  ;;  %vm2477_vm13 = vcmask 195712  }
 0x2b7   :  { %v1819_v33 = vmul.f32 1.050701, %v1755_v35 }
 0x2b8   :  { %1964 = vmatmul.f32.gmra.mxu2 %v1818_v8  ;;  %v2145_v60 = vmul.f32 %v3907_v23, %v3907_v23 }
 0x2b9   :  { %v2946_v48 = vpop.eup %2945  ;;  %2077 = vmatmul.f32.gmra.mxu3 %v1819_v33 }
 0x2ba   :  { %v2679_v29 = vadd.f32 -1.0, %v2946_v48  ;;  %2174 = vadd.xlane.f32.xlu0 %v2145_v60 }
 0x2bb   :  { %v1917_v15 = vpop.f32.mrf.mxu2 }
 0x2bc   :  { %v1693_v26 = vmul.f32 1.6732632, %v2679_v29  ;;  %v1918_v61 = vadd.f32 %v3786_v27, %v1917_v15  ;;  %v2030_v46 = vpop.f32.mrf.mxu3 }
 0x2be   :  { %v3914_v4 = vadd.f32 %v2030_v46, %v1918_v61  ;;  %v1757_v32 = vsel %vm1437_vm15, %v1372_v14, %v1693_v26 }
 0x2bf   :  { %v1821_v1 = vmul.f32 1.050701, %v1757_v32 }
 0x2c0   :  { %1967 = vmatmul.f32.gmra.mxu2 %v1820_v54  ;;  %v2146_v45 = vmul.f32 %v3914_v4, %v3914_v4 }
 0x2c1   :  { %2080 = vmatmul.f32.gmra.mxu3 %v1821_v1 }
 0x2c2   :  { %2176 = vadd.xlane.f32.xlu2 %v2146_v45 }
 0x2c3   :  { %v1920_v40 = vpop.f32.mrf.mxu2 }
 0x2c4   :  { %v1921_v5 = vadd.f32 %v3786_v27, %v1920_v40  ;;  %v2033_v9 = vpop.f32.mrf.mxu3 }
 0x2c6   :  { %v3919_v51 = vadd.f32 %v2033_v9, %v1921_v5 }
 0x2cb   :  { %v1923_v49 = vpop.f32.mrf.mxu2 }
 0x2cc   :  { %v1924_v55 = vadd.f32 %v3786_v27, %v1923_v49  ;;  %v2036_v52 = vpop.f32.mrf.mxu3 }
 0x2ce   :  { %v2037_v19 = vadd.f32 %v2036_v52, %v1924_v55 }
 0x2d0   :  { %v2180_v43 = vmul.f32 %v2037_v19, %v2037_v19  ;;  %v2084_v39 = vmul.f32 %v2037_v19, %v3793_v18 }
 0x2d2   :  { %2196 = vadd.xlane.f32.xlu2 %v2180_v43  ;;  %2100 = vadd.xlane.f32.xlu0 %v2084_v39 }
 0x2d3   :  { %v1926_v47 = vpop.f32.mrf.mxu2 }
 0x2d4   :  { %v1927_v21 = vadd.f32 %v3786_v27, %v1926_v47  ;;  %v2039_v59 = vpop.f32.mrf.mxu3 }
 0x2d6   :  { %v2040_v44 = vadd.f32 %v2039_v59, %v1927_v21  ;;  %v3942_v21 = vpop.xlane.xlu2 %2150  ;;  %v3944_v59 = vpop.xlane.xlu0 %2152 }
 0x2d8   :  { %v2085_v6 = vmul.f32 %v2040_v44, %v3802_v0  ;;  %v2181_v10 = vmul.f32 %v2040_v44, %v2040_v44 }
 0x2da   :  { %2102 = vadd.xlane.f32.xlu0 %v2085_v6 }
 0x2db   :  { %v1929_v3 = vpop.f32.mrf.mxu2 }
 0x2dc   :  { %v1930_v31 = vadd.f32 %v3786_v27, %v1929_v3  ;;  %v2042_v16 = vpop.f32.mrf.mxu3 }
 0x2de   :  { %v2043_v14 = vadd.f32 %v2042_v16, %v1930_v31 }
 0x2e0   :  { %v2086_v12 = vmul.f32 %v2043_v14, %v3811_v42  ;;  %v2182_v37 = vmul.f32 %v2043_v14, %v2043_v14 }
 0x2e2   :  { %2104 = vadd.xlane.f32.xlu1 %v2086_v12  ;;  %2198 = vadd.xlane.f32.xlu0 %v2181_v10 }
 0x2e3   :  { %v1932_v18 = vpop.f32.mrf.mxu2 }
 0x2e4   :  { %v1933_v20 = vadd.f32 %v3786_v27, %v1932_v18  ;;  %v2045_v38 = vpop.f32.mrf.mxu3 }
 0x2e5   :  { %v3950_v14 = vpop.xlane.xlu0 %2156 }
 0x2e6   :  { %v2046_v41 = vadd.f32 %v2045_v38, %v1933_v20 }
 0x2e8   :  { %v2183_v57 = vmul.f32 %v2046_v41, %v2046_v41  ;;  %v2087_v42 = vmul.f32 %v2046_v41, %v3820_v17  ;;  %v2149_v41 = vpop.xlane.xlu1 %2148 }
 0x2ea   :  { %2202 = vadd.xlane.f32.xlu2 %v2183_v57  ;;  %2200 = vadd.xlane.f32.xlu1 %v2182_v37 }
 0x2eb   :  { %v1935_v0 = vpop.f32.mrf.mxu2 }
 0x2ec   :  { %v1936_v7 = vadd.f32 %v3786_v27, %v1935_v0  ;;  %v2048_v30 = vpop.f32.mrf.mxu3 }
 0x2ed   :  { %v3948_v16 = vpop.xlane.xlu2 %2158 }
 0x2ee   :  { %v2049_v22 = vadd.f32 %v2048_v30, %v1936_v7 }
 0x2f0   :  { %v2088_v63 = vmul.f32 %v2049_v22, %v3829_v11  ;;  %v2184_v50 = vmul.f32 %v2049_v22, %v2049_v22 }
 0x2f2   :  { %2108 = vadd.xlane.f32.xlu2 %v2088_v63  ;;  %2106 = vadd.xlane.f32.xlu1 %v2087_v42  ;;  %v2155_v63 = vpop.xlane.xlu1 %2154  ;;  %v2979_v42 = vld [vmem:[%s4214_s7] ss:$0 sm:$0xff]  ;;  %s3141_s7 = smov [#allocation11]  }
 0x2f3   :  { %v1938_v56 = vpop.f32.mrf.mxu2  ;;  %s2538_s13 = sshll.u32 %s3141_s7, 4  ;;  %s2539_s13 = int_to_ptr.vmem [resolvable:$true] %s2538_s13 }
 0x2f4   :  { %v1939_v25 = vadd.f32 %v3786_v27, %v1938_v56  ;;  %v2051_v8 = vpop.f32.mrf.mxu3 }
 0x2f6   :  { %v2052_v35 = vadd.f32 %v2051_v8, %v1939_v25 }
 0x2f8   :  { %v2089_v33 = vmul.f32 %v2052_v35, %v3838_v58  ;;  %v2185_v60 = vmul.f32 %v2052_v35, %v2052_v35 }
 0x2fa   :  { %2110 = vadd.xlane.f32.xlu2 %v2089_v33  ;;  %2204 = vadd.xlane.f32.xlu1 %v2184_v50 }
 0x2fb   :  { %2206 = vadd.xlane.f32.xlu0 %v2185_v60  ;;  %v1941_v48 = vpop.f32.mrf.mxu2 }
 0x2fc   :  { %v1942_v29 = vadd.f32 %v3786_v27, %v1941_v48  ;;  %v2054_v11 = vpop.f32.mrf.mxu3 }
 0x2fd   :  { %v3956_v0 = vpop.xlane.xlu0 %2162 }
 0x2fe   :  { %v2055_v15 = vadd.f32 %v2054_v11, %v1942_v29 }
 0x300   :  { %v2186_v17 = vmul.f32 %v2055_v15, %v2055_v15  ;;  %v2090_v53 = vmul.f32 %v2055_v15, %v3847_v28 }
 0x302   :  { %2208 = vadd.xlane.f32.xlu2 %v2186_v17 }
 0x303   :  { %2112 = vadd.xlane.f32.xlu0 %v2090_v53  ;;  %v1944_v26 = vpop.f32.mrf.mxu2 }
 0x304   :  { %v1945_v61 = vadd.f32 %v3786_v27, %v1944_v26  ;;  %v2057_v46 = vpop.f32.mrf.mxu3 }
 0x305   :  { %v3954_v57 = vpop.xlane.xlu2 %2164 }
 0x306   :  { %v2058_v58 = vadd.f32 %v2057_v46, %v1945_v61 }
 0x308   :  { %v2091_v54 = vmul.f32 %v2058_v58, %v3856_v62  ;;  %v2187_v9 = vmul.f32 %v2058_v58, %v2058_v58 }
 0x30a   :  { %2114 = vadd.xlane.f32.xlu1 %v2091_v54 }
 0x30b   :  { %v1947_v32 = vpop.f32.mrf.mxu2 }
 0x30c   :  { %v1948_v1 = vadd.f32 %v3786_v27, %v1947_v32  ;;  %v2060_v45 = vpop.f32.mrf.mxu3 }
 0x30e   :  { %v2061_v40 = vadd.f32 %v2060_v45, %v1948_v1 }
 0x310   :  { %v2092_v5 = vmul.f32 %v2061_v40, %v3865_v36  ;;  %v2188_v49 = vmul.f32 %v2061_v40, %v2061_v40  ;;  %v2147_v40 = vmul.f32 %v3919_v51, %v3919_v51 }
 0x312   :  { %2116 = vadd.xlane.f32.xlu2 %v2092_v5  ;;  %2210 = vadd.xlane.f32.xlu1 %v2187_v9 }
 0x313   :  { %2212 = vadd.xlane.f32.xlu0 %v2188_v49  ;;  %v1950_v28 = vpop.f32.mrf.mxu2 }
 0x314   :  { %v1951_v55 = vadd.f32 %v3786_v27, %v1950_v28  ;;  %v2063_v52 = vpop.f32.mrf.mxu3 }
 0x315   :  { %v3964_v8 = vpop.xlane.xlu0 %2168 }
 0x316   :  { %v2064_v19 = vadd.f32 %v2063_v52, %v1951_v55 }
 0x318   :  { %v2189_v43 = vmul.f32 %v2064_v19, %v2064_v19  ;;  %v2093_v62 = vmul.f32 %v2064_v19, %v3874_v24 }
 0x31a   :  { %2214 = vadd.xlane.f32.xlu2 %v2189_v43 }
 0x31b   :  { %2118 = vadd.xlane.f32.xlu0 %v2093_v62  ;;  %v1953_v39 = vpop.f32.mrf.mxu2 }
 0x31c   :  { %v1954_v47 = vadd.f32 %v3786_v27, %v1953_v39  ;;  %v2066_v36 = vpop.f32.mrf.mxu3 }
 0x31d   :  { %v3962_v25 = vpop.xlane.xlu2 %2170 }
 0x31e   :  { %v2067_v44 = vadd.f32 %v2066_v36, %v1954_v47 }
 0x320   :  { %v2094_v6 = vmul.f32 %v2067_v44, %v3883_v2  ;;  %v2190_v18 = vmul.f32 %v2067_v44, %v2067_v44 }
 0x322   :  { %2120 = vadd.xlane.f32.xlu1 %v2094_v6 }
 0x323   :  { %v1956_v3 = vpop.f32.mrf.mxu2 }
 0x324   :  { %v1957_v31 = vadd.f32 %v3786_v27, %v1956_v3  ;;  %v2069_v24 = vpop.f32.mrf.mxu3 }
 0x326   :  { %v2070_v12 = vadd.f32 %v2069_v24, %v1957_v31 }
 0x328   :  { %v2095_v10 = vmul.f32 %v2070_v12, %v3892_v34  ;;  %v2191_v20 = vmul.f32 %v2070_v12, %v2070_v12 }
 0x32a   :  { %2122 = vadd.xlane.f32.xlu2 %v2095_v10  ;;  %2216 = vadd.xlane.f32.xlu1 %v2190_v18 }
 0x32b   :  { %2218 = vadd.xlane.f32.xlu0 %v2191_v20  ;;  %v1959_v38 = vpop.f32.mrf.mxu2 }
 0x32c   :  { %v1960_v2 = vadd.f32 %v3786_v27, %v1959_v38  ;;  %v2072_v37 = vpop.f32.mrf.mxu3 }
 0x32d   :  { %v3971_v11 = vpop.xlane.xlu0 %2174 }
 0x32e   :  { %v2073_v7 = vadd.f32 %v2072_v37, %v1960_v2  ;;  %v2468_v2 = vlaneseq }
 0x330   :  { %v2192_v30 = vmul.f32 %v2073_v7, %v2073_v7  ;;  %v2096_v22 = vmul.f32 %v2073_v7, %v3900_v13  ;;  %v3967_v13 = vpop.xlane.xlu1 %2160 }
 0x332   :  { %2220 = vadd.xlane.f32.xlu2 %v2192_v30 }
 0x333   :  { %2124 = vadd.xlane.f32.xlu0 %v2096_v22  ;;  %v1962_v34 = vpop.f32.mrf.mxu2 }
 0x334   :  { %v1963_v56 = vadd.f32 %v2979_v42, %v1962_v34  ;;  %v2075_v27 = vpop.f32.mrf.mxu3 }
 0x335   :  { %v3969_v48 = vpop.xlane.xlu2 %2176 }
 0x336   :  { %v2076_v35 = vadd.f32 %v2075_v27, %v1963_v56 }
 0x338   :  { %v2097_v33 = vmul.f32 %v2076_v35, %v3907_v23  ;;  %v2193_v53 = vmul.f32 %v2076_v35, %v2076_v35  ;;  %v3974_v61 = vpop.xlane.xlu1 %2166 }
 0x33a   :  { %2126 = vadd.xlane.f32.xlu1 %v2097_v33 }
 0x33b   :  { %v1965_v50 = vpop.f32.mrf.mxu2 }
 0x33c   :  { %v1966_v60 = vadd.f32 %v2979_v42, %v1965_v50  ;;  %v2078_v29 = vpop.f32.mrf.mxu3 }
 0x33e   :  { %v2079_v15 = vadd.f32 %v2078_v29, %v1966_v60 }
 0x340   :  { %v2098_v17 = vmul.f32 %v2079_v15, %v3914_v4  ;;  %v3979_v4 = vpop.xlane.xlu1 %2172  ;;  %v2194_v52 = vmul.f32 %v2079_v15, %v2079_v15 }
 0x342   :  { %2128 = vadd.xlane.f32.xlu2 %v2098_v17  ;;  %2222 = vadd.xlane.f32.xlu1 %v2193_v53 }
 0x343   :  { %v1968_v26 = vpop.f32.mrf.mxu2 }
 0x344   :  { %v1969_v23 = vadd.f32 %v2979_v42, %v1968_v26  ;;  %v2081_v46 = vpop.f32.mrf.mxu3 }
 0x345   :  { %v2197_v58 = vpop.xlane.xlu2 %2196  ;;  %v2101_v1 = vpop.xlane.xlu0 %2100 }
 0x346   :  { %v2082_v54 = vadd.f32 %v2081_v46, %v1969_v23  ;;  %v2228_v32 = vmul.f32 %v2197_v58, %v2149_v41 }
 0x348   :  { %2947 = vrsqrt.f32 %v2228_v32  ;;  %v2195_v45 = vmul.f32 %v2082_v54, %v2082_v54  ;;  %v2099_v5 = vmul.f32 %v2082_v54, %v3919_v51  ;;  %vm2250_vm1 = vweird.f32 %v2228_v32 }
 0x34a   :  { %2226 = vadd.xlane.f32.xlu2 %v2195_v45  ;;  %2178 = vadd.xlane.f32.xlu1 %v2147_v40 }
 0x34b   :  { %2130 = vadd.xlane.f32.xlu0 %v2099_v5 }
 0x34d   :  { %v2103_v49 = vpop.xlane.xlu0 %2102 }
 0x34e   :  { %v2948_v9 = vpop.eup %2947 }
 0x34f   :  { %v2245_v28 = vmul.f32 %v2948_v9, %v2228_v32  ;;  %vm2251_vm0 = vweird.f32 %v2948_v9 }
 0x350   :  { %vm2252_vm2 = vmor %vm2250_vm1, %vm2251_vm0 }
 0x351   :  { %v2246_v55 = vmul.f32 %v2948_v9, %v2245_v28 }
 0x353   :  { %v2247_v19 = vmul.f32 0.5, %v2246_v55  ;;  %2224 = vadd.xlane.f32.xlu0 %v2194_v52 }
 0x355   :  { %v2248_v43 = vsub.f32 1.5, %v2247_v19  ;;  %v3981_v62 = vpop.xlane.xlu1 %2104  ;;  %v2199_v39 = vpop.xlane.xlu0 %2198 }
 0x356   :  { %v2229_v51 = vmul.f32 %v2199_v39, %v3942_v21 }
 0x357   :  { %v2249_v47 = vmul.f32 %v2948_v9, %v2248_v43 }
 0x358   :  { %2949 = vrsqrt.f32 %v2229_v51  ;;  %vm2260_vm4 = vweird.f32 %v2229_v51 }
 0x359   :  { %v2253_v36 = vsel %vm2252_vm2, %v2948_v9, %v2249_v47 }
 0x35a   :  { %v2404_v44 = vmul.f32 %v2253_v36, %v2101_v1 }
 0x35c   :  { %v2420_v34 = vadd.f32 1.0, %v2404_v44 }
 0x35d   :  { %v2203_v6 = vpop.xlane.xlu2 %2202  ;;  %v2201_v3 = vpop.xlane.xlu1 %2200 }
 0x35e   :  { %v2231_v31 = vmul.f32 %v2203_v6, %v2155_v63  ;;  %v2230_v24 = vmul.f32 %v2201_v3, %v3944_v59  ;;  %v2950_v12 = vpop.eup %2949  ;;  %v3985_v59 = vand.u32 127, %v2468_v2  ;;  %v2436_v60 = vmul.f32 0.5, %v2420_v34 }
 0x35f   :  { %v2255_v10 = vmul.f32 %v2950_v12, %v2229_v51  ;;  %vm2261_vm3 = vweird.f32 %v2950_v12 }
 0x360   :  { %2951 = vrsqrt.f32 %v2231_v31  ;;  %vm2262_vm5 = vmor %vm2260_vm4, %vm2261_vm3  ;;  %v2471_v33 = vadd.s32 4294967288, %v3985_v59  ;;  %vm2280_vm8 = vweird.f32 %v2231_v31  ;;  %vm2270_vm9 = vweird.f32 %v2230_v24 }
 0x361   :  { %2953 = vrsqrt.f32 %v2230_v24  ;;  %v2256_v18 = vmul.f32 %v2950_v12, %v2255_v10  ;;  %v2470_v1 = vperm.slane %v2436_v60, %v3985_v59  ;;  %v2479_v55 = vadd.s32 4294967272, %v3985_v59 }
 0x362   :  { %v2475_v52 = vadd.s32 4294967280, %v3985_v59  ;;  %v2483_v34 = vadd.s32 4294967264, %v3985_v59 }
 0x363   :  { %v2257_v20 = vmul.f32 0.5, %v2256_v18 }
 0x365   :  { %v2107_v38 = vpop.xlane.xlu1 %2106  ;;  %v2258_v37 = vsub.f32 1.5, %v2257_v20  ;;  %v2109_v9 = vpop.xlane.xlu2 %2108 }
 0x366   :  { %v2952_v41 = vpop.eup %2951 }
 0x367   :  { %v2954_v21 = vpop.eup %2953  ;;  %v2275_v7 = vmul.f32 %v2952_v41, %v2231_v31  ;;  %v2259_v30 = vmul.f32 %v2950_v12, %v2258_v37  ;;  %vm2281_vm6 = vweird.f32 %v2952_v41 }
 0x368   :  { %v2265_v22 = vmul.f32 %v2954_v21, %v2230_v24  ;;  %vm2271_vm7 = vweird.f32 %v2954_v21  ;;  %vm2282_vm10 = vmor %vm2280_vm8, %vm2281_vm6  ;;  %vm2489_vm6 = vcmask 392512  }
 0x369   :  { %v2276_v63 = vmul.f32 %v2952_v41, %v2275_v7  ;;  %v2263_v42 = vsel %vm2262_vm5, %v2950_v12, %v2259_v30  ;;  %vm2272_vm12 = vmor %vm2270_vm9, %vm2271_vm7  ;;  %vm2485_vm5 = vcmask 326912  }
 0x36a   :  { %v2266_v56 = vmul.f32 %v2954_v21, %v2265_v22  ;;  %v2405_v27 = vmul.f32 %v2263_v42, %v2103_v49  ;;  %v2487_v42 = vadd.s32 4294967256, %v3985_v59 }
 0x36b   :  { %v2277_v35 = vmul.f32 0.5, %v2276_v63 }
 0x36c   :  { %v2267_v50 = vmul.f32 0.5, %v2266_v56  ;;  %v2421_v29 = vadd.f32 1.0, %v2405_v27 }
 0x36d   :  { %v2278_v15 = vsub.f32 1.5, %v2277_v35  ;;  %v2205_v17 = vpop.xlane.xlu1 %2204  ;;  %v2111_v18 = vpop.xlane.xlu2 %2110 }
 0x36e   :  { %v2268_v53 = vsub.f32 1.5, %v2267_v50  ;;  %v2232_v26 = vmul.f32 %v2205_v17, %v3950_v14  ;;  %v2207_v23 = vpop.xlane.xlu0 %2206  ;;  %v2437_v46 = vmul.f32 0.5, %v2421_v29 }
 0x36f   :  { %v2279_v58 = vmul.f32 %v2952_v41, %v2278_v15  ;;  %v2233_v54 = vmul.f32 %v2207_v23, %v3948_v16 }
 0x370   :  { %v2269_v32 = vmul.f32 %v2954_v21, %v2268_v53  ;;  %2955 = vrsqrt.f32 %v2232_v26  ;;  %v2472_v45 = vperm.slane %v2437_v46, %v2471_v33  ;;  %vm2290_vm1 = vweird.f32 %v2232_v26 }
 0x371   :  { %v2283_v40 = vsel %vm2282_vm10, %v2952_v41, %v2279_v58  ;;  %2957 = vrsqrt.f32 %v2233_v54  ;;  %vm2300_vm3 = vweird.f32 %v2233_v54 }
 0x372   :  { %v2273_v5 = vsel %vm2272_vm12, %v2954_v21, %v2269_v32  ;;  %v2407_v14 = vmul.f32 %v2283_v40, %v2107_v38  ;;  %v2474_v28 = vsel %vm2473_vm11, %v2472_v45, %v2470_v1 }
 0x373   :  { %v2406_v49 = vmul.f32 %v2273_v5, %v3981_v62 }
 0x374   :  { %v2423_v16 = vadd.f32 1.0, %v2407_v14 }
 0x375   :  { %v2422_v19 = vadd.f32 1.0, %v2406_v49  ;;  %v2209_v35 = vpop.xlane.xlu2 %2208 }
 0x376   :  { %v2956_v43 = vpop.eup %2955  ;;  %v2439_v39 = vmul.f32 0.5, %v2423_v16  ;;  %v2234_v32 = vmul.f32 %v2209_v35, %v3967_v13 }
 0x377   :  { %v2958_v47 = vpop.eup %2957  ;;  %v2438_v51 = vmul.f32 0.5, %v2422_v19  ;;  %v2285_v36 = vmul.f32 %v2956_v43, %v2232_v26  ;;  %vm2291_vm15 = vweird.f32 %v2956_v43  ;;  %v4002_v26 = vpop.xlane.xlu0 %2112 }
 0x378   :  { %v2480_v44 = vperm.slane %v2439_v39, %v2479_v55  ;;  %v2295_v6 = vmul.f32 %v2958_v47, %v2233_v54  ;;  %vm2301_vm0 = vweird.f32 %v2958_v47  ;;  %vm2292_vm2 = vmor %vm2290_vm1, %vm2291_vm15  ;;  %2959 = vrsqrt.f32 %v2234_v32 }
 0x379   :  { %v2476_v3 = vperm.slane %v2438_v51, %v2475_v52  ;;  %v2286_v31 = vmul.f32 %v2956_v43, %v2285_v36  ;;  %vm2302_vm4 = vmor %vm2300_vm3, %vm2301_vm0  ;;  %vm2310_vm8 = vweird.f32 %v2234_v32 }
 0x37a   :  { %v2296_v24 = vmul.f32 %v2958_v47, %v2295_v6 }
 0x37b   :  { %v2478_v62 = vsel %vm2477_vm13, %v2476_v3, %v2474_v28  ;;  %v2287_v12 = vmul.f32 0.5, %v2286_v31 }
 0x37c   :  { %v2482_v10 = vsel %vm2481_vm14, %v2480_v44, %v2478_v62  ;;  %v2297_v20 = vmul.f32 0.5, %v2296_v24 }
 0x37d   :  { %v2288_v38 = vsub.f32 1.5, %v2287_v12  ;;  %v3996_v29 = vpop.xlane.xlu1 %2114 }
 0x37e   :  { %v2298_v41 = vsub.f32 1.5, %v2297_v20  ;;  %v4022_v13 = vpop.eup %2959 }
 0x37f   :  { %v2289_v2 = vmul.f32 %v2956_v43, %v2288_v38  ;;  %vm2311_vm7 = vweird.f32 %v4022_v13 }
 0x380   :  { %v2299_v37 = vmul.f32 %v2958_v47, %v2298_v41  ;;  %vm4087_vm9 = vmor %vm2310_vm8, %vm2311_vm7 }
 0x381   :  { %v2293_v21 = vsel %vm2292_vm2, %v2956_v43, %v2289_v2 }
 0x382   :  { %v2408_v7 = vmul.f32 %v2293_v21, %v2109_v9  ;;  %v2303_v30 = vsel %vm2302_vm4, %v2958_v47, %v2299_v37 }
 0x383   :  { %v2409_v22 = vmul.f32 %v2303_v30, %v2111_v18 }
 0x384   :  { %v2424_v63 = vadd.f32 1.0, %v2408_v7 }
 0x385   :  { %v2425_v56 = vadd.f32 1.0, %v2409_v22  ;;  %v4000_v53 = vpop.xlane.xlu2 %2116  ;;  %v2211_v23 = vpop.xlane.xlu1 %2210 }
 0x386   :  { %v2440_v27 = vmul.f32 0.5, %v2424_v63  ;;  %v2213_v46 = vpop.xlane.xlu0 %2212  ;;  %v4012_v40 = vmul.f32 %v2211_v23, %v3956_v0 }
 0x387   :  { %v2441_v33 = vmul.f32 0.5, %v2425_v56  ;;  %v4015_v5 = vmul.f32 %v2213_v46, %v3954_v57  ;;  %v2305_v57 = vmul.f32 %v4022_v13, %v2234_v32 }
 0x388   :  { %v2484_v50 = vperm.slane %v2440_v27, %v2483_v34  ;;  %2961 = vrsqrt.f32 %v4012_v40  ;;  %vm2320_vm11 = vweird.f32 %v4012_v40 }
 0x389   :  { %v2488_v60 = vperm.slane %v2441_v33, %v2487_v42  ;;  %2963 = vrsqrt.f32 %v4015_v5  ;;  %v2306_v43 = vmul.f32 %v4022_v13, %v2305_v57  ;;  %vm2330_vm14 = vweird.f32 %v4015_v5 }
 0x38a   :  { %v2486_v15 = vsel %vm2485_vm5, %v2484_v50, %v2482_v10 }
 0x38b   :  { %v3998_v17 = vsel %vm2489_vm6, %v2488_v60, %v2486_v15  ;;  %v2307_v51 = vmul.f32 0.5, %v2306_v43 }
 0x38d   :  { %v2215_v58 = vpop.xlane.xlu2 %2214  ;;  %v2308_v20 = vsub.f32 1.5, %v2307_v51 }
 0x38e   :  { %v4009_v45 = vpop.xlane.xlu0 %2118  ;;  %v4019_v14 = vmul.f32 %v2215_v58, %v3974_v61  ;;  %v4028_v55 = vpop.eup %2961 }
 0x38f   :  { %v2315_v19 = vmul.f32 %v4028_v55, %v4012_v40  ;;  %vm2321_vm10 = vweird.f32 %v4028_v55 }
 0x390   :  { %2965 = vrsqrt.f32 %v4019_v14  ;;  %vm2322_vm13 = vmor %vm2320_vm11, %vm2321_vm10  ;;  %vm2340_vm1 = vweird.f32 %v4019_v14 }
 0x391   :  { %v2316_v47 = vmul.f32 %v4028_v55, %v2315_v19 }
 0x393   :  { %v2317_v18 = vmul.f32 0.5, %v2316_v47 }
 0x395   :  { %v4004_v54 = vpop.xlane.xlu1 %2120  ;;  %v2318_v7 = vsub.f32 1.5, %v2317_v18 }
 0x397   :  { %v2319_v15 = vmul.f32 %v4028_v55, %v2318_v7 }
 0x399   :  { %v2323_v19 = vsel %vm2322_vm13, %v4028_v55, %v2319_v15 }
 0x39d   :  { %v4007_v1 = vpop.xlane.xlu2 %2122  ;;  %v2217_v9 = vpop.xlane.xlu1 %2216 }
 0x39e   :  { %v4025_v49 = vmul.f32 %v2217_v9, %v3964_v8  ;;  %v2219_v28 = vpop.xlane.xlu0 %2218  ;;  %v4040_v8 = vpop.eup %2963 }
 0x39f   :  { %v4032_v16 = vmul.f32 %v2219_v28, %v3962_v25  ;;  %v4046_v39 = vpop.eup %2965  ;;  %v2325_v25 = vmul.f32 %v4040_v8, %v4015_v5  ;;  %vm2331_vm12 = vweird.f32 %v4040_v8  ;;  %v2411_v5 = vmul.f32 %v2323_v19, %v3996_v29 }
 0x3a0   :  { %2967 = vrsqrt.f32 %v4025_v49  ;;  %v2335_v36 = vmul.f32 %v4046_v39, %v4019_v14  ;;  %vm4106_vm15 = vmor %vm2330_vm14, %vm2331_vm12  ;;  %vm2341_vm0 = vweird.f32 %v4046_v39  ;;  %vm2350_vm4 = vweird.f32 %v4025_v49 }
 0x3a1   :  { %2969 = vrsqrt.f32 %v4032_v16  ;;  %v2326_v44 = vmul.f32 %v4040_v8, %v2325_v25  ;;  %vm4121_vm3 = vmor %vm2340_vm1, %vm2341_vm0  ;;  %vm2360_vm8 = vweird.f32 %v4032_v16  ;;  %vm2493_vm0 = vcmask 458112  }
 0x3a2   :  { %v2336_v38 = vmul.f32 %v4046_v39, %v2335_v36 }
 0x3a3   :  { %v2327_v41 = vmul.f32 0.5, %v2326_v44 }
 0x3a4   :  { %v2337_v30 = vmul.f32 0.5, %v2336_v38 }
 0x3a5   :  { %v2221_v0 = vpop.xlane.xlu2 %2220  ;;  %v2328_v22 = vsub.f32 1.5, %v2327_v41 }
 0x3a6   :  { %v4036_v61 = vmul.f32 %v2221_v0, %v3979_v4  ;;  %v4051_v4 = vpop.eup %2967  ;;  %v4063_v62 = vpop.xlane.xlu0 %2124  ;;  %v2338_v58 = vsub.f32 1.5, %v2337_v30 }
 0x3a7   :  { %v4059_v31 = vpop.eup %2969  ;;  %v2345_v24 = vmul.f32 %v4051_v4, %v4025_v49  ;;  %v2329_v32 = vmul.f32 %v4040_v8, %v2328_v22  ;;  %vm2351_vm2 = vweird.f32 %v4051_v4 }
 0x3a8   :  { %2971 = vrsqrt.f32 %v4036_v61  ;;  %v2355_v2 = vmul.f32 %v4059_v31, %v4032_v16  ;;  %v2339_v25 = vmul.f32 %v4046_v39, %v2338_v58  ;;  %vm4135_vm5 = vmor %vm2350_vm4, %vm2351_vm2  ;;  %vm2361_vm6 = vweird.f32 %v4059_v31 }
 0x3a9   :  { %v2346_v37 = vmul.f32 %v4051_v4, %v2345_v24  ;;  %v2333_v47 = vsel %vm4106_vm15, %v4040_v8, %v2329_v32  ;;  %vm4153_vm10 = vmor %vm2360_vm8, %vm2361_vm6  ;;  %vm2370_vm11 = vweird.f32 %v4036_v61  ;;  %v2499_v58 = vadd.s32 4294967232, %v3985_v59 }
 0x3aa   :  { %v2356_v34 = vmul.f32 %v4059_v31, %v2355_v2  ;;  %v2412_v29 = vmul.f32 %v2333_v47, %v4000_v53  ;;  %v2427_v2 = vadd.f32 1.0, %v2411_v5  ;;  %vm2497_vm2 = vcmask 523712  }
 0x3ab   :  { %v2347_v27 = vmul.f32 0.5, %v2346_v37  ;;  %vm2501_vm4 = vcmask 589312   ;;  %vm2505_vm6 = vcmask 654912   ;;  %v2511_v5 = vadd.s32 4294967208, %v3985_v59 }
 0x3ac   :  { %v2357_v9 = vmul.f32 0.5, %v2356_v34  ;;  %vm2509_vm8 = vcmask 720512  }
 0x3ad   :  { %v4038_v52 = vpop.xlane.xlu1 %2126  ;;  %v2348_v0 = vsub.f32 1.5, %v2347_v27 }
 0x3ae   :  { %v4068_v10 = vpop.eup %2971  ;;  %v2358_v55 = vsub.f32 1.5, %v2357_v9 }
 0x3af   :  { %v2365_v21 = vmul.f32 %v4068_v10, %v4036_v61  ;;  %vm2371_vm7 = vweird.f32 %v4068_v10 }
 0x3b0   :  { %v2359_v41 = vmul.f32 %v4059_v31, %v2358_v55  ;;  %vm4162_vm12 = vmor %vm2370_vm11, %vm2371_vm7  ;;  %vm2517_vm11 = vcmask 851712  }
 0x3b1   :  { %v2366_v35 = vmul.f32 %v4068_v10, %v2365_v21  ;;  %v2491_v21 = vadd.s32 4294967248, %v3985_v59 }
 0x3b2   :  { %v2363_v16 = vsel %vm4153_vm10, %v4059_v31, %v2359_v41  ;;  %vm2513_vm10 = vcmask 786112  }
 0x3b3   :  { %v2367_v57 = vmul.f32 0.5, %v2366_v35 }
 0x3b5   :  { %v4057_v6 = vpop.xlane.xlu2 %2128  ;;  %v2223_v3 = vpop.xlane.xlu1 %2222  ;;  %v2368_v36 = vsub.f32 1.5, %v2367_v57 }
 0x3b6   :  { %v4066_v12 = vmul.f32 %v2223_v3, %v3971_v11  ;;  %v2309_v11 = vmul.f32 %v4022_v13, %v2308_v20  ;;  %v2343_v20 = vsel %vm4121_vm3, %v4046_v39, %v2339_v25  ;;  %v2515_v3 = vadd.s32 4294967200, %v3985_v59 }
 0x3b7   :  { %v2369_v39 = vmul.f32 %v4068_v10, %v2368_v36 }
 0x3b8   :  { %2973 = vrsqrt.f32 %v4066_v12  ;;  %v2313_v46 = vsel %vm4087_vm9, %v4022_v13, %v2309_v11  ;;  %v2413_v11 = vmul.f32 %v2343_v20, %v4009_v45  ;;  %vm2380_vm13 = vweird.f32 %v4066_v12 }
 0x3b9   :  { %v2410_v40 = vmul.f32 %v2313_v46, %v4002_v26  ;;  %v2349_v26 = vmul.f32 %v4051_v4, %v2348_v0  ;;  %v2495_v45 = vadd.s32 4294967240, %v3985_v59  ;;  %v2373_v61 = vsel %vm4162_vm12, %v4068_v10, %v2369_v39 }
 0x3ba   :  { %v2429_v35 = vadd.f32 1.0, %v2413_v11  ;;  %v2415_v10 = vmul.f32 %v2363_v16, %v4007_v1  ;;  %v2416_v46 = vmul.f32 %v2373_v61, %v4063_v62  ;;  %v2503_v0 = vadd.s32 4294967224, %v3985_v59 }
 0x3bb   :  { %v2426_v18 = vadd.f32 1.0, %v2410_v40  ;;  %v2353_v53 = vsel %vm4135_vm5, %v4051_v4, %v2349_v26  ;;  %v2523_v39 = vadd.s32 4294967184, %v3985_v59  ;;  %vm2521_vm12 = vcmask 917312  }
 0x3bc   :  { %v2414_v4 = vmul.f32 %v2353_v53, %v4004_v54  ;;  %v2445_v57 = vmul.f32 0.5, %v2429_v35  ;;  %v2431_v19 = vadd.f32 1.0, %v2415_v10  ;;  %v2432_v43 = vadd.f32 1.0, %v2416_v46 }
 0x3bd   :  { %v2227_v63 = vpop.xlane.xlu2 %2226  ;;  %v2179_v42 = vpop.xlane.xlu1 %2178  ;;  %v2442_v7 = vmul.f32 0.5, %v2426_v18 }
 0x3be   :  { %v4080_v56 = vpop.eup %2973  ;;  %v4083_v33 = vmul.f32 %v2227_v63, %v2179_v42  ;;  %v4085_v50 = vpop.xlane.xlu0 %2130  ;;  %v2428_v63 = vadd.f32 1.0, %v2412_v29  ;;  %v2443_v42 = vmul.f32 0.5, %v2427_v2  ;;  %v2504_v26 = vperm.slane %v2445_v57, %v2503_v0 }
 0x3bf   :  { %v2375_v23 = vmul.f32 %v4080_v56, %v4066_v12  ;;  %vm2381_vm9 = vweird.f32 %v4080_v56  ;;  %v2492_v15 = vperm.slane %v2442_v7, %v2491_v21  ;;  %v2447_v36 = vmul.f32 0.5, %v2431_v19 }
 0x3c0   :  { %2975 = vrsqrt.f32 %v4083_v33  ;;  %vm4173_vm14 = vmor %vm2380_vm13, %vm2381_vm9  ;;  %vm2400_vm1 = vweird.f32 %v4083_v33  ;;  %v2496_v9 = vperm.slane %v2443_v42, %v2495_v45  ;;  %vm2525_vm13 = vcmask 982912  }
 0x3c1   :  { %v2376_v28 = vmul.f32 %v4080_v56, %v2375_v23  ;;  %v2430_v23 = vadd.f32 1.0, %v2414_v4  ;;  %v2494_v62 = vsel %vm2493_vm0, %v2492_v15, %v3998_v17 }
 0x3c3   :  { %v2377_v13 = vmul.f32 0.5, %v2376_v28  ;;  %v2444_v28 = vmul.f32 0.5, %v2428_v63  ;;  %v2446_v40 = vmul.f32 0.5, %v2430_v23 }
 0x3c5   :  { %v2378_v24 = vsub.f32 1.5, %v2377_v13  ;;  %v2500_v55 = vperm.slane %v2444_v28, %v2499_v58 }
 0x3c6   :  { %v4116_v51 = vpop.eup %2975  ;;  %v2225_v44 = vpop.xlane.xlu0 %2224 }
 0x3c7   :  { %v2395_v8 = vmul.f32 %v4116_v51, %v4083_v33  ;;  %v4128_v14 = vmul.f32 %v2225_v44, %v3969_v48  ;;  %v2379_v49 = vmul.f32 %v4080_v56, %v2378_v24  ;;  %vm2401_vm15 = vweird.f32 %v4116_v51 }
 0x3c8   :  { %vm2402_vm3 = vmor %vm2400_vm1, %vm2401_vm15  ;;  %v2507_v33 = vadd.s32 4294967216, %v3985_v59  ;;  %v2448_v24 = vmul.f32 0.5, %v2432_v43 }
 0x3c9   :  { %v2396_v48 = vmul.f32 %v4116_v51, %v2395_v8  ;;  %2977 = vrsqrt.f32 %v4128_v14  ;;  %v2383_v12 = vsel %vm4173_vm14, %v4080_v56, %v2379_v49  ;;  %vm2390_vm7 = vweird.f32 %v4128_v14 }
 0x3ca   :  { %v2417_v56 = vmul.f32 %v2383_v12, %v4038_v52  ;;  %v2508_v17 = vperm.slane %v2446_v40, %v2507_v33  ;;  %v2516_v2 = vperm.slane %v2448_v24, %v2515_v3  ;;  %vm2529_vm14 = vcmask 1048512  }
 0x3cb   :  { %v2397_v37 = vmul.f32 0.5, %v2396_v48  ;;  %v2512_v48 = vperm.slane %v2447_v36, %v2511_v5 }
 0x3cc   :  { %v2433_v52 = vadd.f32 1.0, %v2417_v56 }
 0x3cd   :  { %v2398_v34 = vsub.f32 1.5, %v2397_v37  ;;  %v2527_v37 = vadd.s32 4294967176, %v3985_v59 }
 0x3ce   :  { %v2449_v8 = vmul.f32 0.5, %v2433_v52 }
 0x3cf   :  { %v2978_v31 = vpop.eup %2977  ;;  %v2399_v27 = vmul.f32 %v4116_v51, %v2398_v34 }
 0x3d0   :  { %v2385_v60 = vmul.f32 %v2978_v31, %v4128_v14  ;;  %vm2391_vm5 = vweird.f32 %v2978_v31 }
 0x3d1   :  { %v2403_v1 = vsel %vm2402_vm3, %v4116_v51, %v2399_v27  ;;  %v2498_v51 = vsel %vm2497_vm2, %v2496_v9, %v2494_v62  ;;  %vm2392_vm9 = vmor %vm2390_vm7, %vm2391_vm5 }
 0x3d2   :  { %v2386_v32 = vmul.f32 %v2978_v31, %v2385_v60  ;;  %v2419_v25 = vmul.f32 %v2403_v1, %v4085_v50  ;;  %v2519_v50 = vadd.s32 4294967192, %v3985_v59  ;;  %v2502_v20 = vsel %vm2501_vm4, %v2500_v55, %v2498_v51 }
 0x3d3   :  { %v2506_v41 = vsel %vm2505_vm6, %v2504_v26, %v2502_v20 }
 0x3d4   :  { %v2387_v13 = vmul.f32 0.5, %v2386_v32  ;;  %v2435_v18 = vadd.f32 1.0, %v2419_v25  ;;  %v2510_v14 = vsel %vm2509_vm8, %v2508_v17, %v2506_v41  ;;  %v2520_v49 = vperm.slane %v2449_v8, %v2519_v50 }
 0x3d5   :  { %v2514_v11 = vsel %vm2513_vm10, %v2512_v48, %v2510_v14 }
 0x3d6   :  { %v2388_v47 = vsub.f32 1.5, %v2387_v13  ;;  %v2451_v21 = vmul.f32 0.5, %v2435_v18 }
 0x3d8   :  { %v2389_v44 = vmul.f32 %v2978_v31, %v2388_v47  ;;  %v2528_v4 = vperm.slane %v2451_v21, %v2527_v37 }
 0x3da   :  { %v2393_v29 = vsel %vm2392_vm9, %v2978_v31, %v2389_v44 }
 0x3db   :  { %v2418_v38 = vmul.f32 %v2393_v29, %v4057_v6  ;;  %v2518_v6 = vsel %vm2517_vm11, %v2516_v2, %v2514_v11 }
 0x3dc   :  { %v2522_v16 = vsel %vm2521_vm12, %v2520_v49, %v2518_v6 }
 0x3dd   :  { %v2434_v53 = vadd.f32 1.0, %v2418_v38 }
 0x3df   :  { %v2450_v7 = vmul.f32 0.5, %v2434_v53 }
 0x3e1   :  { %v2524_v30 = vperm.slane %v2450_v7, %v2523_v39 }
 0x3e3   :  { %v2526_v22 = vsel %vm2525_vm13, %v2524_v30, %v2522_v16 }
 0x3e4   :  { %v2530_v59 = vsel %vm2529_vm14, %v2528_v4, %v2526_v22 }
 0x3e5   :  { %2532 = vst [vmem:[#allocation11] sm:$0x1] %v2530_v59 }
 0x3e6   :  { %2543 = dma.vmem_to_hbm [thread:$0]  %s2539_s13, 16, %s2541_s16, [#allocation4]  }
 0x3e7   :  { %3130 = dma.done.wait [#allocation4], 16  }
 0x3e8   :  { %3131 = vsyncadd [#allocation4], 4294967280 }
 0x3e9   :  { %2548 = vsyncpa [#allocation3], 1 }
 0x3ea   :  { %2549 = vsyncpa [#allocation6], 1 }
 0x3eb   :  { %2550 = vsyncpa [#allocation9], 1 }
 0x3ec   :  { %2551 = vsyncpa [#allocation4], 1 }

</bundles_post_ra>
